<compile_context>
chip_gen: v7x
topology: tpu7x:2x2x1
jax: 0.10.0
libtpu: 0.0.40
codegen_flags: <defaults>
</compile_context>

<pallas_src>
from functools import partial

import numpy as np
import jax
import jax.numpy as jnp
from jax.experimental import pallas as pl
from jax.experimental.pallas import tpu as pltpu

_K = 5   # Conv1d kernel size (both convs)
_P = 4   # MaxPool1d(kernel_size=4, stride=4) (both pools)


def _prelu(y, alpha):
    return jnp.where(y > 0, y, alpha * y)


def _round_up(x, m):
    return ((x + m - 1) // m) * m


# ----------------------------------------------------------------------------
# Single fused kernel: conv1+pool, conv2+pool, flatten, 4-layer MLP head.
# ----------------------------------------------------------------------------
def triplet_embedding_kernel(
    xq_ref,      # (R1, Q)      f32  VMEM: xq[s1*Np+n, q] = x[n, P*s1 + q]
    w1q_ref,     # (Q, P*C1)    f32  VMEM: phase-expanded conv1 weight
    w2_ref,      # (K*C1, C2)   f32  VMEM: conv2 weight, rows (tap k, cin)
    bias_ref,    # (6, Hmax)    f32  VMEM: packed biases fc1,fc2,fc3,fc4,conv1,conv2
    alpha_ref,   # (1, 8)       f32  SMEM: PReLU alphas a1..a5
    w3_hbm,      # (L2p*C2,H1)  bf16 HBM(ANY): fc1 weight, rows (s2, c2)
    w4_hbm,      # (H1, H2)     bf16 HBM(ANY)
    w5_hbm,      # (H2, H3)     bf16 HBM(ANY)
    w6_hbm,      # (H3, 128)    bf16 HBM(ANY): fc4, zero-padded to 128 lanes
    out_ref,     # (Np, 128)    f32  VMEM: lane-dense output tile
    w3_v, w4_v, w5_v, w6_v,     # VMEM scratch for the prefetched MLP weights
    sems,                       # DMA semaphores, shape (4,)
    *, K, P, C1, C2, L2p, Np,
):
    # ---- prefetch the big MLP weights; DMAs overlap conv1/conv2 compute ----
    cp3 = pltpu.make_async_copy(w3_hbm, w3_v, sems.at[0]); cp3.start()
    cp4 = pltpu.make_async_copy(w4_hbm, w4_v, sems.at[1]); cp4.start()
    cp5 = pltpu.make_async_copy(w5_hbm, w5_v, sems.at[2]); cp5.start()
    cp6 = pltpu.make_async_copy(w6_hbm, w6_v, sems.at[3]); cp6.start()

    # Scalar reads before any .wait() (keeps SMEM sst->sld forwarding intact).
    a1 = alpha_ref[0, 0]; a2 = alpha_ref[0, 1]; a3 = alpha_ref[0, 2]
    a4 = alpha_ref[0, 3]; a5 = alpha_ref[0, 4]

    H1 = w3_v.shape[1]; H2 = w4_v.shape[1]; H3 = w5_v.shape[1]
    b3 = bias_ref[0:1, 0:H1]
    b4 = bias_ref[1:2, 0:H2]
    b5 = bias_ref[2:3, 0:H3]
    b6 = bias_ref[3:4, 0:out_ref.shape[1]]
    b1 = bias_ref[4:5, 0:C1]
    b2 = bias_ref[5:6, 0:C2]

    L2 = L2p * P

    # ---- conv1 + pool: one MXU matmul against the phase-expanded weight ----
    pre_all = jnp.dot(xq_ref[...], w1q_ref[...],
                      preferred_element_type=jnp.float32)       # (R1, P*C1)
    pre1 = pre_all[:, 0:C1]
    for j in range(1, P):                                        # pool over the P phases
        pre1 = jnp.maximum(pre1, pre_all[:, j * C1:(j + 1) * C1])
    # Bias + PReLU hoisted after the pooling max: exact because bias is phase-
    # uniform and PReLU is monotone for alpha >= 0 (asserted in prepare_params).
    h1 = _prelu(pre1 + b1, a1)                                   # (R1, C1), rows (s1, n)

    # ---- conv2: per-tap contiguous 128-row LHS slices, accumulated matmuls --
    y2 = b2                                                      # broadcasts to (L2*Np, C2)
    for k in range(K):
        lhs = h1[k * Np:(k + L2) * Np, :]                        # (L2*Np, C1), tile-aligned
        w2k = w2_ref[k * C1:(k + 1) * C1, :]                     # (C1, C2)
        y2 = y2 + jnp.dot(lhs, w2k, preferred_element_type=jnp.float32)
    y2 = _prelu(y2, a2)                                          # exact PReLU-before-pool

    # ---- MaxPool over conv2 positions: per-s2 row-block maxima (no concats) --
    blocks = []
    for s2 in range(L2p):
        blk = y2[(s2 * P) * Np:(s2 * P + 1) * Np, :]
        for j in range(1, P):
            blk = jnp.maximum(blk, y2[(s2 * P + j) * Np:(s2 * P + j + 1) * Np, :])
        blocks.append(blk.astype(jnp.bfloat16))                  # (Np, C2)

    # ---- fc1 with PyTorch's channel-major flatten folded into w3's rows ----
    cp3.wait()
    h = b3
    for s2 in range(L2p):
        h = h + jnp.dot(blocks[s2], w3_v[s2 * C2:(s2 + 1) * C2, :],
                        preferred_element_type=jnp.float32)
    h = _prelu(h, a3)                                            # (Np, H1)

    # ---- rest of the MLP head (f32 element-wise, bf16 MXU operands) --------
    cp4.wait()
    h = _prelu(jnp.dot(h.astype(jnp.bfloat16), w4_v[...],
                       preferred_element_type=jnp.float32) + b4, a4)   # (Np, H2)
    # TODO(synk): nn.Dropout(p=0.25) is identity in eval/inference mode; the
    # training-mode random mask is intentionally not implemented.
    cp5.wait()
    h = _prelu(jnp.dot(h.astype(jnp.bfloat16), w5_v[...],
                       preferred_element_type=jnp.float32) + b5, a5)   # (Np, H3)
    cp6.wait()
    out_ref[...] = (jnp.dot(h.astype(jnp.bfloat16), w6_v[...],
                            preferred_element_type=jnp.float32) + b6)  # (Np, 128)


# ----------------------------------------------------------------------------
# Wrapper: gather-free layout plumbing + the single pallas_call.
# ----------------------------------------------------------------------------
def embedding_forward(x, p, out_dim):
    """x: (N, L) f32 (N = concatenated triplet batch). Returns (N, out_dim)."""
    N, L = x.shape
    K, P = _K, _P
    Q = P + K - 1
    C1 = p["w1q"].shape[1] // P
    C2 = p["w2"].shape[1]
    L1 = L - (K - 1)
    L1p = L1 // P
    L2 = L1p - (K - 1)
    L2p = L2 // P
    assert L1 % P == 0 and L2 % P == 0
    assert p["w1q"].shape[0] == Q
    assert p["w2"].shape[0] == K * C1
    assert p["w3"].shape[0] == C2 * L2p
    assert K - 1 == P               # two-slab xq construction below relies on this

    Np = max(8, _round_up(N, 8))    # pad rows to a sublane-tile multiple
    R1 = L1p * Np

    x_pad = jnp.zeros((Np, L), jnp.float32).at[:N].set(x)
    # xq[s1*Np + n, q] = x[n, P*s1 + q], q in [0, Q): lane-dense (taps in the
    # lane dim), built with strided reshapes + one transpose (no gather HLO).
    xa = x_pad[:, :P * L1p].reshape(Np, L1p, P)              # q = 0..P-1
    xb = x_pad[:, P:P * L1p + P].reshape(Np, L1p, P)         # q = P..2P-1
    xq = jnp.concatenate([xa, xb], axis=2)                   # (Np, L1p, Q)
    xq = jnp.transpose(xq, (1, 0, 2)).reshape(R1, Q)         # rows (s1, n)

    kernel = partial(triplet_embedding_kernel,
                     K=K, P=P, C1=C1, C2=C2, L2p=L2p, Np=Np)

    vmem = pl.BlockSpec(memory_space=pltpu.MemorySpace.VMEM)
    smem = pl.BlockSpec(memory_space=pltpu.MemorySpace.SMEM)
    hbm = pl.BlockSpec(memory_space=pl.ANY)                  # manual prefetch in-kernel

    out = pl.pallas_call(
        kernel,
        out_shape=jax.ShapeDtypeStruct((Np, p["w6"].shape[1]), jnp.float32),
        in_specs=[vmem, vmem, vmem, vmem, smem, hbm, hbm, hbm, hbm],
        out_specs=vmem,
        scratch_shapes=[
            pltpu.VMEM(p["w3"].shape, p["w3"].dtype),
            pltpu.VMEM(p["w4"].shape, p["w4"].dtype),
            pltpu.VMEM(p["w5"].shape, p["w5"].dtype),
            pltpu.VMEM(p["w6"].shape, p["w6"].dtype),
            pltpu.SemaphoreType.DMA((4,)),
        ],
        compiler_params=pltpu.CompilerParams(
            vmem_limit_bytes=32 * 1024 * 1024),   # ample; actual use is ~1 MB
    )(xq, p["w1q"], p["w2"], p["biases"], p["alphas"],
      p["w3"], p["w4"], p["w5"], p["w6"])

    return out[:N, :out_dim]


@partial(jax.jit, static_argnums=(4,))
def triplet_net_forward(x1, x2, x3, params, out_dim):
    """TripletNet.forward: one fused kernel call over the concatenated batch."""
    B = x1.shape[0]
    emb = embedding_forward(jnp.concatenate([x1, x2, x3], axis=0),
                            params, out_dim)
    return emb[:B], emb[B:2 * B], emb[2 * B:3 * B]


# ----------------------------------------------------------------------------
# Synthetic PyTorch-shaped parameters + conversion to kernel layout.
# ----------------------------------------------------------------------------
def init_torch_params(key, out_dim=10):
    ks = jax.random.split(key, 12)
    s = 0.1

    def rnd(k, shape):
        return s * jax.random.normal(k, shape, jnp.float32)

    return dict(
        conv1_w=rnd(ks[0], (32, 1, 5)),    conv1_b=rnd(ks[1], (32,)),
        conv2_w=rnd(ks[2], (64, 32, 5)),   conv2_b=rnd(ks[3], (64,)),
        fc1_w=rnd(ks[4], (512, 256)),      fc1_b=rnd(ks[5], (512,)),   # LazyLinear->256 in
        fc2_w=rnd(ks[6], (256, 512)),      fc2_b=rnd(ks[7], (256,)),
        fc3_w=rnd(ks[8], (128, 256)),      fc3_b=rnd(ks[9], (128,)),
        fc4_w=rnd(ks[10], (out_dim, 128)), fc4_b=rnd(ks[11], (out_dim,)),
        prelu_alphas=jnp.full((5,), 0.25, jnp.float32),  # PReLU default init
    )


def prepare_params(tp):
    C1 = tp["conv1_w"].shape[0]          # 32
    C2 = tp["conv2_w"].shape[0]          # 64
    K = tp["conv1_w"].shape[2]           # 5
    P = _P
    Q = P + K - 1
    L2p = tp["fc1_w"].shape[1] // C2     # 4
    H1 = tp["fc1_w"].shape[0]            # 512
    H2 = tp["fc2_w"].shape[0]            # 256
    H3 = tp["fc3_w"].shape[0]            # 128
    out_dim = tp["fc4_w"].shape[0]
    h_last = tp["fc4_w"].shape[1]        # 128

    # conv1 bias+PReLU-after-maxpool hoist requires monotone PReLU (alpha >= 0).
    assert bool(jnp.all(tp["prelu_alphas"] >= 0))
    # TODO(synk): scalar-alpha PReLU per layer only; nn.PReLU(num_parameters=C)
    # would need per-channel alpha vectors instead of the (1, 8) SMEM scalars.

    # conv1 -> phase-expanded (Q, P*C1) MXU weight: Wq[q, j*C1+c] = w1[c, 0, q-j].
    w1_km = jnp.transpose(tp["conv1_w"][:, 0, :], (1, 0)).astype(jnp.float32)  # (K, C1)
    w1q = jnp.zeros((Q, P * C1), jnp.float32)
    for j in range(P):
        w1q = w1q.at[j:j + K, j * C1:(j + 1) * C1].set(w1_km)

    # conv2 weight: rows (tap k outer, cin inner); kept f32 (only ~40 KB DMA).
    w2 = jnp.transpose(tp["conv2_w"], (2, 1, 0)).reshape(K * C1, C2).astype(jnp.float32)

    # fc1 consumes torch-flatten order (feature = c2*L2p + s2); the kernel
    # produces per-s2 blocks -> permute fc1 weight rows once to (s2, c2).
    w3 = jnp.transpose(tp["fc1_w"], (1, 0))                             # (C2*L2p, H1)
    w3 = jnp.transpose(w3.reshape(C2, L2p, H1), (1, 0, 2)).reshape(C2 * L2p, H1)
    w4 = jnp.transpose(tp["fc2_w"], (1, 0))
    w5 = jnp.transpose(tp["fc3_w"], (1, 0))
    # Final linear zero-padded to 128 output lanes -> unmasked lane-dense store.
    out_pad = max(128, _round_up(out_dim, 128))
    w6 = jnp.zeros((h_last, out_pad), jnp.float32).at[:, :out_dim].set(
        jnp.transpose(tp["fc4_w"], (1, 0)))
    # bf16 for the big MLP weights (halves the dominant weight DMA); matmuls
    # still accumulate in f32 via preferred_element_type.
    w3, w4, w5, w6 = (w.astype(jnp.bfloat16) for w in (w3, w4, w5, w6))

    # Pack all six biases into one buffer -> one small DMA instead of six.
    Hmax = max(H1, H2, H3, out_pad, C1, C2)
    biases = jnp.zeros((6, Hmax), jnp.float32)
    biases = biases.at[0, :H1].set(tp["fc1_b"])
    biases = biases.at[1, :H2].set(tp["fc2_b"])
    biases = biases.at[2, :H3].set(tp["fc3_b"])
    biases = biases.at[3, :out_dim].set(tp["fc4_b"])
    biases = biases.at[4, :C1].set(tp["conv1_b"])
    biases = biases.at[5, :C2].set(tp["conv2_b"])

    alphas = jnp.zeros((1, 8), jnp.float32).at[0, :5].set(tp["prelu_alphas"])

    params = dict(w1q=w1q, w2=w2, biases=biases, alphas=alphas,
                  w3=w3, w4=w4, w5=w5, w6=w6)
    return params, out_dim


# ----------------------------------------------------------------------------
# Pure-JAX f32 reference of the embedding net (for a loose correctness check).
# ----------------------------------------------------------------------------
def _reference_embedding(x, tp):
    a = tp["prelu_alphas"]
    N, L = x.shape
    K = tp["conv1_w"].shape[2]
    # conv1 + PReLU + pool
    y = jnp.stack([x[:, k:L - K + 1 + k] for k in range(K)], axis=-1)   # (N, L1, K)
    y = jnp.einsum("nlk,ck->ncl", y, tp["conv1_w"][:, 0, :]) + tp["conv1_b"][None, :, None]
    y = _prelu(y, a[0])
    y = y.reshape(N, y.shape[1], y.shape[2] // _P, _P).max(axis=-1)     # (N, C1, L1p)
    # conv2 + PReLU + pool
    L1p = y.shape[2]
    y2 = jnp.stack([y[:, :, k:L1p - K + 1 + k] for k in range(K)], axis=-1)
    y2 = jnp.einsum("nclk,dck->ndl", y2, tp["conv2_w"]) + tp["conv2_b"][None, :, None]
    y2 = _prelu(y2, a[1])
    y2 = y2.reshape(N, y2.shape[1], y2.shape[2] // _P, _P).max(axis=-1)  # (N, C2, L2p)
    flat = y2.reshape(N, -1)                                             # channel-major
    h = _prelu(flat @ tp["fc1_w"].T + tp["fc1_b"], a[2])
    h = _prelu(h @ tp["fc2_w"].T + tp["fc2_b"], a[3])
    h = _prelu(h @ tp["fc3_w"].T + tp["fc3_b"], a[4])
    return h @ tp["fc4_w"].T + tp["fc4_b"]


if __name__ == "__main__":
    key = jax.random.PRNGKey(0)
    k1, k2, k3, kp = jax.random.split(key, 4)

    # Per-branch batch 2, seq len 84 -> conv/pool chain gives flatten size 256.
    B, L = 2, 84
    x1 = jax.random.normal(k1, (B, L), jnp.float32)
    x2 = jax.random.normal(k2, (B, L), jnp.float32)
    x3 = jax.random.normal(k3, (B, L), jnp.float32)

    torch_params = init_torch_params(kp, out_dim=10)
    params, out_dim = prepare_params(torch_params)

    o1, o2, o3 = triplet_net_forward(x1, x2, x3, params, out_dim)
    o1, o2, o3 = jax.block_until_ready((o1, o2, o3))

    assert o1.shape == (B, out_dim), o1.shape
    assert o2.shape == (B, out_dim), o2.shape
    assert o3.shape == (B, out_dim), o3.shape
    for o in (o1, o2, o3):
        assert bool(jnp.all(jnp.isfinite(o)))

    # Loose tolerance: MLP weights are bf16 in the kernel, reference is f32.
    ref = _reference_embedding(jnp.concatenate([x1, x2, x3], axis=0), torch_params)
    got = jnp.concatenate([o1, o2, o3], axis=0)
    np.testing.assert_allclose(np.asarray(got), np.asarray(ref), atol=5e-2, rtol=5e-2)

    print("KERNEL_OK")
</pallas_src>

<mosaic_0001>
module attributes {stable_mosaic.version = 11 : i64} {
  func.func @triplet_embedding_kernel(%arg0: memref<160x8xf32, #tpu.memory_space<vmem>>, %arg1: memref<8x128xf32, #tpu.memory_space<vmem>>, %arg2: memref<160x64xf32, #tpu.memory_space<vmem>>, %arg3: memref<6x512xf32, #tpu.memory_space<vmem>>, %arg4: memref<1x8xf32, #tpu.memory_space<smem>>, %arg5: memref<256x512xbf16, #tpu.memory_space<any>>, %arg6: memref<512x256xbf16, #tpu.memory_space<any>>, %arg7: memref<256x128xbf16, #tpu.memory_space<any>>, %arg8: memref<128x128xbf16, #tpu.memory_space<any>>, %arg9: memref<8x128xf32, #tpu.memory_space<vmem>>, %arg10: memref<256x512xbf16, #tpu.memory_space<vmem>>, %arg11: memref<512x256xbf16, #tpu.memory_space<vmem>>, %arg12: memref<256x128xbf16, #tpu.memory_space<vmem>>, %arg13: memref<128x128xbf16, #tpu.memory_space<vmem>>, %arg14: memref<4x!tpu.dma_semaphore, #tpu.memory_space<semaphore_mem>>) attributes {dimension_semantics = [], scalar_prefetch = 0 : i64, scratch_operands = 5 : i64, tpu.core_type = #tpu.core_type<tc>} {
    %c0_i32 = arith.constant 0 : i32
    %0 = tpu.memref_slice %arg14[%c0_i32] : memref<4x!tpu.dma_semaphore, #tpu.memory_space<semaphore_mem>> -> memref<1x!tpu.dma_semaphore, #tpu.memory_space<semaphore_mem>>
    %1 = tpu.memref_squeeze %0 : memref<1x!tpu.dma_semaphore, #tpu.memory_space<semaphore_mem>> -> memref<!tpu.dma_semaphore, #tpu.memory_space<semaphore_mem>>
    tpu.enqueue_dma source(%arg5 : memref<256x512xbf16, #tpu.memory_space<any>>) target(%arg10 : memref<256x512xbf16, #tpu.memory_space<vmem>>) target_semaphore(%1 : memref<!tpu.dma_semaphore, #tpu.memory_space<semaphore_mem>>)
    %c1_i32 = arith.constant 1 : i32
    %2 = tpu.memref_slice %arg14[%c1_i32] : memref<4x!tpu.dma_semaphore, #tpu.memory_space<semaphore_mem>> -> memref<1x!tpu.dma_semaphore, #tpu.memory_space<semaphore_mem>>
    %3 = tpu.memref_squeeze %2 : memref<1x!tpu.dma_semaphore, #tpu.memory_space<semaphore_mem>> -> memref<!tpu.dma_semaphore, #tpu.memory_space<semaphore_mem>>
    tpu.enqueue_dma source(%arg6 : memref<512x256xbf16, #tpu.memory_space<any>>) target(%arg11 : memref<512x256xbf16, #tpu.memory_space<vmem>>) target_semaphore(%3 : memref<!tpu.dma_semaphore, #tpu.memory_space<semaphore_mem>>)
    %c2_i32 = arith.constant 2 : i32
    %4 = tpu.memref_slice %arg14[%c2_i32] : memref<4x!tpu.dma_semaphore, #tpu.memory_space<semaphore_mem>> -> memref<1x!tpu.dma_semaphore, #tpu.memory_space<semaphore_mem>>
    %5 = tpu.memref_squeeze %4 : memref<1x!tpu.dma_semaphore, #tpu.memory_space<semaphore_mem>> -> memref<!tpu.dma_semaphore, #tpu.memory_space<semaphore_mem>>
    tpu.enqueue_dma source(%arg7 : memref<256x128xbf16, #tpu.memory_space<any>>) target(%arg12 : memref<256x128xbf16, #tpu.memory_space<vmem>>) target_semaphore(%5 : memref<!tpu.dma_semaphore, #tpu.memory_space<semaphore_mem>>)
    %c3_i32 = arith.constant 3 : i32
    %6 = tpu.memref_slice %arg14[%c3_i32] : memref<4x!tpu.dma_semaphore, #tpu.memory_space<semaphore_mem>> -> memref<1x!tpu.dma_semaphore, #tpu.memory_space<semaphore_mem>>
    %7 = tpu.memref_squeeze %6 : memref<1x!tpu.dma_semaphore, #tpu.memory_space<semaphore_mem>> -> memref<!tpu.dma_semaphore, #tpu.memory_space<semaphore_mem>>
    tpu.enqueue_dma source(%arg8 : memref<128x128xbf16, #tpu.memory_space<any>>) target(%arg13 : memref<128x128xbf16, #tpu.memory_space<vmem>>) target_semaphore(%7 : memref<!tpu.dma_semaphore, #tpu.memory_space<semaphore_mem>>)
    %c0 = arith.constant 0 : index
    %c0_0 = arith.constant 0 : index
    %8 = memref.load %arg4[%c0, %c0_0] : memref<1x8xf32, #tpu.memory_space<smem>>
    %c0_1 = arith.constant 0 : index
    %c1 = arith.constant 1 : index
    %9 = memref.load %arg4[%c0_1, %c1] : memref<1x8xf32, #tpu.memory_space<smem>>
    %c0_2 = arith.constant 0 : index
    %c2 = arith.constant 2 : index
    %10 = memref.load %arg4[%c0_2, %c2] : memref<1x8xf32, #tpu.memory_space<smem>>
    %c0_3 = arith.constant 0 : index
    %c3 = arith.constant 3 : index
    %11 = memref.load %arg4[%c0_3, %c3] : memref<1x8xf32, #tpu.memory_space<smem>>
    %c0_4 = arith.constant 0 : index
    %c4 = arith.constant 4 : index
    %12 = memref.load %arg4[%c0_4, %c4] : memref<1x8xf32, #tpu.memory_space<smem>>
    %c0_5 = arith.constant 0 : index
    %c0_6 = arith.constant 0 : index
    %13 = vector.load %arg3[%c0_5, %c0_6] : memref<6x512xf32, #tpu.memory_space<vmem>>, vector<1x512xf32>
    %c1_7 = arith.constant 1 : index
    %c0_8 = arith.constant 0 : index
    %14 = vector.load %arg3[%c1_7, %c0_8] : memref<6x512xf32, #tpu.memory_space<vmem>>, vector<1x256xf32>
    %c2_9 = arith.constant 2 : index
    %c0_10 = arith.constant 0 : index
    %15 = vector.load %arg3[%c2_9, %c0_10] : memref<6x512xf32, #tpu.memory_space<vmem>>, vector<1x128xf32>
    %c3_11 = arith.constant 3 : index
    %c0_12 = arith.constant 0 : index
    %16 = vector.load %arg3[%c3_11, %c0_12] : memref<6x512xf32, #tpu.memory_space<vmem>>, vector<1x128xf32>
    %c4_13 = arith.constant 4 : index
    %c0_14 = arith.constant 0 : index
    %17 = vector.load %arg3[%c4_13, %c0_14] : memref<6x512xf32, #tpu.memory_space<vmem>>, vector<1x32xf32>
    %c5 = arith.constant 5 : index
    %c0_15 = arith.constant 0 : index
    %18 = vector.load %arg3[%c5, %c0_15] : memref<6x512xf32, #tpu.memory_space<vmem>>, vector<1x64xf32>
    %c0_16 = arith.constant 0 : index
    %c0_17 = arith.constant 0 : index
    %19 = vector.load %arg0[%c0_16, %c0_17] : memref<160x8xf32, #tpu.memory_space<vmem>>, vector<160x8xf32>
    %c0_18 = arith.constant 0 : index
    %c0_19 = arith.constant 0 : index
    %20 = vector.load %arg1[%c0_18, %c0_19] : memref<8x128xf32, #tpu.memory_space<vmem>>, vector<8x128xf32>
    %cst = arith.constant dense<0.000000e+00> : vector<160x128xf32>
    %21 = tpu.matmul %19, %20, %cst {dimension_numbers = #tpu.dot_dimension_numbers<[1], [0], [0], [1], [0, 0, 1, 1], [], []>} : vector<160x8xf32>, vector<8x128xf32>, vector<160x128xf32> -> vector<160x128xf32>
    %22 = vector.extract_strided_slice %21 {offsets = [0, 0], sizes = [160, 32], strides = [1, 1]} : vector<160x128xf32> to vector<160x32xf32>
    %23 = vector.extract_strided_slice %21 {offsets = [0, 32], sizes = [160, 32], strides = [1, 1]} : vector<160x128xf32> to vector<160x32xf32>
    %24 = arith.maximumf %22, %23 : vector<160x32xf32>
    %25 = vector.extract_strided_slice %21 {offsets = [0, 64], sizes = [160, 32], strides = [1, 1]} : vector<160x128xf32> to vector<160x32xf32>
    %26 = arith.maximumf %24, %25 : vector<160x32xf32>
    %27 = vector.extract_strided_slice %21 {offsets = [0, 96], sizes = [160, 32], strides = [1, 1]} : vector<160x128xf32> to vector<160x32xf32>
    %28 = arith.maximumf %26, %27 : vector<160x32xf32>
    %29 = vector.broadcast %17 : vector<1x32xf32> to vector<160x32xf32>
    %30 = arith.addf %28, %29 : vector<160x32xf32>
    %cst_20 = arith.constant 0.000000e+00 : f32
    %31 = vector.broadcast %cst_20 : f32 to vector<160x32xf32>
    %32 = arith.cmpf ogt, %30, %31 : vector<160x32xf32>
    %33 = vector.broadcast %8 : f32 to vector<160x32xf32>
    %34 = arith.mulf %33, %30 : vector<160x32xf32>
    %35 = arith.select %32, %30, %34 : vector<160x32xi1>, vector<160x32xf32>
    %36 = vector.extract_strided_slice %35 {offsets = [0, 0], sizes = [128, 32], strides = [1, 1]} : vector<160x32xf32> to vector<128x32xf32>
    %c0_21 = arith.constant 0 : index
    %c0_22 = arith.constant 0 : index
    %37 = vector.load %arg2[%c0_21, %c0_22] : memref<160x64xf32, #tpu.memory_space<vmem>>, vector<32x64xf32>
    %cst_23 = arith.constant dense<0.000000e+00> : vector<128x64xf32>
    %38 = tpu.matmul %36, %37, %cst_23 {dimension_numbers = #tpu.dot_dimension_numbers<[1], [0], [0], [1], [0, 0, 1, 1], [], []>} : vector<128x32xf32>, vector<32x64xf32>, vector<128x64xf32> -> vector<128x64xf32>
    %39 = vector.broadcast %18 : vector<1x64xf32> to vector<128x64xf32>
    %40 = arith.addf %39, %38 : vector<128x64xf32>
    %41 = vector.extract_strided_slice %35 {offsets = [8, 0], sizes = [128, 32], strides = [1, 1]} : vector<160x32xf32> to vector<128x32xf32>
    %c32 = arith.constant 32 : index
    %c0_24 = arith.constant 0 : index
    %42 = vector.load %arg2[%c32, %c0_24] : memref<160x64xf32, #tpu.memory_space<vmem>>, vector<32x64xf32>
    %cst_25 = arith.constant dense<0.000000e+00> : vector<128x64xf32>
    %43 = tpu.matmul %41, %42, %cst_25 {dimension_numbers = #tpu.dot_dimension_numbers<[1], [0], [0], [1], [0, 0, 1, 1], [], []>} : vector<128x32xf32>, vector<32x64xf32>, vector<128x64xf32> -> vector<128x64xf32>
    %44 = arith.addf %40, %43 : vector<128x64xf32>
    %45 = vector.extract_strided_slice %35 {offsets = [16, 0], sizes = [128, 32], strides = [1, 1]} : vector<160x32xf32> to vector<128x32xf32>
    %c64 = arith.constant 64 : index
    %c0_26 = arith.constant 0 : index
    %46 = vector.load %arg2[%c64, %c0_26] : memref<160x64xf32, #tpu.memory_space<vmem>>, vector<32x64xf32>
    %cst_27 = arith.constant dense<0.000000e+00> : vector<128x64xf32>
    %47 = tpu.matmul %45, %46, %cst_27 {dimension_numbers = #tpu.dot_dimension_numbers<[1], [0], [0], [1], [0, 0, 1, 1], [], []>} : vector<128x32xf32>, vector<32x64xf32>, vector<128x64xf32> -> vector<128x64xf32>
    %48 = arith.addf %44, %47 : vector<128x64xf32>
    %49 = vector.extract_strided_slice %35 {offsets = [24, 0], sizes = [128, 32], strides = [1, 1]} : vector<160x32xf32> to vector<128x32xf32>
    %c96 = arith.constant 96 : index
    %c0_28 = arith.constant 0 : index
    %50 = vector.load %arg2[%c96, %c0_28] : memref<160x64xf32, #tpu.memory_space<vmem>>, vector<32x64xf32>
    %cst_29 = arith.constant dense<0.000000e+00> : vector<128x64xf32>
    %51 = tpu.matmul %49, %50, %cst_29 {dimension_numbers = #tpu.dot_dimension_numbers<[1], [0], [0], [1], [0, 0, 1, 1], [], []>} : vector<128x32xf32>, vector<32x64xf32>, vector<128x64xf32> -> vector<128x64xf32>
    %52 = arith.addf %48, %51 : vector<128x64xf32>
    %53 = vector.extract_strided_slice %35 {offsets = [32, 0], sizes = [128, 32], strides = [1, 1]} : vector<160x32xf32> to vector<128x32xf32>
    %c128 = arith.constant 128 : index
    %c0_30 = arith.constant 0 : index
    %54 = vector.load %arg2[%c128, %c0_30] : memref<160x64xf32, #tpu.memory_space<vmem>>, vector<32x64xf32>
    %cst_31 = arith.constant dense<0.000000e+00> : vector<128x64xf32>
    %55 = tpu.matmul %53, %54, %cst_31 {dimension_numbers = #tpu.dot_dimension_numbers<[1], [0], [0], [1], [0, 0, 1, 1], [], []>} : vector<128x32xf32>, vector<32x64xf32>, vector<128x64xf32> -> vector<128x64xf32>
    %56 = arith.addf %52, %55 : vector<128x64xf32>
    %cst_32 = arith.constant 0.000000e+00 : f32
    %57 = vector.broadcast %cst_32 : f32 to vector<128x64xf32>
    %58 = arith.cmpf ogt, %56, %57 : vector<128x64xf32>
    %59 = vector.broadcast %9 : f32 to vector<128x64xf32>
    %60 = arith.mulf %59, %56 : vector<128x64xf32>
    %61 = arith.select %58, %56, %60 : vector<128x64xi1>, vector<128x64xf32>
    %62 = vector.extract_strided_slice %61 {offsets = [0, 0], sizes = [8, 64], strides = [1, 1]} : vector<128x64xf32> to vector<8x64xf32>
    %63 = vector.extract_strided_slice %61 {offsets = [8, 0], sizes = [8, 64], strides = [1, 1]} : vector<128x64xf32> to vector<8x64xf32>
    %64 = arith.maximumf %62, %63 : vector<8x64xf32>
    %65 = vector.extract_strided_slice %61 {offsets = [16, 0], sizes = [8, 64], strides = [1, 1]} : vector<128x64xf32> to vector<8x64xf32>
    %66 = arith.maximumf %64, %65 : vector<8x64xf32>
    %67 = vector.extract_strided_slice %61 {offsets = [24, 0], sizes = [8, 64], strides = [1, 1]} : vector<128x64xf32> to vector<8x64xf32>
    %68 = arith.maximumf %66, %67 : vector<8x64xf32>
    %69 = arith.truncf %68 : vector<8x64xf32> to vector<8x64xbf16>
    %70 = vector.extract_strided_slice %61 {offsets = [32, 0], sizes = [8, 64], strides = [1, 1]} : vector<128x64xf32> to vector<8x64xf32>
    %71 = vector.extract_strided_slice %61 {offsets = [40, 0], sizes = [8, 64], strides = [1, 1]} : vector<128x64xf32> to vector<8x64xf32>
    %72 = arith.maximumf %70, %71 : vector<8x64xf32>
    %73 = vector.extract_strided_slice %61 {offsets = [48, 0], sizes = [8, 64], strides = [1, 1]} : vector<128x64xf32> to vector<8x64xf32>
    %74 = arith.maximumf %72, %73 : vector<8x64xf32>
    %75 = vector.extract_strided_slice %61 {offsets = [56, 0], sizes = [8, 64], strides = [1, 1]} : vector<128x64xf32> to vector<8x64xf32>
    %76 = arith.maximumf %74, %75 : vector<8x64xf32>
    %77 = arith.truncf %76 : vector<8x64xf32> to vector<8x64xbf16>
    %78 = vector.extract_strided_slice %61 {offsets = [64, 0], sizes = [8, 64], strides = [1, 1]} : vector<128x64xf32> to vector<8x64xf32>
    %79 = vector.extract_strided_slice %61 {offsets = [72, 0], sizes = [8, 64], strides = [1, 1]} : vector<128x64xf32> to vector<8x64xf32>
    %80 = arith.maximumf %78, %79 : vector<8x64xf32>
    %81 = vector.extract_strided_slice %61 {offsets = [80, 0], sizes = [8, 64], strides = [1, 1]} : vector<128x64xf32> to vector<8x64xf32>
    %82 = arith.maximumf %80, %81 : vector<8x64xf32>
    %83 = vector.extract_strided_slice %61 {offsets = [88, 0], sizes = [8, 64], strides = [1, 1]} : vector<128x64xf32> to vector<8x64xf32>
    %84 = arith.maximumf %82, %83 : vector<8x64xf32>
    %85 = arith.truncf %84 : vector<8x64xf32> to vector<8x64xbf16>
    %86 = vector.extract_strided_slice %61 {offsets = [96, 0], sizes = [8, 64], strides = [1, 1]} : vector<128x64xf32> to vector<8x64xf32>
    %87 = vector.extract_strided_slice %61 {offsets = [104, 0], sizes = [8, 64], strides = [1, 1]} : vector<128x64xf32> to vector<8x64xf32>
    %88 = arith.maximumf %86, %87 : vector<8x64xf32>
    %89 = vector.extract_strided_slice %61 {offsets = [112, 0], sizes = [8, 64], strides = [1, 1]} : vector<128x64xf32> to vector<8x64xf32>
    %90 = arith.maximumf %88, %89 : vector<8x64xf32>
    %91 = vector.extract_strided_slice %61 {offsets = [120, 0], sizes = [8, 64], strides = [1, 1]} : vector<128x64xf32> to vector<8x64xf32>
    %92 = arith.maximumf %90, %91 : vector<8x64xf32>
    %93 = arith.truncf %92 : vector<8x64xf32> to vector<8x64xbf16>
    %c0_i32_33 = arith.constant 0 : i32
    %94 = tpu.memref_slice %arg14[%c0_i32_33] : memref<4x!tpu.dma_semaphore, #tpu.memory_space<semaphore_mem>> -> memref<1x!tpu.dma_semaphore, #tpu.memory_space<semaphore_mem>>
    %95 = tpu.memref_squeeze %94 : memref<1x!tpu.dma_semaphore, #tpu.memory_space<semaphore_mem>> -> memref<!tpu.dma_semaphore, #tpu.memory_space<semaphore_mem>>
    tpu.wait_dma2 semaphore(%95 : memref<!tpu.dma_semaphore, #tpu.memory_space<semaphore_mem>>) src(%arg5 : memref<256x512xbf16, #tpu.memory_space<any>>) dst(%arg10 : memref<256x512xbf16, #tpu.memory_space<vmem>>)
    %c0_34 = arith.constant 0 : index
    %c0_35 = arith.constant 0 : index
    %96 = vector.load %arg10[%c0_34, %c0_35] : memref<256x512xbf16, #tpu.memory_space<vmem>>, vector<64x512xbf16>
    %cst_36 = arith.constant dense<0.000000e+00> : vector<8x512xf32>
    %97 = tpu.matmul %69, %96, %cst_36 {dimension_numbers = #tpu.dot_dimension_numbers<[1], [0], [0], [1], [0, 0, 1, 1], [], []>} : vector<8x64xbf16>, vector<64x512xbf16>, vector<8x512xf32> -> vector<8x512xf32>
    %98 = vector.broadcast %13 : vector<1x512xf32> to vector<8x512xf32>
    %99 = arith.addf %98, %97 : vector<8x512xf32>
    %c64_37 = arith.constant 64 : index
    %c0_38 = arith.constant 0 : index
    %100 = vector.load %arg10[%c64_37, %c0_38] : memref<256x512xbf16, #tpu.memory_space<vmem>>, vector<64x512xbf16>
    %cst_39 = arith.constant dense<0.000000e+00> : vector<8x512xf32>
    %101 = tpu.matmul %77, %100, %cst_39 {dimension_numbers = #tpu.dot_dimension_numbers<[1], [0], [0], [1], [0, 0, 1, 1], [], []>} : vector<8x64xbf16>, vector<64x512xbf16>, vector<8x512xf32> -> vector<8x512xf32>
    %102 = arith.addf %99, %101 : vector<8x512xf32>
    %c128_40 = arith.constant 128 : index
    %c0_41 = arith.constant 0 : index
    %103 = vector.load %arg10[%c128_40, %c0_41] : memref<256x512xbf16, #tpu.memory_space<vmem>>, vector<64x512xbf16>
    %cst_42 = arith.constant dense<0.000000e+00> : vector<8x512xf32>
    %104 = tpu.matmul %85, %103, %cst_42 {dimension_numbers = #tpu.dot_dimension_numbers<[1], [0], [0], [1], [0, 0, 1, 1], [], []>} : vector<8x64xbf16>, vector<64x512xbf16>, vector<8x512xf32> -> vector<8x512xf32>
    %105 = arith.addf %102, %104 : vector<8x512xf32>
    %c192 = arith.constant 192 : index
    %c0_43 = arith.constant 0 : index
    %106 = vector.load %arg10[%c192, %c0_43] : memref<256x512xbf16, #tpu.memory_space<vmem>>, vector<64x512xbf16>
    %cst_44 = arith.constant dense<0.000000e+00> : vector<8x512xf32>
    %107 = tpu.matmul %93, %106, %cst_44 {dimension_numbers = #tpu.dot_dimension_numbers<[1], [0], [0], [1], [0, 0, 1, 1], [], []>} : vector<8x64xbf16>, vector<64x512xbf16>, vector<8x512xf32> -> vector<8x512xf32>
    %108 = arith.addf %105, %107 : vector<8x512xf32>
    %cst_45 = arith.constant 0.000000e+00 : f32
    %109 = vector.broadcast %cst_45 : f32 to vector<8x512xf32>
    %110 = arith.cmpf ogt, %108, %109 : vector<8x512xf32>
    %111 = vector.broadcast %10 : f32 to vector<8x512xf32>
    %112 = arith.mulf %111, %108 : vector<8x512xf32>
    %113 = arith.select %110, %108, %112 : vector<8x512xi1>, vector<8x512xf32>
    %c1_i32_46 = arith.constant 1 : i32
    %114 = tpu.memref_slice %arg14[%c1_i32_46] : memref<4x!tpu.dma_semaphore, #tpu.memory_space<semaphore_mem>> -> memref<1x!tpu.dma_semaphore, #tpu.memory_space<semaphore_mem>>
    %115 = tpu.memref_squeeze %114 : memref<1x!tpu.dma_semaphore, #tpu.memory_space<semaphore_mem>> -> memref<!tpu.dma_semaphore, #tpu.memory_space<semaphore_mem>>
    tpu.wait_dma2 semaphore(%115 : memref<!tpu.dma_semaphore, #tpu.memory_space<semaphore_mem>>) src(%arg6 : memref<512x256xbf16, #tpu.memory_space<any>>) dst(%arg11 : memref<512x256xbf16, #tpu.memory_space<vmem>>)
    %116 = arith.truncf %113 : vector<8x512xf32> to vector<8x512xbf16>
    %c0_47 = arith.constant 0 : index
    %c0_48 = arith.constant 0 : index
    %117 = vector.load %arg11[%c0_47, %c0_48] : memref<512x256xbf16, #tpu.memory_space<vmem>>, vector<512x256xbf16>
    %cst_49 = arith.constant dense<0.000000e+00> : vector<8x256xf32>
    %118 = tpu.matmul %116, %117, %cst_49 {dimension_numbers = #tpu.dot_dimension_numbers<[1], [0], [0], [1], [0, 0, 1, 1], [], []>} : vector<8x512xbf16>, vector<512x256xbf16>, vector<8x256xf32> -> vector<8x256xf32>
    %119 = vector.broadcast %14 : vector<1x256xf32> to vector<8x256xf32>
    %120 = arith.addf %118, %119 : vector<8x256xf32>
    %cst_50 = arith.constant 0.000000e+00 : f32
    %121 = vector.broadcast %cst_50 : f32 to vector<8x256xf32>
    %122 = arith.cmpf ogt, %120, %121 : vector<8x256xf32>
    %123 = vector.broadcast %11 : f32 to vector<8x256xf32>
    %124 = arith.mulf %123, %120 : vector<8x256xf32>
    %125 = arith.select %122, %120, %124 : vector<8x256xi1>, vector<8x256xf32>
    %c2_i32_51 = arith.constant 2 : i32
    %126 = tpu.memref_slice %arg14[%c2_i32_51] : memref<4x!tpu.dma_semaphore, #tpu.memory_space<semaphore_mem>> -> memref<1x!tpu.dma_semaphore, #tpu.memory_space<semaphore_mem>>
    %127 = tpu.memref_squeeze %126 : memref<1x!tpu.dma_semaphore, #tpu.memory_space<semaphore_mem>> -> memref<!tpu.dma_semaphore, #tpu.memory_space<semaphore_mem>>
    tpu.wait_dma2 semaphore(%127 : memref<!tpu.dma_semaphore, #tpu.memory_space<semaphore_mem>>) src(%arg7 : memref<256x128xbf16, #tpu.memory_space<any>>) dst(%arg12 : memref<256x128xbf16, #tpu.memory_space<vmem>>)
    %128 = arith.truncf %125 : vector<8x256xf32> to vector<8x256xbf16>
    %c0_52 = arith.constant 0 : index
    %c0_53 = arith.constant 0 : index
    %129 = vector.load %arg12[%c0_52, %c0_53] : memref<256x128xbf16, #tpu.memory_space<vmem>>, vector<256x128xbf16>
    %cst_54 = arith.constant dense<0.000000e+00> : vector<8x128xf32>
    %130 = tpu.matmul %128, %129, %cst_54 {dimension_numbers = #tpu.dot_dimension_numbers<[1], [0], [0], [1], [0, 0, 1, 1], [], []>} : vector<8x256xbf16>, vector<256x128xbf16>, vector<8x128xf32> -> vector<8x128xf32>
    %131 = vector.broadcast %15 : vector<1x128xf32> to vector<8x128xf32>
    %132 = arith.addf %130, %131 : vector<8x128xf32>
    %cst_55 = arith.constant 0.000000e+00 : f32
    %133 = vector.broadcast %cst_55 : f32 to vector<8x128xf32>
    %134 = arith.cmpf ogt, %132, %133 : vector<8x128xf32>
    %135 = vector.broadcast %12 : f32 to vector<8x128xf32>
    %136 = arith.mulf %135, %132 : vector<8x128xf32>
    %137 = arith.select %134, %132, %136 : vector<8x128xi1>, vector<8x128xf32>
    %c3_i32_56 = arith.constant 3 : i32
    %138 = tpu.memref_slice %arg14[%c3_i32_56] : memref<4x!tpu.dma_semaphore, #tpu.memory_space<semaphore_mem>> -> memref<1x!tpu.dma_semaphore, #tpu.memory_space<semaphore_mem>>
    %139 = tpu.memref_squeeze %138 : memref<1x!tpu.dma_semaphore, #tpu.memory_space<semaphore_mem>> -> memref<!tpu.dma_semaphore, #tpu.memory_space<semaphore_mem>>
    tpu.wait_dma2 semaphore(%139 : memref<!tpu.dma_semaphore, #tpu.memory_space<semaphore_mem>>) src(%arg8 : memref<128x128xbf16, #tpu.memory_space<any>>) dst(%arg13 : memref<128x128xbf16, #tpu.memory_space<vmem>>)
    %140 = arith.truncf %137 : vector<8x128xf32> to vector<8x128xbf16>
    %c0_57 = arith.constant 0 : index
    %c0_58 = arith.constant 0 : index
    %141 = vector.load %arg13[%c0_57, %c0_58] : memref<128x128xbf16, #tpu.memory_space<vmem>>, vector<128x128xbf16>
    %cst_59 = arith.constant dense<0.000000e+00> : vector<8x128xf32>
    %142 = tpu.matmul %140, %141, %cst_59 {dimension_numbers = #tpu.dot_dimension_numbers<[1], [0], [0], [1], [0, 0, 1, 1], [], []>} : vector<8x128xbf16>, vector<128x128xbf16>, vector<8x128xf32> -> vector<8x128xf32>
    %143 = vector.broadcast %16 : vector<1x128xf32> to vector<8x128xf32>
    %144 = arith.addf %142, %143 : vector<8x128xf32>
    %c0_60 = arith.constant 0 : index
    %c0_61 = arith.constant 0 : index
    %145 = vector.load %arg9[%c0_60, %c0_61] : memref<8x128xf32, #tpu.memory_space<vmem>>, vector<8x128xf32>
    tpu.vector_store %arg9[%c0_60, %c0_61], %144 {strides = array<i32>} : memref<8x128xf32, #tpu.memory_space<vmem>>, vector<8x128xf32>,
    return
  }
}

</mosaic_0001>

<bundles_post_ra>
// kernel: triplet_net_forward.1
= control target key start
LH: loop header
LB: loop body
LE: loop exit
PB: predicated region body
PF: predicated region fallthrough
CT: control target
= control target key end

     0   :  { %14 = vsyncpa [#allocation8], 0  ;;  %s5823_s0 = inlined_call_operand.vmem [shape: f32[160,8], index: 0, kind: input, shape index: {}]   ;;  %s5824_s1 = inlined_call_operand.vmem [shape: f32[8,128], index: 1, kind: input, shape index: {}]   ;;  %s5825_s2 = inlined_call_operand.vmem [shape: f32[160,64], index: 2, kind: input, shape index: {}]   ;;  %s5826_s3 = inlined_call_operand.hbm [shape: f32[6,512], index: 3, kind: input, shape index: {}]   ;;  %s5827_s4 = inlined_call_operand.vmem [shape: f32[1,8], index: 4, kind: input, shape index: {}]   ;;  %s5828_s5 = inlined_call_operand.vmem [shape: bf16[256,512], index: 5, kind: input, shape index: {}]   ;;  %s5829_s6 = inlined_call_operand.vmem [shape: bf16[512,256], index: 6, kind: input, shape index: {}]   ;;  %s5830_s7 = inlined_call_operand.hbm [shape: bf16[256,128], index: 7, kind: input, shape index: {}]   ;;  %s5831_s8 = inlined_call_operand.vmem [shape: bf16[128,128], index: 8, kind: input, shape index: {}]   ;;  %s5832_s9 = inlined_call_operand.vmem [shape: f32[8,128], index: 9, kind: output, shape index: {}]  }
   0x1   :  { %15 = vsyncpa [#allocation9], 0  ;;  %s38_s11 = sshll.u32 %s5827_s4, 4  ;;  %s4325_s12 = smov [#allocation7]   ;;  %s39_s11 = int_to_ptr.vmem [resolvable:$true] %s38_s11 }
   0x2   :  { %s28_s13 = sshll.u32 %s4325_s12, 4  ;;  %s4257_s16 = scalar_lea.hbm %s5826_s3, 512  ;;  %s29_s13 = int_to_ptr.vmem [resolvable:$true] %s28_s13 }
   0x3   :  { %p4258_p0 = scmp.ne.s32.totalorder %s5826_s3, %s4257_s16  ;;  %p4261_p1 = scmp.lt.u32.totalorder %s4257_s16, %s5826_s3 }
   0x5   :  { %p4263_p2 = pnand %p4261_p1, %p4258_p0 }
   0x7   :  { %4266 = shalt.err (!%p4263_p2)
}
   0x8   :  { %s4267_s21 = scalar_lea.vmem %s29_s13, 512  ;;  %p4272_p4 = scmp.lt.s32.totalorder %s29_s13, %s29_s13 }
   0x9   :  { %p4268_p3 = scmp.ne.s32.totalorder %s29_s13, %s4267_s21  ;;  %p4273_p5 = scmp.lt.s32.totalorder %s4267_s21, %s4267_s21 }
   0xb   :  { %p4274_p6 = por %p4273_p5, %p4272_p4 }
   0xd   :  { %p4275_p7 = pnand %p4274_p6, %p4268_p3 }
   0xf   :  { %4278 = shalt.err (!%p4275_p7)
}
  0x10   :  { %31 = dma.hbm_to_vmem [thread:$0]  %s5826_s3, 512, %s29_s13, [#allocation8]  }
  0x11   :  { %s4279_s23 = scalar_lea.vmem %s39_s11, 16  ;;  %p4284_p9 = scmp.lt.s32.totalorder %s39_s11, %s39_s11 }
  0x12   :  { %p4280_p8 = scmp.ne.s32.totalorder %s39_s11, %s4279_s23  ;;  %p4285_p10 = scmp.lt.s32.totalorder %s4279_s23, %s4279_s23 }
  0x14   :  { %p4286_p11 = por %p4285_p10, %p4284_p9 }
  0x16   :  { %p4287_p12 = pnand %p4286_p11, %p4280_p8 }
  0x18   :  { %4290 = shalt.err (!%p4287_p12)
}
  0x19   :  { %s4326_s24 = smov [#allocation10]  }
  0x1a   :  { %41 = dma.vmem_to_smem %s39_s11, 16, %s4326_s24, [#allocation9]  }
  0x1b   :  { %4313 = dma.done.wait [#allocation8], 512  }
  0x1c   :  { %4314 = vsyncadd [#allocation8], 4294966784 }
  0x1d   :  { %4315 = dma.done.wait [#allocation9], 16  }
  0x1e   :  { %4316 = vsyncadd [#allocation9], 4294967280 }
  0x1f   :  { %48 = sfence }
  0x20   :  { %v67_v0 = vld [vmem:[%s5828_s5] sm:$0xf]  ;;  %v69_v1 = vld [vmem:[%s5828_s5 + $0x10] sm:$0xf]  ;;  %v71_v2 = vld [vmem:[%s5828_s5 + $0x4] sm:$0xf] }
  0x21   :  { %68 = vst [vmem:[#allocation2] sm:$0xf] %v67_v0  ;;  %70 = vst [vmem:[#allocation2 + $0x4] sm:$0xf] %v69_v1  ;;  %v73_v3 = vld [vmem:[%s5828_s5 + $0x14] sm:$0xf] }
  0x22   :  { %72 = vst [vmem:[#allocation2 + $0x8] sm:$0xf] %v71_v2  ;;  %v75_v4 = vld [vmem:[%s5828_s5 + $0x8] sm:$0xf]  ;;  %v77_v5 = vld [vmem:[%s5828_s5 + $0x18] sm:$0xf] }
  0x23   :  { %74 = vst [vmem:[#allocation2 + $0xc] sm:$0xf] %v73_v3  ;;  %76 = vst [vmem:[#allocation2 + $0x10] sm:$0xf] %v75_v4  ;;  %v79_v6 = vld [vmem:[%s5828_s5 + $0xc] sm:$0xf] }
  0x24   :  { %78 = vst [vmem:[#allocation2 + $0x14] sm:$0xf] %v77_v5  ;;  %v81_v7 = vld [vmem:[%s5828_s5 + $0x1c] sm:$0xff]   ;;  %v85_v8 = vld [vmem:[%s5828_s5 + $0x30] sm:$0xf] }
  0x25   :  { %80 = vst [vmem:[#allocation2 + $0x18] sm:$0xf] %v79_v6  ;;  %82 = vst [vmem:[#allocation2 + $0x1c] sm:$0xff] %v81_v7   ;;  %v87_v9 = vld [vmem:[%s5828_s5 + $0x24] sm:$0xf]  ;;  %v97_v14 = vld [vmem:[%s5828_s5 + $0x3c] sm:$0xff]  }
  0x26   :  { %86 = vst [vmem:[#allocation2 + $0x24] sm:$0xf] %v85_v8  ;;  %v89_v10 = vld [vmem:[%s5828_s5 + $0x34] sm:$0xf]  ;;  %v91_v11 = vld [vmem:[%s5828_s5 + $0x28] sm:$0xf] }
  0x27   :  { %88 = vst [vmem:[#allocation2 + $0x28] sm:$0xf] %v87_v9  ;;  %90 = vst [vmem:[#allocation2 + $0x2c] sm:$0xf] %v89_v10  ;;  %v93_v12 = vld [vmem:[%s5828_s5 + $0x38] sm:$0xf] }
  0x28   :  { %92 = vst [vmem:[#allocation2 + $0x30] sm:$0xf] %v91_v11  ;;  %v95_v13 = vld [vmem:[%s5828_s5 + $0x2c] sm:$0xf]  ;;  %94 = vst [vmem:[#allocation2 + $0x34] sm:$0xf] %v93_v12 }
  0x29   :  { %96 = vst [vmem:[#allocation2 + $0x38] sm:$0xf] %v95_v13  ;;  %98 = vst [vmem:[#allocation2 + $0x3c] sm:$0xff] %v97_v14   ;;  %v101_v15 = vld [vmem:[%s5828_s5 + $0x50] sm:$0xf]  ;;  %v113_v21 = vld [vmem:[%s5828_s5 + $0x5c] sm:$0xff]  }
  0x2a   :  { %v103_v16 = vld [vmem:[%s5828_s5 + $0x44] sm:$0xf]  ;;  %v105_v17 = vld [vmem:[%s5828_s5 + $0x54] sm:$0xf]  ;;  %102 = vst [vmem:[#allocation2 + $0x44] sm:$0xf] %v101_v15 }
  0x2b   :  { %104 = vst [vmem:[#allocation2 + $0x48] sm:$0xf] %v103_v16  ;;  %106 = vst [vmem:[#allocation2 + $0x4c] sm:$0xf] %v105_v17  ;;  %v107_v18 = vld [vmem:[%s5828_s5 + $0x48] sm:$0xf] }
  0x2c   :  { %v109_v19 = vld [vmem:[%s5828_s5 + $0x58] sm:$0xf]  ;;  %v111_v20 = vld [vmem:[%s5828_s5 + $0x4c] sm:$0xf]  ;;  %108 = vst [vmem:[#allocation2 + $0x50] sm:$0xf] %v107_v18 }
  0x2d   :  { %110 = vst [vmem:[#allocation2 + $0x54] sm:$0xf] %v109_v19  ;;  %112 = vst [vmem:[#allocation2 + $0x58] sm:$0xf] %v111_v20  ;;  %v117_v22 = vld [vmem:[%s5828_s5 + $0x70] sm:$0xf] }
  0x2e   :  { %v119_v23 = vld [vmem:[%s5828_s5 + $0x64] sm:$0xf]  ;;  %114 = vst [vmem:[#allocation2 + $0x5c] sm:$0xff] %v113_v21   ;;  %118 = vst [vmem:[#allocation2 + $0x64] sm:$0xf] %v117_v22  ;;  %v129_v28 = vld [vmem:[%s5828_s5 + $0x7c] sm:$0xff]  }
  0x2f   :  { %120 = vst [vmem:[#allocation2 + $0x68] sm:$0xf] %v119_v23  ;;  %v121_v24 = vld [vmem:[%s5828_s5 + $0x74] sm:$0xf]  ;;  %v123_v25 = vld [vmem:[%s5828_s5 + $0x68] sm:$0xf] }
  0x30   :  { %v125_v26 = vld [vmem:[%s5828_s5 + $0x78] sm:$0xf]  ;;  %122 = vst [vmem:[#allocation2 + $0x6c] sm:$0xf] %v121_v24  ;;  %124 = vst [vmem:[#allocation2 + $0x70] sm:$0xf] %v123_v25 }
  0x31   :  { %126 = vst [vmem:[#allocation2 + $0x74] sm:$0xf] %v125_v26  ;;  %v127_v27 = vld [vmem:[%s5828_s5 + $0x6c] sm:$0xf]  ;;  %v133_v29 = vld [vmem:[%s5828_s5 + $0x90] sm:$0xf] }
  0x32   :  { %128 = vst [vmem:[#allocation2 + $0x78] sm:$0xf] %v127_v27  ;;  %130 = vst [vmem:[#allocation2 + $0x7c] sm:$0xff] %v129_v28   ;;  %v135_v30 = vld [vmem:[%s5828_s5 + $0x84] sm:$0xf]  ;;  %v145_v35 = vld [vmem:[%s5828_s5 + $0x9c] sm:$0xff]  }
  0x33   :  { %134 = vst [vmem:[#allocation2 + $0x84] sm:$0xf] %v133_v29  ;;  %v137_v31 = vld [vmem:[%s5828_s5 + $0x94] sm:$0xf]  ;;  %v139_v32 = vld [vmem:[%s5828_s5 + $0x88] sm:$0xf] }
  0x34   :  { %136 = vst [vmem:[#allocation2 + $0x88] sm:$0xf] %v135_v30  ;;  %138 = vst [vmem:[#allocation2 + $0x8c] sm:$0xf] %v137_v31  ;;  %v141_v33 = vld [vmem:[%s5828_s5 + $0x98] sm:$0xf] }
  0x35   :  { %140 = vst [vmem:[#allocation2 + $0x90] sm:$0xf] %v139_v32  ;;  %v143_v34 = vld [vmem:[%s5828_s5 + $0x8c] sm:$0xf]  ;;  %142 = vst [vmem:[#allocation2 + $0x94] sm:$0xf] %v141_v33 }
  0x36   :  { %144 = vst [vmem:[#allocation2 + $0x98] sm:$0xf] %v143_v34  ;;  %146 = vst [vmem:[#allocation2 + $0x9c] sm:$0xff] %v145_v35   ;;  %v149_v36 = vld [vmem:[%s5828_s5 + $0xb0] sm:$0xf]  ;;  %v161_v42 = vld [vmem:[%s5828_s5 + $0xbc] sm:$0xff]  }
  0x37   :  { %v151_v37 = vld [vmem:[%s5828_s5 + $0xa4] sm:$0xf]  ;;  %v153_v38 = vld [vmem:[%s5828_s5 + $0xb4] sm:$0xf]  ;;  %150 = vst [vmem:[#allocation2 + $0xa4] sm:$0xf] %v149_v36 }
  0x38   :  { %152 = vst [vmem:[#allocation2 + $0xa8] sm:$0xf] %v151_v37  ;;  %154 = vst [vmem:[#allocation2 + $0xac] sm:$0xf] %v153_v38  ;;  %v155_v39 = vld [vmem:[%s5828_s5 + $0xa8] sm:$0xf] }
  0x39   :  { %v157_v40 = vld [vmem:[%s5828_s5 + $0xb8] sm:$0xf]  ;;  %v159_v41 = vld [vmem:[%s5828_s5 + $0xac] sm:$0xf]  ;;  %156 = vst [vmem:[#allocation2 + $0xb0] sm:$0xf] %v155_v39 }
  0x3a   :  { %158 = vst [vmem:[#allocation2 + $0xb4] sm:$0xf] %v157_v40  ;;  %160 = vst [vmem:[#allocation2 + $0xb8] sm:$0xf] %v159_v41  ;;  %v165_v43 = vld [vmem:[%s5828_s5 + $0xd0] sm:$0xf] }
  0x3b   :  { %v167_v44 = vld [vmem:[%s5828_s5 + $0xc4] sm:$0xf]  ;;  %162 = vst [vmem:[#allocation2 + $0xbc] sm:$0xff] %v161_v42   ;;  %166 = vst [vmem:[#allocation2 + $0xc4] sm:$0xf] %v165_v43  ;;  %v177_v49 = vld [vmem:[%s5828_s5 + $0xdc] sm:$0xff]  }
  0x3c   :  { %168 = vst [vmem:[#allocation2 + $0xc8] sm:$0xf] %v167_v44  ;;  %v169_v45 = vld [vmem:[%s5828_s5 + $0xd4] sm:$0xf]  ;;  %v171_v46 = vld [vmem:[%s5828_s5 + $0xc8] sm:$0xf] }
  0x3d   :  { %v173_v47 = vld [vmem:[%s5828_s5 + $0xd8] sm:$0xf]  ;;  %170 = vst [vmem:[#allocation2 + $0xcc] sm:$0xf] %v169_v45  ;;  %172 = vst [vmem:[#allocation2 + $0xd0] sm:$0xf] %v171_v46 }
  0x3e   :  { %174 = vst [vmem:[#allocation2 + $0xd4] sm:$0xf] %v173_v47  ;;  %v175_v48 = vld [vmem:[%s5828_s5 + $0xcc] sm:$0xf]  ;;  %v181_v50 = vld [vmem:[%s5828_s5 + $0xf0] sm:$0xf] }
  0x3f   :  { %176 = vst [vmem:[#allocation2 + $0xd8] sm:$0xf] %v175_v48  ;;  %178 = vst [vmem:[#allocation2 + $0xdc] sm:$0xff] %v177_v49   ;;  %v183_v51 = vld [vmem:[%s5828_s5 + $0xe4] sm:$0xf]  ;;  %v193_v56 = vld [vmem:[%s5828_s5 + $0xfc] sm:$0xff]  }
  0x40   :  { %182 = vst [vmem:[#allocation2 + $0xe4] sm:$0xf] %v181_v50  ;;  %v185_v52 = vld [vmem:[%s5828_s5 + $0xf4] sm:$0xf]  ;;  %v187_v53 = vld [vmem:[%s5828_s5 + $0xe8] sm:$0xf] }
  0x41   :  { %184 = vst [vmem:[#allocation2 + $0xe8] sm:$0xf] %v183_v51  ;;  %186 = vst [vmem:[#allocation2 + $0xec] sm:$0xf] %v185_v52  ;;  %v189_v54 = vld [vmem:[%s5828_s5 + $0xf8] sm:$0xf] }
  0x42   :  { %188 = vst [vmem:[#allocation2 + $0xf0] sm:$0xf] %v187_v53  ;;  %v191_v55 = vld [vmem:[%s5828_s5 + $0xec] sm:$0xf]  ;;  %190 = vst [vmem:[#allocation2 + $0xf4] sm:$0xf] %v189_v54 }
  0x43   :  { %192 = vst [vmem:[#allocation2 + $0xf8] sm:$0xf] %v191_v55  ;;  %194 = vst [vmem:[#allocation2 + $0xfc] sm:$0xff] %v193_v56   ;;  %v197_v57 = vld [vmem:[%s5828_s5 + $0x110] sm:$0xf]  ;;  %v209_v63 = vld [vmem:[%s5828_s5 + $0x11c] sm:$0xff]  }
  0x44   :  { %v199_v58 = vld [vmem:[%s5828_s5 + $0x104] sm:$0xf]  ;;  %v201_v59 = vld [vmem:[%s5828_s5 + $0x114] sm:$0xf]  ;;  %198 = vst [vmem:[#allocation2 + $0x104] sm:$0xf] %v197_v57 }
  0x45   :  { %200 = vst [vmem:[#allocation2 + $0x108] sm:$0xf] %v199_v58  ;;  %202 = vst [vmem:[#allocation2 + $0x10c] sm:$0xf] %v201_v59  ;;  %v203_v60 = vld [vmem:[%s5828_s5 + $0x108] sm:$0xf] }
  0x46   :  { %v205_v61 = vld [vmem:[%s5828_s5 + $0x118] sm:$0xf]  ;;  %v207_v62 = vld [vmem:[%s5828_s5 + $0x10c] sm:$0xf]  ;;  %204 = vst [vmem:[#allocation2 + $0x110] sm:$0xf] %v203_v60 }
  0x47   :  { %206 = vst [vmem:[#allocation2 + $0x114] sm:$0xf] %v205_v61  ;;  %208 = vst [vmem:[#allocation2 + $0x118] sm:$0xf] %v207_v62  ;;  %v213_v0 = vld [vmem:[%s5828_s5 + $0x130] sm:$0xf] }
  0x48   :  { %v215_v1 = vld [vmem:[%s5828_s5 + $0x124] sm:$0xf]  ;;  %210 = vst [vmem:[#allocation2 + $0x11c] sm:$0xff] %v209_v63   ;;  %214 = vst [vmem:[#allocation2 + $0x124] sm:$0xf] %v213_v0  ;;  %v225_v6 = vld [vmem:[%s5828_s5 + $0x13c] sm:$0xff]  }
  0x49   :  { %216 = vst [vmem:[#allocation2 + $0x128] sm:$0xf] %v215_v1  ;;  %v217_v2 = vld [vmem:[%s5828_s5 + $0x134] sm:$0xf]  ;;  %v219_v3 = vld [vmem:[%s5828_s5 + $0x128] sm:$0xf] }
  0x4a   :  { %v221_v4 = vld [vmem:[%s5828_s5 + $0x138] sm:$0xf]  ;;  %218 = vst [vmem:[#allocation2 + $0x12c] sm:$0xf] %v217_v2  ;;  %220 = vst [vmem:[#allocation2 + $0x130] sm:$0xf] %v219_v3 }
  0x4b   :  { %222 = vst [vmem:[#allocation2 + $0x134] sm:$0xf] %v221_v4  ;;  %v223_v5 = vld [vmem:[%s5828_s5 + $0x12c] sm:$0xf]  ;;  %v229_v7 = vld [vmem:[%s5828_s5 + $0x150] sm:$0xf] }
  0x4c   :  { %224 = vst [vmem:[#allocation2 + $0x138] sm:$0xf] %v223_v5  ;;  %226 = vst [vmem:[#allocation2 + $0x13c] sm:$0xff] %v225_v6   ;;  %v231_v8 = vld [vmem:[%s5828_s5 + $0x144] sm:$0xf]  ;;  %v241_v13 = vld [vmem:[%s5828_s5 + $0x15c] sm:$0xff]  }
  0x4d   :  { %230 = vst [vmem:[#allocation2 + $0x144] sm:$0xf] %v229_v7  ;;  %v233_v9 = vld [vmem:[%s5828_s5 + $0x154] sm:$0xf]  ;;  %v235_v10 = vld [vmem:[%s5828_s5 + $0x148] sm:$0xf] }
  0x4e   :  { %232 = vst [vmem:[#allocation2 + $0x148] sm:$0xf] %v231_v8  ;;  %234 = vst [vmem:[#allocation2 + $0x14c] sm:$0xf] %v233_v9  ;;  %v237_v11 = vld [vmem:[%s5828_s5 + $0x158] sm:$0xf] }
  0x4f   :  { %236 = vst [vmem:[#allocation2 + $0x150] sm:$0xf] %v235_v10  ;;  %v239_v12 = vld [vmem:[%s5828_s5 + $0x14c] sm:$0xf]  ;;  %238 = vst [vmem:[#allocation2 + $0x154] sm:$0xf] %v237_v11 }
  0x50   :  { %240 = vst [vmem:[#allocation2 + $0x158] sm:$0xf] %v239_v12  ;;  %242 = vst [vmem:[#allocation2 + $0x15c] sm:$0xff] %v241_v13   ;;  %v245_v14 = vld [vmem:[%s5828_s5 + $0x170] sm:$0xf]  ;;  %v257_v20 = vld [vmem:[%s5828_s5 + $0x17c] sm:$0xff]  }
  0x51   :  { %v247_v15 = vld [vmem:[%s5828_s5 + $0x164] sm:$0xf]  ;;  %v249_v16 = vld [vmem:[%s5828_s5 + $0x174] sm:$0xf]  ;;  %246 = vst [vmem:[#allocation2 + $0x164] sm:$0xf] %v245_v14 }
  0x52   :  { %248 = vst [vmem:[#allocation2 + $0x168] sm:$0xf] %v247_v15  ;;  %250 = vst [vmem:[#allocation2 + $0x16c] sm:$0xf] %v249_v16  ;;  %v251_v17 = vld [vmem:[%s5828_s5 + $0x168] sm:$0xf] }
  0x53   :  { %v253_v18 = vld [vmem:[%s5828_s5 + $0x178] sm:$0xf]  ;;  %v255_v19 = vld [vmem:[%s5828_s5 + $0x16c] sm:$0xf]  ;;  %252 = vst [vmem:[#allocation2 + $0x170] sm:$0xf] %v251_v17 }
  0x54   :  { %254 = vst [vmem:[#allocation2 + $0x174] sm:$0xf] %v253_v18  ;;  %256 = vst [vmem:[#allocation2 + $0x178] sm:$0xf] %v255_v19  ;;  %v261_v21 = vld [vmem:[%s5828_s5 + $0x190] sm:$0xf] }
  0x55   :  { %v263_v22 = vld [vmem:[%s5828_s5 + $0x184] sm:$0xf]  ;;  %258 = vst [vmem:[#allocation2 + $0x17c] sm:$0xff] %v257_v20   ;;  %262 = vst [vmem:[#allocation2 + $0x184] sm:$0xf] %v261_v21  ;;  %v273_v27 = vld [vmem:[%s5828_s5 + $0x19c] sm:$0xff]  }
  0x56   :  { %264 = vst [vmem:[#allocation2 + $0x188] sm:$0xf] %v263_v22  ;;  %v265_v23 = vld [vmem:[%s5828_s5 + $0x194] sm:$0xf]  ;;  %v267_v24 = vld [vmem:[%s5828_s5 + $0x188] sm:$0xf] }
  0x57   :  { %v269_v25 = vld [vmem:[%s5828_s5 + $0x198] sm:$0xf]  ;;  %266 = vst [vmem:[#allocation2 + $0x18c] sm:$0xf] %v265_v23  ;;  %268 = vst [vmem:[#allocation2 + $0x190] sm:$0xf] %v267_v24 }
  0x58   :  { %270 = vst [vmem:[#allocation2 + $0x194] sm:$0xf] %v269_v25  ;;  %v271_v26 = vld [vmem:[%s5828_s5 + $0x18c] sm:$0xf]  ;;  %v277_v28 = vld [vmem:[%s5828_s5 + $0x1b0] sm:$0xf] }
  0x59   :  { %272 = vst [vmem:[#allocation2 + $0x198] sm:$0xf] %v271_v26  ;;  %274 = vst [vmem:[#allocation2 + $0x19c] sm:$0xff] %v273_v27   ;;  %v279_v29 = vld [vmem:[%s5828_s5 + $0x1a4] sm:$0xf]  ;;  %v289_v34 = vld [vmem:[%s5828_s5 + $0x1bc] sm:$0xff]  }
  0x5a   :  { %278 = vst [vmem:[#allocation2 + $0x1a4] sm:$0xf] %v277_v28  ;;  %v281_v30 = vld [vmem:[%s5828_s5 + $0x1b4] sm:$0xf]  ;;  %v283_v31 = vld [vmem:[%s5828_s5 + $0x1a8] sm:$0xf] }
  0x5b   :  { %280 = vst [vmem:[#allocation2 + $0x1a8] sm:$0xf] %v279_v29  ;;  %282 = vst [vmem:[#allocation2 + $0x1ac] sm:$0xf] %v281_v30  ;;  %v285_v32 = vld [vmem:[%s5828_s5 + $0x1b8] sm:$0xf] }
  0x5c   :  { %284 = vst [vmem:[#allocation2 + $0x1b0] sm:$0xf] %v283_v31  ;;  %v287_v33 = vld [vmem:[%s5828_s5 + $0x1ac] sm:$0xf]  ;;  %286 = vst [vmem:[#allocation2 + $0x1b4] sm:$0xf] %v285_v32 }
  0x5d   :  { %288 = vst [vmem:[#allocation2 + $0x1b8] sm:$0xf] %v287_v33  ;;  %290 = vst [vmem:[#allocation2 + $0x1bc] sm:$0xff] %v289_v34   ;;  %v293_v35 = vld [vmem:[%s5828_s5 + $0x1d0] sm:$0xf]  ;;  %v305_v41 = vld [vmem:[%s5828_s5 + $0x1dc] sm:$0xff]  }
  0x5e   :  { %v295_v36 = vld [vmem:[%s5828_s5 + $0x1c4] sm:$0xf]  ;;  %v297_v37 = vld [vmem:[%s5828_s5 + $0x1d4] sm:$0xf]  ;;  %294 = vst [vmem:[#allocation2 + $0x1c4] sm:$0xf] %v293_v35 }
  0x5f   :  { %296 = vst [vmem:[#allocation2 + $0x1c8] sm:$0xf] %v295_v36  ;;  %298 = vst [vmem:[#allocation2 + $0x1cc] sm:$0xf] %v297_v37  ;;  %v299_v38 = vld [vmem:[%s5828_s5 + $0x1c8] sm:$0xf] }
  0x60   :  { %v301_v39 = vld [vmem:[%s5828_s5 + $0x1d8] sm:$0xf]  ;;  %v303_v40 = vld [vmem:[%s5828_s5 + $0x1cc] sm:$0xf]  ;;  %300 = vst [vmem:[#allocation2 + $0x1d0] sm:$0xf] %v299_v38 }
  0x61   :  { %302 = vst [vmem:[#allocation2 + $0x1d4] sm:$0xf] %v301_v39  ;;  %304 = vst [vmem:[#allocation2 + $0x1d8] sm:$0xf] %v303_v40  ;;  %v309_v42 = vld [vmem:[%s5828_s5 + $0x1f0] sm:$0xf] }
  0x62   :  { %v311_v43 = vld [vmem:[%s5828_s5 + $0x1e4] sm:$0xf]  ;;  %306 = vst [vmem:[#allocation2 + $0x1dc] sm:$0xff] %v305_v41   ;;  %310 = vst [vmem:[#allocation2 + $0x1e4] sm:$0xf] %v309_v42 }
  0x63   :  { %312 = vst [vmem:[#allocation2 + $0x1e8] sm:$0xf] %v311_v43  ;;  %v313_v44 = vld [vmem:[%s5828_s5 + $0x1f4] sm:$0xf]  ;;  %v315_v45 = vld [vmem:[%s5828_s5 + $0x1e8] sm:$0xf] }
  0x64   :  { %v317_v46 = vld [vmem:[%s5828_s5 + $0x1f8] sm:$0xf]  ;;  %314 = vst [vmem:[#allocation2 + $0x1ec] sm:$0xf] %v313_v44  ;;  %316 = vst [vmem:[#allocation2 + $0x1f0] sm:$0xf] %v315_v45 }
  0x65   :  { %318 = vst [vmem:[#allocation2 + $0x1f4] sm:$0xf] %v317_v46  ;;  %v319_v47 = vld [vmem:[%s5828_s5 + $0x1ec] sm:$0xf]  ;;  %v321_v48 = vld [vmem:[%s5828_s5 + $0x1fc] sm:$0xf] }
  0x66   :  { %320 = vst [vmem:[#allocation2 + $0x1f8] sm:$0xf] %v319_v47  ;;  %322 = vst [vmem:[#allocation2 + $0x1fc] sm:$0xf] %v321_v48 }
  0x67   :  { %609 = vsyncadd [#allocation6], 8192  ;;  %v628_v49 = vld [vmem:[%s5829_s6] sm:$0xf]  ;;  %v630_v50 = vld [vmem:[%s5829_s6 + $0x8] sm:$0xf] }
  0x68   :  { %629 = vst [vmem:[#allocation3] sm:$0xf] %v628_v49  ;;  %631 = vst [vmem:[#allocation3 + $0x4] sm:$0xf] %v630_v50  ;;  %v632_v51 = vld [vmem:[%s5829_s6 + $0x4] sm:$0xf] }
  0x69   :  { %v634_v52 = vld [vmem:[%s5829_s6 + $0xc] sm:$0xff]   ;;  %v638_v53 = vld [vmem:[%s5829_s6 + $0x18] sm:$0xf]  ;;  %633 = vst [vmem:[#allocation3 + $0x8] sm:$0xf] %v632_v51  ;;  %v642_v55 = vld [vmem:[%s5829_s6 + $0x1c] sm:$0xff]  }
  0x6a   :  { %635 = vst [vmem:[#allocation3 + $0xc] sm:$0xff] %v634_v52   ;;  %639 = vst [vmem:[#allocation3 + $0x14] sm:$0xf] %v638_v53  ;;  %v640_v54 = vld [vmem:[%s5829_s6 + $0x14] sm:$0xf]  ;;  %v650_v58 = vld [vmem:[%s5829_s6 + $0x2c] sm:$0xff]  }
  0x6b   :  { %v646_v56 = vld [vmem:[%s5829_s6 + $0x28] sm:$0xf]  ;;  %641 = vst [vmem:[#allocation3 + $0x18] sm:$0xf] %v640_v54  ;;  %643 = vst [vmem:[#allocation3 + $0x1c] sm:$0xff] %v642_v55   ;;  %v658_v61 = vld [vmem:[%s5829_s6 + $0x3c] sm:$0xff]  }
  0x6c   :  { %647 = vst [vmem:[#allocation3 + $0x24] sm:$0xf] %v646_v56  ;;  %v648_v57 = vld [vmem:[%s5829_s6 + $0x24] sm:$0xf]  ;;  %v654_v59 = vld [vmem:[%s5829_s6 + $0x38] sm:$0xf] }
  0x6d   :  { %649 = vst [vmem:[#allocation3 + $0x28] sm:$0xf] %v648_v57  ;;  %651 = vst [vmem:[#allocation3 + $0x2c] sm:$0xff] %v650_v58   ;;  %v656_v60 = vld [vmem:[%s5829_s6 + $0x34] sm:$0xf]  ;;  %v666_v0 = vld [vmem:[%s5829_s6 + $0x4c] sm:$0xff]  }
  0x6e   :  { %655 = vst [vmem:[#allocation3 + $0x34] sm:$0xf] %v654_v59  ;;  %v662_v62 = vld [vmem:[%s5829_s6 + $0x48] sm:$0xf]  ;;  %657 = vst [vmem:[#allocation3 + $0x38] sm:$0xf] %v656_v60 }
  0x6f   :  { %659 = vst [vmem:[#allocation3 + $0x3c] sm:$0xff] %v658_v61   ;;  %663 = vst [vmem:[#allocation3 + $0x44] sm:$0xf] %v662_v62  ;;  %v664_v63 = vld [vmem:[%s5829_s6 + $0x44] sm:$0xf]  ;;  %v674_v3 = vld [vmem:[%s5829_s6 + $0x5c] sm:$0xff]  }
  0x70   :  { %v670_v1 = vld [vmem:[%s5829_s6 + $0x58] sm:$0xf]  ;;  %665 = vst [vmem:[#allocation3 + $0x48] sm:$0xf] %v664_v63  ;;  %667 = vst [vmem:[#allocation3 + $0x4c] sm:$0xff] %v666_v0   ;;  %v682_v6 = vld [vmem:[%s5829_s6 + $0x6c] sm:$0xff]  }
  0x71   :  { %671 = vst [vmem:[#allocation3 + $0x54] sm:$0xf] %v670_v1  ;;  %v672_v2 = vld [vmem:[%s5829_s6 + $0x54] sm:$0xf]  ;;  %v678_v4 = vld [vmem:[%s5829_s6 + $0x68] sm:$0xf] }
  0x72   :  { %673 = vst [vmem:[#allocation3 + $0x58] sm:$0xf] %v672_v2  ;;  %675 = vst [vmem:[#allocation3 + $0x5c] sm:$0xff] %v674_v3   ;;  %v680_v5 = vld [vmem:[%s5829_s6 + $0x64] sm:$0xf]  ;;  %v690_v9 = vld [vmem:[%s5829_s6 + $0x7c] sm:$0xff]  }
  0x73   :  { %679 = vst [vmem:[#allocation3 + $0x64] sm:$0xf] %v678_v4  ;;  %v686_v7 = vld [vmem:[%s5829_s6 + $0x78] sm:$0xf]  ;;  %681 = vst [vmem:[#allocation3 + $0x68] sm:$0xf] %v680_v5 }
  0x74   :  { %683 = vst [vmem:[#allocation3 + $0x6c] sm:$0xff] %v682_v6   ;;  %687 = vst [vmem:[#allocation3 + $0x74] sm:$0xf] %v686_v7  ;;  %v688_v8 = vld [vmem:[%s5829_s6 + $0x74] sm:$0xf]  ;;  %v698_v12 = vld [vmem:[%s5829_s6 + $0x8c] sm:$0xff]  }
  0x75   :  { %v694_v10 = vld [vmem:[%s5829_s6 + $0x88] sm:$0xf]  ;;  %689 = vst [vmem:[#allocation3 + $0x78] sm:$0xf] %v688_v8  ;;  %691 = vst [vmem:[#allocation3 + $0x7c] sm:$0xff] %v690_v9   ;;  %v706_v15 = vld [vmem:[%s5829_s6 + $0x9c] sm:$0xff]  }
  0x76   :  { %695 = vst [vmem:[#allocation3 + $0x84] sm:$0xf] %v694_v10  ;;  %v696_v11 = vld [vmem:[%s5829_s6 + $0x84] sm:$0xf]  ;;  %v702_v13 = vld [vmem:[%s5829_s6 + $0x98] sm:$0xf] }
  0x77   :  { %697 = vst [vmem:[#allocation3 + $0x88] sm:$0xf] %v696_v11  ;;  %699 = vst [vmem:[#allocation3 + $0x8c] sm:$0xff] %v698_v12   ;;  %v704_v14 = vld [vmem:[%s5829_s6 + $0x94] sm:$0xf]  ;;  %v714_v18 = vld [vmem:[%s5829_s6 + $0xac] sm:$0xff]  }
  0x78   :  { %703 = vst [vmem:[#allocation3 + $0x94] sm:$0xf] %v702_v13  ;;  %v710_v16 = vld [vmem:[%s5829_s6 + $0xa8] sm:$0xf]  ;;  %705 = vst [vmem:[#allocation3 + $0x98] sm:$0xf] %v704_v14 }
  0x79   :  { %707 = vst [vmem:[#allocation3 + $0x9c] sm:$0xff] %v706_v15   ;;  %711 = vst [vmem:[#allocation3 + $0xa4] sm:$0xf] %v710_v16  ;;  %v712_v17 = vld [vmem:[%s5829_s6 + $0xa4] sm:$0xf]  ;;  %v722_v21 = vld [vmem:[%s5829_s6 + $0xbc] sm:$0xff]  }
  0x7a   :  { %v718_v19 = vld [vmem:[%s5829_s6 + $0xb8] sm:$0xf]  ;;  %713 = vst [vmem:[#allocation3 + $0xa8] sm:$0xf] %v712_v17  ;;  %715 = vst [vmem:[#allocation3 + $0xac] sm:$0xff] %v714_v18   ;;  %v730_v24 = vld [vmem:[%s5829_s6 + $0xcc] sm:$0xff]  }
  0x7b   :  { %719 = vst [vmem:[#allocation3 + $0xb4] sm:$0xf] %v718_v19  ;;  %v720_v20 = vld [vmem:[%s5829_s6 + $0xb4] sm:$0xf]  ;;  %v726_v22 = vld [vmem:[%s5829_s6 + $0xc8] sm:$0xf] }
  0x7c   :  { %721 = vst [vmem:[#allocation3 + $0xb8] sm:$0xf] %v720_v20  ;;  %723 = vst [vmem:[#allocation3 + $0xbc] sm:$0xff] %v722_v21   ;;  %v728_v23 = vld [vmem:[%s5829_s6 + $0xc4] sm:$0xf]  ;;  %v738_v27 = vld [vmem:[%s5829_s6 + $0xdc] sm:$0xff]  }
  0x7d   :  { %727 = vst [vmem:[#allocation3 + $0xc4] sm:$0xf] %v726_v22  ;;  %v734_v25 = vld [vmem:[%s5829_s6 + $0xd8] sm:$0xf]  ;;  %729 = vst [vmem:[#allocation3 + $0xc8] sm:$0xf] %v728_v23 }
  0x7e   :  { %731 = vst [vmem:[#allocation3 + $0xcc] sm:$0xff] %v730_v24   ;;  %735 = vst [vmem:[#allocation3 + $0xd4] sm:$0xf] %v734_v25  ;;  %v736_v26 = vld [vmem:[%s5829_s6 + $0xd4] sm:$0xf]  ;;  %v746_v30 = vld [vmem:[%s5829_s6 + $0xec] sm:$0xff]  }
  0x7f   :  { %v742_v28 = vld [vmem:[%s5829_s6 + $0xe8] sm:$0xf]  ;;  %737 = vst [vmem:[#allocation3 + $0xd8] sm:$0xf] %v736_v26  ;;  %739 = vst [vmem:[#allocation3 + $0xdc] sm:$0xff] %v738_v27   ;;  %v754_v33 = vld [vmem:[%s5829_s6 + $0xfc] sm:$0xff]  }
  0x80   :  { %743 = vst [vmem:[#allocation3 + $0xe4] sm:$0xf] %v742_v28  ;;  %v744_v29 = vld [vmem:[%s5829_s6 + $0xe4] sm:$0xf]  ;;  %v750_v31 = vld [vmem:[%s5829_s6 + $0xf8] sm:$0xf] }
  0x81   :  { %745 = vst [vmem:[#allocation3 + $0xe8] sm:$0xf] %v744_v29  ;;  %747 = vst [vmem:[#allocation3 + $0xec] sm:$0xff] %v746_v30   ;;  %v752_v32 = vld [vmem:[%s5829_s6 + $0xf4] sm:$0xf]  ;;  %v762_v36 = vld [vmem:[%s5829_s6 + $0x10c] sm:$0xff]  }
  0x82   :  { %751 = vst [vmem:[#allocation3 + $0xf4] sm:$0xf] %v750_v31  ;;  %v758_v34 = vld [vmem:[%s5829_s6 + $0x108] sm:$0xf]  ;;  %753 = vst [vmem:[#allocation3 + $0xf8] sm:$0xf] %v752_v32 }
  0x83   :  { %755 = vst [vmem:[#allocation3 + $0xfc] sm:$0xff] %v754_v33   ;;  %759 = vst [vmem:[#allocation3 + $0x104] sm:$0xf] %v758_v34  ;;  %v760_v35 = vld [vmem:[%s5829_s6 + $0x104] sm:$0xf]  ;;  %v770_v39 = vld [vmem:[%s5829_s6 + $0x11c] sm:$0xff]  }
  0x84   :  { %v766_v37 = vld [vmem:[%s5829_s6 + $0x118] sm:$0xf]  ;;  %761 = vst [vmem:[#allocation3 + $0x108] sm:$0xf] %v760_v35  ;;  %763 = vst [vmem:[#allocation3 + $0x10c] sm:$0xff] %v762_v36   ;;  %v778_v42 = vld [vmem:[%s5829_s6 + $0x12c] sm:$0xff]  }
  0x85   :  { %767 = vst [vmem:[#allocation3 + $0x114] sm:$0xf] %v766_v37  ;;  %v768_v38 = vld [vmem:[%s5829_s6 + $0x114] sm:$0xf]  ;;  %v774_v40 = vld [vmem:[%s5829_s6 + $0x128] sm:$0xf] }
  0x86   :  { %769 = vst [vmem:[#allocation3 + $0x118] sm:$0xf] %v768_v38  ;;  %771 = vst [vmem:[#allocation3 + $0x11c] sm:$0xff] %v770_v39   ;;  %v776_v41 = vld [vmem:[%s5829_s6 + $0x124] sm:$0xf]  ;;  %v786_v45 = vld [vmem:[%s5829_s6 + $0x13c] sm:$0xff]  }
  0x87   :  { %775 = vst [vmem:[#allocation3 + $0x124] sm:$0xf] %v774_v40  ;;  %v782_v43 = vld [vmem:[%s5829_s6 + $0x138] sm:$0xf]  ;;  %777 = vst [vmem:[#allocation3 + $0x128] sm:$0xf] %v776_v41 }
  0x88   :  { %779 = vst [vmem:[#allocation3 + $0x12c] sm:$0xff] %v778_v42   ;;  %783 = vst [vmem:[#allocation3 + $0x134] sm:$0xf] %v782_v43  ;;  %v784_v44 = vld [vmem:[%s5829_s6 + $0x134] sm:$0xf]  ;;  %v794_v48 = vld [vmem:[%s5829_s6 + $0x14c] sm:$0xff]  }
  0x89   :  { %v790_v46 = vld [vmem:[%s5829_s6 + $0x148] sm:$0xf]  ;;  %785 = vst [vmem:[#allocation3 + $0x138] sm:$0xf] %v784_v44  ;;  %787 = vst [vmem:[#allocation3 + $0x13c] sm:$0xff] %v786_v45   ;;  %v802_v51 = vld [vmem:[%s5829_s6 + $0x15c] sm:$0xff]  }
  0x8a   :  { %791 = vst [vmem:[#allocation3 + $0x144] sm:$0xf] %v790_v46  ;;  %v792_v47 = vld [vmem:[%s5829_s6 + $0x144] sm:$0xf]  ;;  %v798_v49 = vld [vmem:[%s5829_s6 + $0x158] sm:$0xf] }
  0x8b   :  { %793 = vst [vmem:[#allocation3 + $0x148] sm:$0xf] %v792_v47  ;;  %795 = vst [vmem:[#allocation3 + $0x14c] sm:$0xff] %v794_v48   ;;  %v800_v50 = vld [vmem:[%s5829_s6 + $0x154] sm:$0xf]  ;;  %v810_v54 = vld [vmem:[%s5829_s6 + $0x16c] sm:$0xff]  }
  0x8c   :  { %799 = vst [vmem:[#allocation3 + $0x154] sm:$0xf] %v798_v49  ;;  %v806_v52 = vld [vmem:[%s5829_s6 + $0x168] sm:$0xf]  ;;  %801 = vst [vmem:[#allocation3 + $0x158] sm:$0xf] %v800_v50 }
  0x8d   :  { %803 = vst [vmem:[#allocation3 + $0x15c] sm:$0xff] %v802_v51   ;;  %807 = vst [vmem:[#allocation3 + $0x164] sm:$0xf] %v806_v52  ;;  %v808_v53 = vld [vmem:[%s5829_s6 + $0x164] sm:$0xf]  ;;  %v818_v57 = vld [vmem:[%s5829_s6 + $0x17c] sm:$0xff]  }
  0x8e   :  { %v814_v55 = vld [vmem:[%s5829_s6 + $0x178] sm:$0xf]  ;;  %809 = vst [vmem:[#allocation3 + $0x168] sm:$0xf] %v808_v53  ;;  %811 = vst [vmem:[#allocation3 + $0x16c] sm:$0xff] %v810_v54   ;;  %v826_v60 = vld [vmem:[%s5829_s6 + $0x18c] sm:$0xff]  }
  0x8f   :  { %815 = vst [vmem:[#allocation3 + $0x174] sm:$0xf] %v814_v55  ;;  %v816_v56 = vld [vmem:[%s5829_s6 + $0x174] sm:$0xf]  ;;  %v822_v58 = vld [vmem:[%s5829_s6 + $0x188] sm:$0xf] }
  0x90   :  { %817 = vst [vmem:[#allocation3 + $0x178] sm:$0xf] %v816_v56  ;;  %819 = vst [vmem:[#allocation3 + $0x17c] sm:$0xff] %v818_v57   ;;  %v824_v59 = vld [vmem:[%s5829_s6 + $0x184] sm:$0xf]  ;;  %v834_v63 = vld [vmem:[%s5829_s6 + $0x19c] sm:$0xff]  }
  0x91   :  { %823 = vst [vmem:[#allocation3 + $0x184] sm:$0xf] %v822_v58  ;;  %v830_v61 = vld [vmem:[%s5829_s6 + $0x198] sm:$0xf]  ;;  %825 = vst [vmem:[#allocation3 + $0x188] sm:$0xf] %v824_v59 }
  0x92   :  { %827 = vst [vmem:[#allocation3 + $0x18c] sm:$0xff] %v826_v60   ;;  %831 = vst [vmem:[#allocation3 + $0x194] sm:$0xf] %v830_v61  ;;  %v832_v62 = vld [vmem:[%s5829_s6 + $0x194] sm:$0xf]  ;;  %v842_v2 = vld [vmem:[%s5829_s6 + $0x1ac] sm:$0xff]  }
  0x93   :  { %v838_v0 = vld [vmem:[%s5829_s6 + $0x1a8] sm:$0xf]  ;;  %833 = vst [vmem:[#allocation3 + $0x198] sm:$0xf] %v832_v62  ;;  %835 = vst [vmem:[#allocation3 + $0x19c] sm:$0xff] %v834_v63   ;;  %v850_v5 = vld [vmem:[%s5829_s6 + $0x1bc] sm:$0xff]  }
  0x94   :  { %839 = vst [vmem:[#allocation3 + $0x1a4] sm:$0xf] %v838_v0  ;;  %v840_v1 = vld [vmem:[%s5829_s6 + $0x1a4] sm:$0xf]  ;;  %v846_v3 = vld [vmem:[%s5829_s6 + $0x1b8] sm:$0xf] }
  0x95   :  { %841 = vst [vmem:[#allocation3 + $0x1a8] sm:$0xf] %v840_v1  ;;  %843 = vst [vmem:[#allocation3 + $0x1ac] sm:$0xff] %v842_v2   ;;  %v848_v4 = vld [vmem:[%s5829_s6 + $0x1b4] sm:$0xf]  ;;  %v858_v8 = vld [vmem:[%s5829_s6 + $0x1cc] sm:$0xff]  }
  0x96   :  { %847 = vst [vmem:[#allocation3 + $0x1b4] sm:$0xf] %v846_v3  ;;  %v854_v6 = vld [vmem:[%s5829_s6 + $0x1c8] sm:$0xf]  ;;  %849 = vst [vmem:[#allocation3 + $0x1b8] sm:$0xf] %v848_v4 }
  0x97   :  { %851 = vst [vmem:[#allocation3 + $0x1bc] sm:$0xff] %v850_v5   ;;  %855 = vst [vmem:[#allocation3 + $0x1c4] sm:$0xf] %v854_v6  ;;  %v856_v7 = vld [vmem:[%s5829_s6 + $0x1c4] sm:$0xf]  ;;  %v866_v11 = vld [vmem:[%s5829_s6 + $0x1dc] sm:$0xff]  }
  0x98   :  { %v862_v9 = vld [vmem:[%s5829_s6 + $0x1d8] sm:$0xf]  ;;  %857 = vst [vmem:[#allocation3 + $0x1c8] sm:$0xf] %v856_v7  ;;  %859 = vst [vmem:[#allocation3 + $0x1cc] sm:$0xff] %v858_v8   ;;  %v874_v14 = vld [vmem:[%s5829_s6 + $0x1ec] sm:$0xff]  }
  0x99   :  { %863 = vst [vmem:[#allocation3 + $0x1d4] sm:$0xf] %v862_v9  ;;  %v864_v10 = vld [vmem:[%s5829_s6 + $0x1d4] sm:$0xf]  ;;  %v870_v12 = vld [vmem:[%s5829_s6 + $0x1e8] sm:$0xf] }
  0x9a   :  { %865 = vst [vmem:[#allocation3 + $0x1d8] sm:$0xf] %v864_v10  ;;  %867 = vst [vmem:[#allocation3 + $0x1dc] sm:$0xff] %v866_v11   ;;  %v872_v13 = vld [vmem:[%s5829_s6 + $0x1e4] sm:$0xf] }
  0x9b   :  { %871 = vst [vmem:[#allocation3 + $0x1e4] sm:$0xf] %v870_v12  ;;  %v878_v15 = vld [vmem:[%s5829_s6 + $0x1f8] sm:$0xf]  ;;  %873 = vst [vmem:[#allocation3 + $0x1e8] sm:$0xf] %v872_v13 }
  0x9c   :  { %875 = vst [vmem:[#allocation3 + $0x1ec] sm:$0xff] %v874_v14   ;;  %879 = vst [vmem:[#allocation3 + $0x1f4] sm:$0xf] %v878_v15  ;;  %v880_v16 = vld [vmem:[%s5829_s6 + $0x1f4] sm:$0xf] }
  0x9d   :  { %v882_v17 = vld [vmem:[%s5829_s6 + $0x1fc] sm:$0xf]  ;;  %881 = vst [vmem:[#allocation3 + $0x1f8] sm:$0xf] %v880_v16 }
  0x9e   :  { %883 = vst [vmem:[#allocation3 + $0x1fc] sm:$0xf] %v882_v17 }
  0x9f   :  { %1170 = vsyncadd [#allocation6 + $0x1], 8192  ;;  %v5032_v18 = vld [vmem:[%s5831_s8] sm:$0xff]  ;;  %v5037_v19 = vld [vmem:[%s5831_s8 + $0x8] sm:$0xff]  ;;  %s4327_s27 = smov [#allocation4]   ;;  %s4291_s19 = scalar_lea.hbm %s5830_s7, 2048 }
  0xa0   :  { %s1179_s3 = sshll.u32 %s4327_s27, 4  ;;  %v5042_v20 = vld [vmem:[%s5831_s8 + $0x10] sm:$0xff]  ;;  %v5047_v21 = vld [vmem:[%s5831_s8 + $0x18] sm:$0xff]  ;;  %v5052_v22 = vld [vmem:[%s5831_s8 + $0x20] sm:$0xff]  ;;  %p4292_p13 = scmp.ne.s32.totalorder %s5830_s7, %s4291_s19  ;;  %s1180_s3 = int_to_ptr.vmem [resolvable:$true] %s1179_s3 }
  0xa1   :  { %v5057_v23 = vld [vmem:[%s5831_s8 + $0x28] sm:$0xff]  ;;  %v5062_v24 = vld [vmem:[%s5831_s8 + $0x30] sm:$0xff]  ;;  %v5067_v25 = vld [vmem:[%s5831_s8 + $0x38] sm:$0xff]  ;;  %p4295_p0 = scmp.lt.u32.totalorder %s4291_s19, %s5830_s7 }
  0xa2   :  { %5833 = vst [vmem:[#allocation24_spill] sm:$0xff] %v5067_v25 }
  0xa3   :  { %p4297_p1 = pnand %p4295_p0, %p4292_p13 }
  0xa5   :  { %4300 = shalt.err (!%p4297_p1)  }
  0xa6   :  { %s4301_s23 = scalar_lea.vmem %s1180_s3, 2048  ;;  %p4306_p3 = scmp.lt.s32.totalorder %s1180_s3, %s1180_s3 }
  0xa7   :  { %p4302_p2 = scmp.ne.s32.totalorder %s1180_s3, %s4301_s23  ;;  %p4307_p4 = scmp.lt.s32.totalorder %s4301_s23, %s4301_s23 }
  0xa9   :  { %p4308_p5 = por %p4307_p4, %p4306_p3 }
  0xab   :  { %p4309_p6 = pnand %p4308_p5, %p4302_p2 }
  0xad   :  { %4312 = shalt.err (!%p4309_p6)  }
  0xae   :  { %1182 = dma.hbm_to_vmem [thread:$0]  %s5830_s7, 2048, %s1180_s3, [#allocation6 + $0x2] }
  0xaf   :  { %1239 = vsyncadd [#allocation6 + $0x3], 1024  ;;  %s5081_s25 = sld [smem:[#allocation10 + $0x2]]  ;;  %s5083_s26 = sld [smem:[#allocation10 + $0x3]]  ;;  %v1272_v27 = vld [vmem:[%s5824_s1] sm:$0xff]  ;;  %vm1273_vm0 = vcmask 64512  }
  0xb0   :  { %s5085_s27 = sld [smem:[#allocation10 + $0x4]]  ;;  %v5087_v26 = vld [vmem:[#allocation7] ss:$8 sm:$0xf]  ;;  %v5094_v29 = vld [vmem:[#allocation7 + $0x2] ss:$0 sm:$0xff]  ;;  %3878 = vmatprep.subr.mxu0 %v1272_v27 }
  0xb1   :  { %v5092_v28 = vld [vmem:[#allocation7 + $0x1] ss:$8 sm:$0x3]  ;;  %v1252_v30 = vld [vmem:[%s5823_s0] sm:$0xff]  ;;  %v5099_v31 = vld [vmem:[#allocation7 + $0x3] ss:$0 sm:$0xff]  ;;  %3879 = vmatpush3.msra.mxu0 %v1272_v27 }
  0xb2   :  { %5834 = vst [vmem:[#allocation25_spill] sm:$0xff] %v5099_v31  ;;  %v1253_v32 = vld [vmem:[%s5823_s0 + $0x8] sm:$0xff]  ;;  %v1254_v33 = vld [vmem:[%s5823_s0 + $0x10] sm:$0xff]  ;;  %3880 = vmatprep.mubr.msk.f32.mxu0 %vm1273_vm0, %v1252_v30  ;;  %v1255_v34 = vld [vmem:[%s5823_s0 + $0x18] sm:$0xff]  ;;  %s4328_s19 = smov 32   ;;  %s4329_s20 = smov 96  }
  0xb3   :  { %3881 = vmatmul.mubr.msk.f32.vlgmr.msra.gmra.mrb[0].mxu0 %vm1273_vm0, %v1253_v32  ;;  %v1256_v35 = vld [vmem:[%s5823_s0 + $0x20] sm:$0xff]  ;;  %v1257_v36 = vld [vmem:[%s5823_s0 + $0x28] sm:$0xff]  ;;  %v1258_v37 = vld [vmem:[%s5823_s0 + $0x30] sm:$0xff]  ;;  %s4330_s21 = smov 64   ;;  %s1240_s30 = sld [smem:[#allocation10]]  ;;  %vm1844_vm1 = vcmask 261120  }
  0xb4   :  { %3883 = vmatprep.mubr.msk.f32.mxu0 %vm1273_vm0, %v1254_v33  ;;  %v1259_v38 = vld [vmem:[%s5823_s0 + $0x38] sm:$0xff]  ;;  %v1260_v39 = vld [vmem:[%s5823_s0 + $0x40] sm:$0xff]  ;;  %v1261_v40 = vld [vmem:[%s5823_s0 + $0x48] sm:$0xff] }
  0xb5   :  { %v1262_v41 = vld [vmem:[%s5823_s0 + $0x50] sm:$0xff]  ;;  %v1263_v42 = vld [vmem:[%s5823_s0 + $0x58] sm:$0xff]  ;;  %v1264_v43 = vld [vmem:[%s5823_s0 + $0x60] sm:$0xff] }
  0xb6   :  { %v1265_v44 = vld [vmem:[%s5823_s0 + $0x68] sm:$0xff]  ;;  %v1266_v45 = vld [vmem:[%s5823_s0 + $0x70] sm:$0xff]  ;;  %v1267_v46 = vld [vmem:[%s5823_s0 + $0x78] sm:$0xff] }
  0xb7   :  { %3884 = vmatmul.mubr.msk.f32.gmra.mrb[2].mxu0 %vm1273_vm0, %v1255_v34  ;;  %v1268_v47 = vld [vmem:[%s5823_s0 + $0x80] sm:$0xff]  ;;  %v1269_v48 = vld [vmem:[%s5823_s0 + $0x88] sm:$0xff]  ;;  %v1270_v49 = vld [vmem:[%s5823_s0 + $0x90] sm:$0xff] }
  0xb8   :  { %3886 = vmatprep.mubr.msk.f32.mxu0 %vm1273_vm0, %v1256_v35  ;;  %v1271_v50 = vld [vmem:[%s5823_s0 + $0x98] sm:$0xff]  ;;  %v1840_v7 = vld [vmem:[%s5825_s2] sm:$0xff]  ;;  %v1841_v8 = vld [vmem:[%s5825_s2 + $0x8] sm:$0xff] }
  0xb9   :  { %v4090_v9 = vpack.c.bf16 %v1841_v8, %v1840_v7  ;;  %v1842_v10 = vld [vmem:[%s5825_s2 + $0x10] sm:$0xff]  ;;  %v1843_v11 = vld [vmem:[%s5825_s2 + $0x18] sm:$0xff]  ;;  %v2054_v13 = vld [vmem:[%s5825_s2 + $0x20] sm:$0xff] }
  0xba   :  { %v4094_v12 = vpack.c.bf16 %v1843_v11, %v1842_v10  ;;  %v2055_v14 = vld [vmem:[%s5825_s2 + $0x28] sm:$0xff] }
  0xbb   :  { %3887 = vmatmul.mubr.msk.f32.gmra.mrb[4].mxu0 %vm1273_vm0, %v1257_v36  ;;  %4130 = vmatprep.subr.bf16.mxu1 %v4090_v9  ;;  %v5288_v15 = vpack.c.bf16 %v2055_v14, %v2054_v13 }
  0xbc   :  { %3889 = vmatprep.mubr.msk.f32.mxu0 %vm1273_vm0, %v1258_v37  ;;  %4091 = vmatprep.subr.bf16.mxu0 %v4090_v9 }
  0xbd   :  { %4132 = vmatpush3.bf16.msra.mxu1 %v4090_v9  ;;  %4093 = vmatpush3.bf16.msra.mxu0 %v4090_v9 }
  0xbe   :  { %4131 = vmatprep.subr.bf16.mxu1 %v4094_v12  ;;  %4095 = vmatprep.subr.bf16.mxu0 %v4094_v12 }
  0xbf   :  { %3890 = vmatmul.mubr.msk.f32.gmra.mrb[6].mxu0 %vm1273_vm0, %v1259_v38 }
  0xc0   :  { %3892 = vmatprep.mubr.msk.f32.mxu0 %vm1273_vm0, %v1260_v39 }
  0xc1   :  { %4133 = vmatpush3.bf16.msra.mxu1 %v4094_v12  ;;  %4097 = vmatpush3.bf16.msra.mxu0 %v4094_v12 }
  0xc2   :  { %4099 = vmatprep.subr.bf16.mxu1 %v5288_v15 }
  0xc3   :  { %3893 = vmatmul.mubr.msk.f32.gmra.mrb[8].mxu0 %vm1273_vm0, %v1261_v40 }
  0xc4   :  { %3895 = vmatprep.mubr.msk.f32.mxu0 %vm1273_vm0, %v1262_v41 }
  0xc7   :  { %3896 = vmatmul.mubr.msk.f32.gmra.mrb[10].mxu0 %vm1273_vm0, %v1263_v42 }
  0xc8   :  { %3898 = vmatprep.mubr.msk.f32.mxu0 %vm1273_vm0, %v1264_v43 }
  0xcb   :  { %3899 = vmatmul.mubr.msk.f32.gmra.mrb[12].mxu0 %vm1273_vm0, %v1265_v44 }
  0xcc   :  { %3901 = vmatprep.mubr.msk.f32.mxu0 %vm1273_vm0, %v1266_v45 }
  0xcf   :  { %3902 = vmatmul.mubr.msk.f32.gmra.mrb[14].mxu0 %vm1273_vm0, %v1267_v46 }
  0xd0   :  { %3904 = vmatprep.mubr.msk.f32.mxu0 %vm1273_vm0, %v1268_v47 }
  0xd3   :  { %3905 = vmatmul.mubr.msk.f32.gmra.mrb[16].mxu0 %vm1273_vm0, %v1269_v48 }
  0xd4   :  { %3907 = vmatprep.mubr.msk.f32.mxu0 %vm1273_vm0, %v1270_v49 }
  0xd7   :  { %3908 = vmatmul.mubr.msk.f32.gmra.mrb[18].mxu0 %vm1273_vm0, %v1271_v50 }
 0x186   :  { %v5178_v51 = vpop.f32.mrb[0].mxu0 }
 0x187   :  { %1681 = vrot.lane.b32.xlu1 %v5178_v51, %s4328_s19  ;;  %1521 = vrot.lane.b32.xlu0 %v5178_v51, %s4329_s20  ;;  %v5184_v52 = vpop.f32.mrb[1].mxu0 }
 0x18a   :  { %v5186_v53 = vpop.f32.mrb[2].mxu0 }
 0x18b   :  { %1601 = vrot.lane.b32.xlu0 %v5178_v51, %s4330_s21  ;;  %1685 = vrot.lane.b32.xlu1 %v5186_v53, %s4328_s19  ;;  %v5192_v54 = vpop.f32.mrb[3].mxu0 }
 0x18e   :  { %v5194_v55 = vpop.f32.mrb[4].mxu0 }
 0x18f   :  { %1525 = vrot.lane.b32.xlu0 %v5186_v53, %s4329_s20  ;;  %1603 = vrot.lane.b32.xlu1 %v5192_v54, %s4330_s21  ;;  %v5200_v56 = vpop.f32.mrb[5].mxu0 }
 0x192   :  { %v5202_v57 = vpop.f32.mrb[6].mxu0 }
 0x193   :  { %1605 = vrot.lane.b32.xlu0 %v5186_v53, %s4330_s21  ;;  %1683 = vrot.lane.b32.xlu1 %v5192_v54, %s4328_s19  ;;  %v5208_v58 = vpop.f32.mrb[7].mxu0 }
 0x196   :  { %v5210_v59 = vpop.f32.mrb[8].mxu0 }
 0x197   :  { %1523 = vrot.lane.b32.xlu0 %v5192_v54, %s4329_s20  ;;  %1689 = vrot.lane.b32.xlu1 %v5194_v55, %s4328_s19  ;;  %v5216_v60 = vpop.f32.mrb[9].mxu0 }
 0x19a   :  { %v5218_v61 = vpop.f32.mrb[10].mxu0 }
 0x19b   :  { %1529 = vrot.lane.b32.xlu0 %v5194_v55, %s4329_s20  ;;  %1607 = vrot.lane.b32.xlu1 %v5200_v56, %s4330_s21  ;;  %v5224_v62 = vpop.f32.mrb[11].mxu0 }
 0x19e   :  { %v5226_v63 = vpop.f32.mrb[12].mxu0 }
 0x19f   :  { %1609 = vrot.lane.b32.xlu0 %v5194_v55, %s4330_s21  ;;  %1687 = vrot.lane.b32.xlu1 %v5200_v56, %s4328_s19  ;;  %v5232_v0 = vpop.f32.mrb[13].mxu0 }
 0x1a2   :  { %v5234_v1 = vpop.f32.mrb[14].mxu0 }
 0x1a3   :  { %1527 = vrot.lane.b32.xlu0 %v5200_v56, %s4329_s20  ;;  %1611 = vrot.lane.b32.xlu1 %v5208_v58, %s4330_s21  ;;  %v5240_v2 = vpop.f32.mrb[15].mxu0 }
 0x1a6   :  { %v5242_v3 = vpop.f32.mrb[16].mxu0 }
 0x1a7   :  { %1533 = vrot.lane.b32.xlu0 %v5202_v57, %s4329_s20  ;;  %1691 = vrot.lane.b32.xlu1 %v5208_v58, %s4328_s19  ;;  %v5248_v4 = vpop.f32.mrb[17].mxu0 }
 0x1aa   :  { %v5250_v5 = vpop.f32.mrb[18].mxu0 }
 0x1ab   :  { %1531 = vrot.lane.b32.xlu0 %v5208_v58, %s4329_s20  ;;  %1625 = vrot.lane.b32.xlu1 %v5226_v63, %s4330_s21  ;;  %v5256_v6 = vpop.f32.mrb[19].mxu0 }
 0x1af   :  { %1535 = vrot.lane.b32.xlu0 %v5216_v60, %s4329_s20  ;;  %1705 = vrot.lane.b32.xlu1 %v5226_v63, %s4328_s19 }
 0x1b3   :  { %1545 = vrot.lane.b32.xlu0 %v5226_v63, %s4329_s20  ;;  %1623 = vrot.lane.b32.xlu1 %v5232_v0, %s4330_s21 }
 0x1b7   :  { %1703 = vrot.lane.b32.xlu1 %v5232_v0, %s4328_s19  ;;  %1543 = vrot.lane.b32.xlu0 %v5232_v0, %s4329_s20 }
 0x1bb   :  { %1629 = vrot.lane.b32.xlu1 %v5234_v1, %s4330_s21  ;;  %1549 = vrot.lane.b32.xlu0 %v5234_v1, %s4329_s20 }
 0x1bf   :  { %1709 = vrot.lane.b32.xlu1 %v5234_v1, %s4328_s19  ;;  %1547 = vrot.lane.b32.xlu0 %v5240_v2, %s4329_s20 }
 0x1c3   :  { %1707 = vrot.lane.b32.xlu1 %v5240_v2, %s4328_s19  ;;  %1627 = vrot.lane.b32.xlu0 %v5240_v2, %s4330_s21 }
 0x1c7   :  { %1615 = vrot.lane.b32.xlu1 %v5216_v60, %s4330_s21  ;;  %1613 = vrot.lane.b32.xlu0 %v5202_v57, %s4330_s21 }
 0x1cb   :  { %1693 = vrot.lane.b32.xlu1 %v5202_v57, %s4328_s19  ;;  %1537 = vrot.lane.b32.xlu0 %v5210_v59, %s4329_s20 }
 0x1cf   :  { %1695 = vrot.lane.b32.xlu1 %v5216_v60, %s4328_s19  ;;  %1539 = vrot.lane.b32.xlu0 %v5224_v62, %s4329_s20 }
 0x1d3   :  { %1619 = vrot.lane.b32.xlu1 %v5224_v62, %s4330_s21  ;;  %1617 = vrot.lane.b32.xlu0 %v5210_v59, %s4330_s21 }
 0x1d7   :  { %1697 = vrot.lane.b32.xlu1 %v5210_v59, %s4328_s19  ;;  %1541 = vrot.lane.b32.xlu0 %v5218_v61, %s4329_s20 }
 0x1db   :  { %1621 = vrot.lane.b32.xlu1 %v5218_v61, %s4330_s21  ;;  %1699 = vrot.lane.b32.xlu0 %v5224_v62, %s4328_s19 }
 0x1df   :  { %1701 = vrot.lane.b32.xlu0 %v5218_v61, %s4328_s19  ;;  %1551 = vrot.lane.b32.xlu1 %v5248_v4, %s4329_s20 }
 0x1e3   :  { %1631 = vrot.lane.b32.xlu0 %v5248_v4, %s4330_s21  ;;  %1711 = vrot.lane.b32.xlu1 %v5248_v4, %s4328_s19 }
 0x1e7   :  { %1553 = vrot.lane.b32.xlu0 %v5242_v3, %s4329_s20  ;;  %1633 = vrot.lane.b32.xlu1 %v5242_v3, %s4330_s21 }
 0x1eb   :  { %1713 = vrot.lane.b32.xlu0 %v5242_v3, %s4328_s19  ;;  %1555 = vrot.lane.b32.xlu1 %v5256_v6, %s4329_s20 }
 0x1ef   :  { %1635 = vrot.lane.b32.xlu0 %v5256_v6, %s4330_s21  ;;  %1715 = vrot.lane.b32.xlu1 %v5256_v6, %s4328_s19 }
 0x1f3   :  { %1519 = vrot.lane.b32.xlu0 %v5184_v52, %s4329_s20  ;;  %1599 = vrot.lane.b32.xlu1 %v5184_v52, %s4330_s21 }
 0x1f7   :  { %1679 = vrot.lane.b32.xlu0 %v5184_v52, %s4328_s19  ;;  %1557 = vrot.lane.b32.xlu1 %v5250_v5, %s4329_s20 }
 0x1f9   :  { %v5355_v16 = vpop.permute.xlu1 %1681  ;;  %v1522_v17 = vpop.permute.xlu0 %1521 }
 0x1fa   :  { %v1580_v27 = vmax.f32 %v5178_v51, %v1522_v17 }
 0x1fb   :  { %1637 = vrot.lane.b32.xlu0 %v5250_v5, %s4330_s21  ;;  %1717 = vrot.lane.b32.xlu1 %v5250_v5, %s4328_s19 }
 0x1fd   :  { %v1602_v30 = vpop.permute.xlu0 %1601  ;;  %v5362_v32 = vpop.permute.xlu1 %1685 }
 0x1fe   :  { %v1660_v33 = vmax.f32 %v1580_v27, %v1602_v30  ;;  %v5388_v30 = vld [vmem:[#allocation7 + $0x4] ss:$0 sm:$0xff] }
 0x200   :  { %v1740_v34 = vmax.f32 %v1660_v33, %v5355_v16 }
 0x201   :  { %v1526_v35 = vpop.permute.xlu0 %1525  ;;  %v1604_v36 = vpop.permute.xlu1 %1603 }
 0x202   :  { %v1582_v37 = vmax.f32 %v5186_v53, %v1526_v35 }
 0x205   :  { %v1606_v38 = vpop.permute.xlu0 %1605  ;;  %v5366_v39 = vpop.permute.xlu1 %1683 }
 0x206   :  { %v5368_v40 = vmax.f32 %v1582_v37, %v1606_v38 }
 0x209   :  { %v1524_v42 = vpop.permute.xlu0 %1523  ;;  %v5372_v43 = vpop.permute.xlu1 %1689 }
 0x20a   :  { %v1581_v41 = vmax.f32 %v5192_v54, %v1524_v42  ;;  %v2057_v54 = vld [vmem:[%s5825_s2 + $0x38] sm:$0xff] }
 0x20c   :  { %v1661_v42 = vmax.f32 %v1581_v41, %v1604_v36 }
 0x20d   :  { %v1530_v44 = vpop.permute.xlu0 %1529  ;;  %v1608_v45 = vpop.permute.xlu1 %1607 }
 0x20e   :  { %v1741_v41 = vmax.f32 %v1661_v42, %v5366_v39  ;;  %v5835_v39 = vmax.f32 %v5368_v40, %v5362_v32 }
 0x211   :  { %v1610_v46 = vpop.permute.xlu0 %1609  ;;  %v5374_v47 = vpop.permute.xlu1 %1687 }
 0x215   :  { %v1528_v48 = vpop.permute.xlu0 %1527  ;;  %v5376_v49 = vpop.permute.xlu1 %1611 }
 0x219   :  { %v5378_v50 = vpop.permute.xlu0 %1533  ;;  %v5380_v51 = vpop.permute.xlu1 %1691 }
 0x21d   :  { %v5382_v53 = vpop.permute.xlu0 %1531  ;;  %v1626_v7 = vpop.permute.xlu1 %1625 }
 0x221   :  { %v5384_v8 = vpop.permute.xlu0 %1535  ;;  %v1706_v9 = vpop.permute.xlu1 %1705 }
 0x225   :  { %v1546_v10 = vpop.permute.xlu0 %1545  ;;  %v1624_v11 = vpop.permute.xlu1 %1623 }
 0x226   :  { %v1592_v12 = vmax.f32 %v5226_v63, %v1546_v10  ;;  %v5393_v63 = vstv %s1240_s30 }
 0x228   :  { %v1672_v13 = vmax.f32 %v1592_v12, %v1626_v7 }
 0x229   :  { %v1704_v14 = vpop.permute.xlu1 %1703  ;;  %v1544_v16 = vpop.permute.xlu0 %1543 }
 0x22a   :  { %v1752_v17 = vmax.f32 %v1672_v13, %v1706_v9  ;;  %v1591_v27 = vmax.f32 %v5232_v0, %v1544_v16 }
 0x22c   :  { %v1671_v33 = vmax.f32 %v1591_v27, %v1624_v11  ;;  %v1772_v35 = vadd.f32 %v1752_v17, %v5388_v30  ;;  %v2056_v11 = vld [vmem:[%s5825_s2 + $0x30] sm:$0xff]  ;;  %v1760_v17 = vadd.f32 %v1740_v34, %v5388_v30  ;;  %v1584_v27 = vmax.f32 %v5194_v55, %v1530_v44 }
 0x22d   :  { %v1630_v37 = vpop.permute.xlu1 %1629  ;;  %v1550_v38 = vpop.permute.xlu0 %1549  ;;  %v4102_v16 = vpack.c.bf16 %v2057_v54, %v2056_v11  ;;  %v1586_v54 = vmax.f32 %v5202_v57, %v5378_v50  ;;  %v1587_v57 = vmax.f32 %v5216_v60, %v5384_v8 }
 0x22e   :  { %v1751_v31 = vmax.f32 %v1671_v33, %v1704_v14  ;;  %v1594_v25 = vmax.f32 %v5234_v1, %v1550_v38  ;;  %v1813_v0 = vmul.f32 %v5393_v63, %v1772_v35  ;;  %vm1792_vm3 = vcmp.gt.f32.partialorder %v1772_v35, 0.0 }
 0x22f   :  { %v1664_v55 = vmax.f32 %v1584_v27, %v1610_v46  ;;  %vm1780_vm4 = vcmp.gt.f32.partialorder %v1760_v17, 0.0 }
 0x230   :  { %v1771_v7 = vadd.f32 %v1751_v31, %v5388_v30  ;;  %v1674_v10 = vmax.f32 %v1594_v25, %v1630_v37  ;;  %v1583_v25 = vmax.f32 %v5200_v56, %v1528_v48  ;;  %v5412_v36 = vsel %vm1792_vm3, %v1772_v35, %v1813_v0  ;;  %v2222_v56 = vld [vmem:[%s5825_s2 + $0x40] sm:$0xff] }
 0x231   :  { %v1710_v9 = vpop.permute.xlu1 %1709  ;;  %v1548_v12 = vpop.permute.xlu0 %1547  ;;  %v1585_v48 = vmax.f32 %v5208_v58, %v5382_v53  ;;  %v1801_v58 = vmul.f32 %v5393_v63, %v1760_v17  ;;  %v1744_v53 = vmax.f32 %v1664_v55, %v5372_v43  ;;  %v2390_v55 = vld [vmem:[%s5825_s2 + $0x60] sm:$0xff] }
 0x232   :  { %vm1791_vm2 = vcmp.gt.f32.partialorder %v1771_v7, 0.0  ;;  %v1812_v1 = vmul.f32 %v5393_v63, %v1771_v7  ;;  %v1754_v31 = vmax.f32 %v1674_v10, %v1710_v9  ;;  %v1593_v13 = vmax.f32 %v5240_v2, %v1548_v12  ;;  %v2223_v2 = vld [vmem:[%s5825_s2 + $0x48] sm:$0xff] }
 0x233   :  { %v1663_v44 = vmax.f32 %v1583_v25, %v1608_v45  ;;  %v1762_v12 = vadd.f32 %v5835_v39, %v5388_v30  ;;  %v1761_v45 = vadd.f32 %v1741_v41, %v5388_v30  ;;  %v1665_v0 = vmax.f32 %v1585_v48, %v5376_v49 }
 0x234   :  { %v5406_v14 = vsel %vm1791_vm2, %v1771_v7, %v1812_v1  ;;  %v1774_v35 = vadd.f32 %v1754_v31, %v5388_v30  ;;  %v4106_v7 = vpack.c.bf16 %v2223_v2, %v2222_v56 }
 0x235   :  { %v1708_v33 = vpop.permute.xlu1 %1707  ;;  %v1628_v37 = vpop.permute.xlu0 %1627  ;;  %3936 = vmatprep.mubr.msk.f32.mxu1 %vm1844_vm1, %v5406_v14  ;;  %v1802_v1 = vmul.f32 %v5393_v63, %v1761_v45  ;;  %v1745_v31 = vmax.f32 %v1665_v0, %v5380_v51  ;;  %vm1781_vm7 = vcmp.gt.f32.partialorder %v1761_v45, 0.0  ;;  %v1803_v60 = vmul.f32 %v5393_v63, %v1762_v12 }
 0x236   :  { %v1673_v34 = vmax.f32 %v1593_v13, %v1628_v37  ;;  %3937 = vmatmul.mubr.msk.f32.vlgmr.msra.gmra.mrb[0].mxu1 %vm1844_vm1, %v5412_v36  ;;  %v1815_v11 = vmul.f32 %v5393_v63, %v1774_v35  ;;  %vm1794_vm5 = vcmp.gt.f32.partialorder %v1774_v35, 0.0  ;;  %v2224_v13 = vld [vmem:[%s5825_s2 + $0x50] sm:$0xff]  ;;  %vm1782_vm8 = vcmp.gt.f32.partialorder %v1762_v12, 0.0 }
 0x237   :  { %4101 = vmatpush3.bf16.msra.mxu1 %v5288_v15  ;;  %v1743_v15 = vmax.f32 %v1663_v44, %v5374_v47  ;;  %v5445_v47 = vsel %vm1780_vm4, %v1760_v17, %v1801_v58  ;;  %v1764_v17 = vadd.f32 %v1744_v53, %v5388_v30  ;;  %v1765_v56 = vadd.f32 %v1745_v31, %v5388_v30  ;;  %v2391_v44 = vld [vmem:[%s5825_s2 + $0x68] sm:$0xff] }
 0x238   :  { %v1753_v38 = vmax.f32 %v1673_v34, %v1708_v33  ;;  %4103 = vmatprep.subr.bf16.mxu1 %v4102_v16  ;;  %v5453_v50 = vsel %vm1794_vm5, %v1774_v35, %v1815_v11  ;;  %v5468_v41 = vsel %vm1781_vm7, %v1761_v45, %v1802_v1  ;;  %v5486_v45 = vpack.c.bf16 %v2391_v44, %v2390_v55 }
 0x239   :  { %v1616_v10 = vpop.permute.xlu1 %1615  ;;  %v1614_v9 = vpop.permute.xlu0 %1613  ;;  %v1763_v49 = vadd.f32 %v1743_v15, %v5388_v30  ;;  %v1805_v48 = vmul.f32 %v5393_v63, %v1764_v17  ;;  %vm1784_vm10 = vcmp.gt.f32.partialorder %v1764_v17, 0.0  ;;  %vm1785_vm11 = vcmp.gt.f32.partialorder %v1765_v56, 0.0 }
 0x23a   :  { %v1773_v46 = vadd.f32 %v1753_v38, %v5388_v30  ;;  %v1666_v43 = vmax.f32 %v1586_v54, %v1614_v9  ;;  %v1667_v51 = vmax.f32 %v1587_v57, %v1616_v10  ;;  %v5481_v38 = vsel %vm1782_vm8, %v1762_v12, %v1803_v60 }
 0x23b   :  { %4105 = vmatpush3.bf16.msra.mxu1 %v4102_v16  ;;  %v2225_v16 = vld [vmem:[%s5825_s2 + $0x58] sm:$0xff]  ;;  %v1804_v34 = vmul.f32 %v5393_v63, %v1763_v49  ;;  %vm1783_vm9 = vcmp.gt.f32.partialorder %v1763_v49, 0.0  ;;  %v1806_v12 = vmul.f32 %v5393_v63, %v1765_v56  ;;  %v5495_v0 = vsel %vm1784_vm10, %v1764_v17, %v1805_v48 }
 0x23c   :  { %v1814_v32 = vmul.f32 %v5393_v63, %v1773_v46  ;;  %vm1793_vm6 = vcmp.gt.f32.partialorder %v1773_v46, 0.0  ;;  %4107 = vmatprep.subr.bf16.mxu1 %v4106_v7  ;;  %v4110_v37 = vpack.c.bf16 %v2225_v16, %v2224_v13 }
 0x23d   :  { %v1694_v40 = vpop.permute.xlu1 %1693  ;;  %v1538_v42 = vpop.permute.xlu0 %1537  ;;  %v5489_v58 = vsel %vm1783_vm9, %v1763_v49, %v1804_v34 }
 0x23e   :  { %v5442_v25 = vsel %vm1793_vm6, %v1773_v46, %v1814_v32  ;;  %v1746_v27 = vmax.f32 %v1666_v43, %v1694_v40  ;;  %v1588_v39 = vmax.f32 %v5210_v59, %v1538_v42  ;;  %v5502_v40 = vsel %vm1785_vm11, %v1765_v56, %v1806_v12 }
 0x23f   :  { %3939 = vmatprep.mubr.msk.f32.mxu1 %vm1844_vm1, %v5442_v25 }
 0x240   :  { %3940 = vmatmul.mubr.msk.f32.gmra.mrb[2].mxu1 %vm1844_vm1, %v5453_v50  ;;  %v1766_v35 = vadd.f32 %v1746_v27, %v5388_v30 }
 0x241   :  { %v1696_v8 = vpop.permute.xlu1 %1695  ;;  %v1540_v33 = vpop.permute.xlu0 %1539  ;;  %3950 = vmatprep.mubr.msk.f32.mxu1 %vm1844_vm1, %v5445_v47 }
 0x242   :  { %v1747_v2 = vmax.f32 %v1667_v51, %v1696_v8  ;;  %v1807_v53 = vmul.f32 %v5393_v63, %v1766_v35  ;;  %vm1786_vm12 = vcmp.gt.f32.partialorder %v1766_v35, 0.0  ;;  %v1589_v11 = vmax.f32 %v5224_v62, %v1540_v33 }
 0x244   :  { %3951 = vmatmul.mubr.msk.f32.vlgmr.msra.gmra.mrb[4].mxu1 %vm1844_vm1, %v5468_v41  ;;  %v1767_v46 = vadd.f32 %v1747_v2, %v5388_v30  ;;  %v5507_v43 = vsel %vm1786_vm12, %v1766_v35, %v1807_v53 }
 0x245   :  { %v1620_v10 = vpop.permute.xlu1 %1619  ;;  %v1618_v9 = vpop.permute.xlu0 %1617  ;;  %3953 = vmatprep.mubr.msk.f32.mxu1 %vm1844_vm1, %v5481_v38  ;;  %4109 = vmatpush3.bf16.msra.mxu1 %v4106_v7 }
 0x246   :  { %4111 = vmatprep.subr.bf16.mxu1 %v4110_v37  ;;  %v1668_v15 = vmax.f32 %v1588_v39, %v1618_v9  ;;  %v1808_v32 = vmul.f32 %v5393_v63, %v1767_v46  ;;  %vm1787_vm13 = vcmp.gt.f32.partialorder %v1767_v46, 0.0  ;;  %v1669_v42 = vmax.f32 %v1589_v11, %v1620_v10  ;;  %v2392_v11 = vld [vmem:[%s5825_s2 + $0x70] sm:$0xff] }
 0x248   :  { %3954 = vmatmul.mubr.msk.f32.gmra.mrb[6].mxu1 %vm1844_vm1, %v5489_v58  ;;  %v5513_v16 = vsel %vm1787_vm13, %v1767_v46, %v1808_v32 }
 0x249   :  { %v1698_v59 = vpop.permute.xlu1 %1697  ;;  %v1542_v7 = vpop.permute.xlu0 %1541  ;;  %3956 = vmatprep.mubr.msk.f32.mxu1 %vm1844_vm1, %v5495_v0  ;;  %4113 = vmatpush3.bf16.msra.mxu1 %v4110_v37 }
 0x24a   :  { %v1748_v54 = vmax.f32 %v1668_v15, %v1698_v59  ;;  %4115 = vmatprep.subr.bf16.mxu1 %v5486_v45  ;;  %v1590_v57 = vmax.f32 %v5218_v61, %v1542_v7 }
 0x24c   :  { %v1768_v1 = vadd.f32 %v1748_v54, %v5388_v30  ;;  %3957 = vmatmul.mubr.msk.f32.gmra.mrb[8].mxu1 %vm1844_vm1, %v5502_v40  ;;  %v2393_v54 = vld [vmem:[%s5825_s2 + $0x78] sm:$0xff] }
 0x24d   :  { %v1622_v49 = vpop.permute.xlu1 %1621  ;;  %v1700_v31 = vpop.permute.xlu0 %1699  ;;  %3959 = vmatprep.mubr.msk.f32.mxu1 %vm1844_vm1, %v5507_v43  ;;  %v4118_v32 = vpack.c.bf16 %v2393_v54, %v2392_v11 }
 0x24e   :  { %vm1788_vm14 = vcmp.gt.f32.partialorder %v1768_v1, 0.0  ;;  %v1809_v62 = vmul.f32 %v5393_v63, %v1768_v1  ;;  %v1749_v13 = vmax.f32 %v1669_v42, %v1700_v31  ;;  %v1670_v17 = vmax.f32 %v1590_v57, %v1622_v49  ;;  %v2559_v49 = vld [vmem:[%s5825_s2 + $0x88] sm:$0xff] }
 0x250   :  { %v1769_v27 = vadd.f32 %v1749_v13, %v5388_v30  ;;  %3960 = vmatmul.mubr.msk.f32.gmra.mrb[10].mxu1 %vm1844_vm1, %v5513_v16  ;;  %v5518_v60 = vsel %vm1788_vm14, %v1768_v1, %v1809_v62  ;;  %v2558_v1 = vld [vmem:[%s5825_s2 + $0x80] sm:$0xff] }
 0x251   :  { %v1702_v51 = vpop.permute.xlu0 %1701  ;;  %v1552_v8 = vpop.permute.xlu1 %1551  ;;  %3962 = vmatprep.mubr.msk.f32.mxu1 %vm1844_vm1, %v5518_v60  ;;  %v4122_v13 = vpack.c.bf16 %v2559_v49, %v2558_v1 }
 0x252   :  { %vm1789_vm15 = vcmp.gt.f32.partialorder %v1769_v27, 0.0  ;;  %v1810_v33 = vmul.f32 %v5393_v63, %v1769_v27  ;;  %v1750_v61 = vmax.f32 %v1670_v17, %v1702_v51  ;;  %v1595_v56 = vmax.f32 %v5248_v4, %v1552_v8 }
 0x254   :  { %v1770_v37 = vadd.f32 %v1750_v61, %v5388_v30  ;;  %v5525_v2 = vsel %vm1789_vm15, %v1769_v27, %v1810_v33 }
 0x255   :  { %v1632_v34 = vpop.permute.xlu0 %1631  ;;  %v1712_v55 = vpop.permute.xlu1 %1711  ;;  %3963 = vmatmul.mubr.msk.f32.gmra.mrb[12].mxu1 %vm1844_vm1, %v5525_v2 }
 0x256   :  { %vm1790_vm0 = vcmp.gt.f32.partialorder %v1770_v37, 0.0  ;;  %v1811_v44 = vmul.f32 %v5393_v63, %v1770_v37  ;;  %v1675_v48 = vmax.f32 %v1595_v56, %v1632_v34  ;;  %v2561_v56 = vld [vmem:[%s5825_s2 + $0x98] sm:$0xff] }
 0x258   :  { %v1755_v35 = vmax.f32 %v1675_v48, %v1712_v55  ;;  %v5530_v10 = vsel %vm1790_vm0, %v1770_v37, %v1811_v44  ;;  %v2560_v37 = vld [vmem:[%s5825_s2 + $0x90] sm:$0xff]  ;;  %s3610_s2 = sld [smem:[#allocation10 + $0x1]] }
 0x259   :  { %v1554_v9 = vpop.permute.xlu0 %1553  ;;  %v1634_v39 = vpop.permute.xlu1 %1633  ;;  %3965 = vmatprep.mubr.msk.f32.mxu1 %vm1844_vm1, %v5530_v10  ;;  %v4126_v34 = vpack.c.bf16 %v2561_v56, %v2560_v37 }
 0x25a   :  { %v1775_v4 = vadd.f32 %v1755_v35, %v5388_v30  ;;  %3966 = vmatmul.mubr.msk.f32.gmra.mrb[14].mxu1 %vm1844_vm1, %v5406_v14 }
 0x25b   :  { %3968 = vmatprep.mubr.msk.f32.mxu1 %vm1844_vm1, %v5412_v36 }
 0x25c   :  { %v1816_v46 = vmul.f32 %v5393_v63, %v1775_v4  ;;  %vm1795_vm2 = vcmp.gt.f32.partialorder %v1775_v4, 0.0 }
 0x25d   :  { %v1714_v12 = vpop.permute.xlu0 %1713  ;;  %v5540_v53 = vpop.permute.xlu1 %1555 }
 0x25e   :  { %3969 = vmatmul.mubr.msk.f32.gmra.mrb[0].mxu1 %vm1844_vm1, %v5442_v25  ;;  %v5550_v7 = vsel %vm1795_vm2, %v1775_v4, %v1816_v46  ;;  %v5709_v54 = vstv %s3610_s2 }
 0x25f   :  { %3971 = vmatprep.mubr.msk.f32.mxu1 %vm1844_vm1, %v5453_v50 }
 0x261   :  { %v5546_v15 = vpop.permute.xlu0 %1635  ;;  %v5548_v59 = vpop.permute.xlu1 %1715 }
 0x262   :  { %3972 = vmatmul.mubr.msk.f32.gmra.mrb[2].mxu1 %vm1844_vm1, %v5550_v7 }
 0x263   :  { %3982 = vmatprep.mubr.msk.f32.mxu1 %vm1844_vm1, %v5468_v41 }
 0x265   :  { %v1520_v42 = vpop.permute.xlu0 %1519  ;;  %v1600_v62 = vpop.permute.xlu1 %1599 }
 0x266   :  { %v1579_v31 = vmax.f32 %v5184_v52, %v1520_v42  ;;  %3983 = vmatmul.mubr.msk.f32.vlgmr.msra.gmra.mrb[4].mxu1 %vm1844_vm1, %v5481_v38 }
 0x267   :  { %4117 = vmatpush3.bf16.msra.mxu1 %v5486_v45  ;;  %3985 = vmatprep.mubr.msk.f32.mxu1 %vm1844_vm1, %v5489_v58  ;;  %v1596_v45 = vmax.f32 %v5242_v3, %v1554_v9 }
 0x268   :  { %v1659_v57 = vmax.f32 %v1579_v31, %v1600_v62  ;;  %4119 = vmatprep.subr.bf16.mxu1 %v4118_v32 }
 0x269   :  { %v1680_v17 = vpop.permute.xlu0 %1679  ;;  %v1676_v33 = vmax.f32 %v1596_v45, %v1634_v39  ;;  %v1558_v9 = vpop.permute.xlu1 %1557 }
 0x26a   :  { %v1739_v27 = vmax.f32 %v1659_v57, %v1680_v17  ;;  %3986 = vmatmul.mubr.msk.f32.gmra.mrb[6].mxu1 %vm1844_vm1, %v5495_v0  ;;  %v1598_v4 = vmax.f32 %v5250_v5, %v1558_v9 }
 0x26b   :  { %3988 = vmatprep.mubr.msk.f32.mxu1 %vm1844_vm1, %v5502_v40  ;;  %4121 = vmatpush3.bf16.msra.mxu1 %v4118_v32  ;;  %v1756_v3 = vmax.f32 %v1676_v33, %v1714_v12 }
 0x26c   :  { %v1759_v52 = vadd.f32 %v1739_v27, %v5388_v30  ;;  %4123 = vmatprep.subr.bf16.mxu1 %v4122_v13 }
 0x26d   :  { %v1638_v39 = vpop.permute.xlu0 %1637 }
 0x26e   :  { %v1800_v51 = vmul.f32 %v5393_v63, %v1759_v52  ;;  %3989 = vmatmul.mubr.msk.f32.gmra.mrb[8].mxu1 %vm1844_vm1, %v5507_v43  ;;  %vm1779_vm3 = vcmp.gt.f32.partialorder %v1759_v52, 0.0 }
 0x26f   :  { %3991 = vmatprep.mubr.msk.f32.mxu1 %vm1844_vm1, %v5513_v16 }
 0x270   :  { %v1820_v8 = vsel %vm1779_vm3, %v1759_v52, %v1800_v51 }
 0x271   :  { %3918 = vmatprep.mubr.msk.f32.mxu0 %vm1844_vm1, %v1820_v8 }
 0x272   :  { %3919 = vmatmul.mubr.msk.f32.vlgmr.msra.gmra.mrb[20].mxu0 %vm1844_vm1, %v5445_v47  ;;  %3992 = vmatmul.mubr.msk.f32.gmra.mrb[10].mxu1 %vm1844_vm1, %v5518_v60  ;;  %v1776_v47 = vadd.f32 %v1756_v3, %v5388_v30 }
 0x273   :  { %3921 = vmatprep.mubr.msk.f32.mxu0 %vm1844_vm1, %v5468_v41  ;;  %3994 = vmatprep.mubr.msk.f32.mxu1 %vm1844_vm1, %v5525_v2 }
 0x274   :  { %v1817_v41 = vmul.f32 %v5393_v63, %v1776_v47  ;;  %vm1796_vm4 = vcmp.gt.f32.partialorder %v1776_v47, 0.0 }
 0x276   :  { %3922 = vmatmul.mubr.msk.f32.gmra.mrb[22].mxu0 %vm1844_vm1, %v5481_v38  ;;  %3995 = vmatmul.mubr.msk.f32.gmra.mrb[12].mxu1 %vm1844_vm1, %v5530_v10  ;;  %v1837_v61 = vsel %vm1796_vm4, %v1776_v47, %v1817_v41 }
 0x277   :  { %3924 = vmatprep.mubr.msk.f32.mxu0 %vm1844_vm1, %v5489_v58  ;;  %3997 = vmatprep.mubr.msk.f32.mxu1 %vm1844_vm1, %v5406_v14 }
 0x27a   :  { %3925 = vmatmul.mubr.msk.f32.gmra.mrb[24].mxu0 %vm1844_vm1, %v5495_v0  ;;  %3998 = vmatmul.mubr.msk.f32.gmra.mrb[14].mxu1 %vm1844_vm1, %v5412_v36 }
 0x27b   :  { %3927 = vmatprep.mubr.msk.f32.mxu0 %vm1844_vm1, %v5502_v40  ;;  %4000 = vmatprep.mubr.msk.f32.mxu1 %vm1844_vm1, %v5442_v25 }
 0x27e   :  { %3928 = vmatmul.mubr.msk.f32.gmra.mrb[26].mxu0 %vm1844_vm1, %v5507_v43  ;;  %4001 = vmatmul.mubr.msk.f32.gmra.mrb[0].mxu1 %vm1844_vm1, %v5453_v50 }
 0x27f   :  { %3930 = vmatprep.mubr.msk.f32.mxu0 %vm1844_vm1, %v5513_v16  ;;  %4003 = vmatprep.mubr.msk.f32.mxu1 %vm1844_vm1, %v5550_v7 }
 0x282   :  { %3931 = vmatmul.mubr.msk.f32.gmra.mrb[28].mxu0 %vm1844_vm1, %v5518_v60  ;;  %4004 = vmatmul.mubr.msk.f32.gmra.mrb[2].mxu1 %vm1844_vm1, %v1837_v61 }
 0x283   :  { %3933 = vmatprep.mubr.msk.f32.mxu0 %vm1844_vm1, %v5525_v2  ;;  %4014 = vmatprep.mubr.msk.f32.mxu1 %vm1844_vm1, %v5481_v38  ;;  %v1597_v38 = vmax.f32 %v5256_v6, %v5540_v53 }
 0x285   :  { %v1677_v55 = vmax.f32 %v1597_v38, %v5546_v15  ;;  %v5705_v15 = vld [vmem:[#allocation7 + $0x5] ss:$0 sm:$0xff] }
 0x286   :  { %3934 = vmatmul.mubr.msk.f32.gmra.mrb[30].mxu0 %vm1844_vm1, %v5530_v10  ;;  %4015 = vmatmul.mubr.msk.f32.vlgmr.msra.gmra.mrb[4].mxu1 %vm1844_vm1, %v5489_v58 }
 0x287   :  { %4125 = vmatpush3.bf16.msra.mxu1 %v4122_v13  ;;  %4017 = vmatprep.mubr.msk.f32.mxu1 %vm1844_vm1, %v5495_v0  ;;  %v1757_v44 = vmax.f32 %v1677_v55, %v5548_v59 }
 0x288   :  { %4127 = vmatprep.subr.bf16.mxu1 %v4126_v34 }
 0x289   :  { %v1777_v6 = vadd.f32 %v1757_v44, %v5388_v30 }
 0x28a   :  { %4018 = vmatmul.mubr.msk.f32.gmra.mrb[6].mxu1 %vm1844_vm1, %v5502_v40 }
 0x28b   :  { %4020 = vmatprep.mubr.msk.f32.mxu1 %vm1844_vm1, %v5507_v43  ;;  %4129 = vmatpush3.bf16.msra.mxu1 %v4126_v34  ;;  %v1818_v48 = vmul.f32 %v5393_v63, %v1777_v6  ;;  %vm1797_vm5 = vcmp.gt.f32.partialorder %v1777_v6, 0.0 }
 0x28d   :  { %v1838_v35 = vsel %vm1797_vm5, %v1777_v6, %v1818_v48 }
 0x28e   :  { %4021 = vmatmul.mubr.msk.f32.gmra.mrb[8].mxu1 %vm1844_vm1, %v5513_v16 }
 0x28f   :  { %4023 = vmatprep.mubr.msk.f32.mxu1 %vm1844_vm1, %v5518_v60 }
 0x292   :  { %4024 = vmatmul.mubr.msk.f32.gmra.mrb[10].mxu1 %vm1844_vm1, %v5525_v2 }
 0x293   :  { %4026 = vmatprep.mubr.msk.f32.mxu1 %vm1844_vm1, %v5530_v10 }
 0x296   :  { %4027 = vmatmul.mubr.msk.f32.gmra.mrb[12].mxu1 %vm1844_vm1, %v5406_v14 }
 0x297   :  { %4029 = vmatprep.mubr.msk.f32.mxu1 %vm1844_vm1, %v5412_v36 }
 0x29a   :  { %4030 = vmatmul.mubr.msk.f32.gmra.mrb[14].mxu1 %vm1844_vm1, %v5442_v25 }
 0x29b   :  { %4032 = vmatprep.mubr.msk.f32.mxu1 %vm1844_vm1, %v5453_v50 }
 0x29e   :  { %4033 = vmatmul.mubr.msk.f32.gmra.mrb[0].mxu1 %vm1844_vm1, %v5550_v7 }
 0x29f   :  { %4035 = vmatprep.mubr.msk.f32.mxu1 %vm1844_vm1, %v1837_v61 }
 0x2a2   :  { %4036 = vmatmul.mubr.msk.f32.gmra.mrb[2].mxu1 %vm1844_vm1, %v1838_v35 }
 0x2a3   :  { %4046 = vmatprep.mubr.msk.f32.mxu1 %vm1844_vm1, %v5489_v58  ;;  %v1678_v58 = vmax.f32 %v1598_v4, %v1638_v39 }
 0x2a6   :  { %4047 = vmatmul.mubr.msk.f32.vlgmr.msra.gmra.mrb[4].mxu1 %vm1844_vm1, %v5495_v0  ;;  %v1718_v0 = vpop.permute.xlu1 %1717 }
 0x2a7   :  { %4049 = vmatprep.mubr.msk.f32.mxu1 %vm1844_vm1, %v5502_v40  ;;  %v1758_v40 = vmax.f32 %v1678_v58, %v1718_v0 }
 0x2a9   :  { %v1778_v5 = vadd.f32 %v1758_v40, %v5388_v30 }
 0x2aa   :  { %4050 = vmatmul.mubr.msk.f32.gmra.mrb[6].mxu1 %vm1844_vm1, %v5507_v43 }
 0x2ab   :  { %4052 = vmatprep.mubr.msk.f32.mxu1 %vm1844_vm1, %v5513_v16  ;;  %v1819_v43 = vmul.f32 %v5393_v63, %v1778_v5  ;;  %vm1798_vm6 = vcmp.gt.f32.partialorder %v1778_v5, 0.0 }
 0x2ae   :  { %4053 = vmatmul.mubr.msk.f32.gmra.mrb[8].mxu1 %vm1844_vm1, %v5518_v60 }
 0x2af   :  { %4055 = vmatprep.mubr.msk.f32.mxu1 %vm1844_vm1, %v5525_v2 }
 0x2b2   :  { %4056 = vmatmul.mubr.msk.f32.gmra.mrb[10].mxu1 %vm1844_vm1, %v5530_v10 }
 0x2b3   :  { %4058 = vmatprep.mubr.msk.f32.mxu1 %vm1844_vm1, %v5406_v14  ;;  %v1839_v14 = vsel %vm1798_vm6, %v1778_v5, %v1819_v43 }
 0x2b6   :  { %4059 = vmatmul.mubr.msk.f32.gmra.mrb[12].mxu1 %vm1844_vm1, %v5412_v36 }
 0x2b7   :  { %4061 = vmatprep.mubr.msk.f32.mxu1 %vm1844_vm1, %v5442_v25 }
 0x2ba   :  { %4062 = vmatmul.mubr.msk.f32.gmra.mrb[14].mxu1 %vm1844_vm1, %v5453_v50 }
 0x2bb   :  { %4064 = vmatprep.mubr.msk.f32.mxu1 %vm1844_vm1, %v5550_v7 }
 0x2be   :  { %4065 = vmatmul.mubr.msk.f32.gmra.mrb[0].mxu1 %vm1844_vm1, %v1837_v61 }
 0x2bf   :  { %4067 = vmatprep.mubr.msk.f32.mxu1 %vm1844_vm1, %v1838_v35 }
 0x2c2   :  { %4068 = vmatmul.mubr.msk.f32.gmra.mrb[2].mxu1 %vm1844_vm1, %v1839_v14 }
 0x345   :  { %v3920_v36 = vpop.f32.mrb[20].mxu0 }
 0x346   :  { %v1959_v25 = vpop.f32.mrb[21].mxu0  ;;  %v2039_v59 = vadd.f32 %v3920_v36, %v5705_v15 }
 0x347   :  { %v2038_v7 = vadd.f32 %v1959_v25, %v5705_v15 }
 0x349   :  { %v3923_v16 = vpop.f32.mrb[22].mxu0 }
 0x34a   :  { %v1969_v30 = vpop.f32.mrb[23].mxu0  ;;  %v2041_v49 = vadd.f32 %v3923_v16, %v5705_v15 }
 0x34b   :  { %v2040_v62 = vadd.f32 %v1969_v30, %v5705_v15 }
 0x34d   :  { %v3926_v60 = vpop.f32.mrb[24].mxu0 }
 0x34e   :  { %v1979_v2 = vpop.f32.mrb[25].mxu0  ;;  %v2043_v8 = vadd.f32 %v3926_v60, %v5705_v15 }
 0x34f   :  { %v2042_v3 = vadd.f32 %v1979_v2, %v5705_v15 }
 0x351   :  { %v3929_v50 = vpop.f32.mrb[26].mxu0 }
 0x352   :  { %v1989_v10 = vpop.f32.mrb[27].mxu0  ;;  %v2045_v55 = vadd.f32 %v3929_v50, %v5705_v15 }
 0x353   :  { %v2044_v48 = vadd.f32 %v1989_v10, %v5705_v15 }
 0x355   :  { %v3932_v46 = vpop.f32.mrb[28].mxu0 }
 0x356   :  { %v1999_v12 = vpop.f32.mrb[29].mxu0  ;;  %v2047_v14 = vadd.f32 %v3932_v46, %v5705_v15 }
 0x357   :  { %v2046_v16 = vadd.f32 %v1999_v12, %v5705_v15 }
 0x359   :  { %v5701_v53 = vpop.f32.mrb[30].mxu0 }
 0x35a   :  { %v5703_v63 = vpop.f32.mrb[31].mxu0 }
 0x35b   :  { %v2048_v12 = vadd.f32 %v5703_v63, %v5705_v15 }
 0x379   :  { %v4048_v11 = vpop.f32.mrb[4].mxu1 }
 0x37a   :  { %v4135_v32 = vadd.f32 %v4048_v11, %v2039_v59  ;;  %v2631_v42 = vpop.f32.mrb[5].mxu1  ;;  %v2049_v11 = vadd.f32 %v5701_v53, %v5705_v15 }
 0x37b   :  { %v4137_v1 = vadd.f32 %v2631_v42, %v2038_v7 }
 0x37c   :  { %vm2727_vm1 = vcmp.gt.f32.partialorder %v4135_v32, 0.0  ;;  %v2744_v31 = vmul.f32 %v4135_v32, %v5709_v54 }
 0x37d   :  { %vm2726_vm7 = vcmp.gt.f32.partialorder %v4137_v1, 0.0  ;;  %v2743_v57 = vmul.f32 %v4137_v1, %v5709_v54  ;;  %v4051_v13 = vpop.f32.mrb[6].mxu1 }
 0x37e   :  { %v2760_v17 = vsel %vm2727_vm1, %v4135_v32, %v2744_v31  ;;  %v4139_v27 = vadd.f32 %v4051_v13, %v2041_v49  ;;  %v2641_v52 = vpop.f32.mrb[7].mxu1 }
 0x37f   :  { %v2759_v45 = vsel %vm2726_vm7, %v4137_v1, %v2743_v57  ;;  %v4141_v51 = vadd.f32 %v2641_v52, %v2040_v62 }
 0x380   :  { %v2775_v33 = vmax.f32 %v2759_v45, %v2760_v17  ;;  %v2746_v47 = vmul.f32 %v4139_v27, %v5709_v54  ;;  %vm2729_vm9 = vcmp.gt.f32.partialorder %v4139_v27, 0.0 }
 0x381   :  { %vm2728_vm8 = vcmp.gt.f32.partialorder %v4141_v51, 0.0  ;;  %v2745_v41 = vmul.f32 %v4141_v51, %v5709_v54  ;;  %v4054_v61 = vpop.f32.mrb[8].mxu1 }
 0x382   :  { %v4143_v37 = vadd.f32 %v4054_v61, %v2043_v8  ;;  %v2651_v56 = vpop.f32.mrb[9].mxu1  ;;  %v2762_v35 = vsel %vm2729_vm9, %v4139_v27, %v2746_v47 }
 0x383   :  { %v2761_v34 = vsel %vm2728_vm8, %v4141_v51, %v2745_v41  ;;  %v4145_v38 = vadd.f32 %v2651_v56, %v2042_v3 }
 0x384   :  { %v2776_v44 = vmax.f32 %v2775_v33, %v2761_v34  ;;  %vm2731_vm10 = vcmp.gt.f32.partialorder %v4143_v37, 0.0  ;;  %v2748_v6 = vmul.f32 %v4143_v37, %v5709_v54 }
 0x385   :  { %vm2730_vm11 = vcmp.gt.f32.partialorder %v4145_v38, 0.0  ;;  %v2747_v9 = vmul.f32 %v4145_v38, %v5709_v54  ;;  %v4057_v39 = vpop.f32.mrb[10].mxu1 }
 0x386   :  { %v2777_v4 = vmax.f32 %v2776_v44, %v2762_v35  ;;  %v2764_v58 = vsel %vm2731_vm10, %v4143_v37, %v2748_v6  ;;  %v4147_v0 = vadd.f32 %v4057_v39, %v2045_v55  ;;  %v2661_v40 = vpop.f32.mrb[11].mxu1 }
 0x387   :  { %v2763_v5 = vsel %vm2730_vm11, %v4145_v38, %v2747_v9  ;;  %v4149_v43 = vadd.f32 %v2661_v40, %v2044_v48 }
 0x388   :  { %v5724_v36 = vpack.c.bf16 %v2777_v4, %v2777_v4  ;;  %v2779_v25 = vmax.f32 %v2763_v5, %v2764_v58  ;;  %v2750_v30 = vmul.f32 %v4147_v0, %v5709_v54  ;;  %vm2733_vm13 = vcmp.gt.f32.partialorder %v4147_v0, 0.0 }
 0x389   :  { %vm2732_vm12 = vcmp.gt.f32.partialorder %v4149_v43, 0.0  ;;  %v2749_v60 = vmul.f32 %v4149_v43, %v5709_v54  ;;  %v4060_v2 = vpop.f32.mrb[12].mxu1 }
 0x38a   :  { %v4151_v50 = vadd.f32 %v4060_v2, %v2047_v14  ;;  %v2671_v10 = vpop.f32.mrb[13].mxu1  ;;  %v2766_v42 = vsel %vm2733_vm13, %v4147_v0, %v2750_v30 }
 0x38b   :  { %v2765_v59 = vsel %vm2732_vm12, %v4149_v43, %v2749_v60  ;;  %v4153_v7 = vadd.f32 %v2671_v10, %v2046_v16 }
 0x38c   :  { %v2780_v46 = vmax.f32 %v2779_v25, %v2765_v59  ;;  %vm2735_vm14 = vcmp.gt.f32.partialorder %v4151_v50, 0.0  ;;  %v2752_v32 = vmul.f32 %v4151_v50, %v5709_v54 }
 0x38d   :  { %vm2734_vm15 = vcmp.gt.f32.partialorder %v4153_v7, 0.0  ;;  %v2751_v1 = vmul.f32 %v4153_v7, %v5709_v54  ;;  %v4063_v49 = vpop.f32.mrb[14].mxu1 }
 0x38e   :  { %v2781_v31 = vmax.f32 %v2780_v46, %v2766_v42  ;;  %v2768_v62 = vsel %vm2735_vm14, %v4151_v50, %v2752_v32  ;;  %v4155_v57 = vadd.f32 %v4063_v49, %v2049_v11  ;;  %v2681_v13 = vpop.f32.mrb[15].mxu1 }
 0x38f   :  { %v2767_v17 = vsel %vm2734_vm15, %v4153_v7, %v2751_v1  ;;  %v4157_v27 = vadd.f32 %v2681_v13, %v2048_v12 }
 0x390   :  { %v5735_v52 = vpack.c.bf16 %v2781_v31, %v2781_v31  ;;  %v2783_v53 = vmax.f32 %v2767_v17, %v2768_v62  ;;  %v2754_v45 = vmul.f32 %v4155_v57, %v5709_v54  ;;  %vm2737_vm2 = vcmp.gt.f32.partialorder %v4155_v57, 0.0 }
 0x391   :  { %vm2736_vm0 = vcmp.gt.f32.partialorder %v4157_v27, 0.0  ;;  %v2753_v51 = vmul.f32 %v4157_v27, %v5709_v54  ;;  %v4066_v63 = vpop.f32.mrb[0].mxu1 }
 0x392   :  { %v4158_v8 = vadd.f32 %v4066_v63, %v5705_v15  ;;  %v2691_v33 = vpop.f32.mrb[1].mxu1  ;;  %v2770_v37 = vsel %vm2737_vm2, %v4155_v57, %v2754_v45 }
 0x393   :  { %v2769_v3 = vsel %vm2736_vm0, %v4157_v27, %v2753_v51  ;;  %v4159_v47 = vadd.f32 %v2691_v33, %v5705_v15 }
 0x394   :  { %v2784_v41 = vmax.f32 %v2783_v53, %v2769_v3  ;;  %vm2739_vm3 = vcmp.gt.f32.partialorder %v4158_v8, 0.0  ;;  %v2756_v61 = vmul.f32 %v4158_v8, %v5709_v54 }
 0x395   :  { %vm2738_vm4 = vcmp.gt.f32.partialorder %v4159_v47, 0.0  ;;  %v2755_v56 = vmul.f32 %v4159_v47, %v5709_v54  ;;  %v4069_v34 = vpop.f32.mrb[2].mxu1 }
 0x396   :  { %v2785_v38 = vmax.f32 %v2784_v41, %v2770_v37  ;;  %v2772_v55 = vsel %vm2739_vm3, %v4158_v8, %v2756_v61  ;;  %v4160_v44 = vadd.f32 %v4069_v34, %v5705_v15  ;;  %v2701_v6 = vpop.f32.mrb[3].mxu1 }
 0x397   :  { %v2771_v48 = vsel %vm2738_vm4, %v4159_v47, %v2755_v56  ;;  %v4161_v35 = vadd.f32 %v2701_v6, %v5705_v15 }
 0x398   :  { %v5745_v9 = vpack.c.bf16 %v2785_v38, %v2785_v38  ;;  %v2787_v39 = vmax.f32 %v2771_v48, %v2772_v55  ;;  %v2758_v4 = vmul.f32 %v4160_v44, %v5709_v54  ;;  %vm2741_vm6 = vcmp.gt.f32.partialorder %v4160_v44, 0.0 }
 0x399   :  { %vm2740_vm5 = vcmp.gt.f32.partialorder %v4161_v35, 0.0  ;;  %v2757_v58 = vmul.f32 %v4161_v35, %v5709_v54 }
 0x39a   :  { %v2774_v5 = vsel %vm2741_vm6, %v4160_v44, %v2758_v4 }
 0x39b   :  { %v2773_v0 = vsel %vm2740_vm5, %v4161_v35, %v2757_v58 }
 0x39c   :  { %v2788_v40 = vmax.f32 %v2787_v39, %v2773_v0 }
 0x39e   :  { %v2789_v43 = vmax.f32 %v2788_v40, %v2774_v5 }
 0x3a0   :  { %v5749_v14 = vpack.c.bf16 %v2789_v43, %v2789_v43 }
 0x3a1   :  { %4317 = dma.done.wait [#allocation6], 8192 }
 0x3a2   :  { %4318 = vsyncadd [#allocation6], 4294959104  ;;  %v4331_v25 = vmov 0   ;;  %v2796_v15 = vld [vmem:[#allocation2 + $0x8] sm:$0xff]  ;;  %v2795_v16 = vld [vmem:[#allocation2] sm:$0xff]  ;;  %vm2811_vm1 = vcmask 523264  }
 0x3a3   :  { %2847 = vmatprep.mubr.bf16.mxu0 %v4331_v25  ;;  %v2800_v30 = vld [vmem:[#allocation2 + $0x28] sm:$0xff]  ;;  %2815 = vmatprep.subr.bf16.mxu0 %v2796_v15  ;;  %v2799_v60 = vld [vmem:[#allocation2 + $0x20] sm:$0xff]  ;;  %v2798_v59 = vld [vmem:[#allocation2 + $0x18] sm:$0xff] }
 0x3a4   :  { %2816 = vmatpush1.bf16.msra.mxu0 %v2795_v16  ;;  %v2804_v54 = vld [vmem:[#allocation2 + $0x48] sm:$0xff]  ;;  %v2803_v2 = vld [vmem:[#allocation2 + $0x40] sm:$0xff]  ;;  %v2797_v7 = vld [vmem:[#allocation2 + $0x10] sm:$0xff] }
 0x3a5   :  { %2817 = vmatprep.subr.bf16.mxu0 %v2800_v30  ;;  %v2808_v50 = vld [vmem:[#allocation2 + $0x68] sm:$0xff]  ;;  %v2807_v10 = vld [vmem:[#allocation2 + $0x60] sm:$0xff]  ;;  %v2802_v11 = vld [vmem:[#allocation2 + $0x38] sm:$0xff] }
 0x3a6   :  { %v2801_v46 = vld [vmem:[#allocation2 + $0x30] sm:$0xff]  ;;  %v2806_v32 = vld [vmem:[#allocation2 + $0x58] sm:$0xff]  ;;  %v2923_v49 = vld [vmem:[#allocation2 + $0x88] sm:$0xff] }
 0x3a7   :  { %v2805_v12 = vld [vmem:[#allocation2 + $0x50] sm:$0xff]  ;;  %v2810_v42 = vld [vmem:[#allocation2 + $0x78] sm:$0xff]  ;;  %v2922_v31 = vld [vmem:[#allocation2 + $0x80] sm:$0xff] }
 0x3a8   :  { %2818 = vmatpush1.bf16.msra.mxu0 %v2799_v60  ;;  %v2809_v1 = vld [vmem:[#allocation2 + $0x70] sm:$0xff]  ;;  %v2927_v62 = vld [vmem:[#allocation2 + $0xa8] sm:$0xff]  ;;  %v2926_v57 = vld [vmem:[#allocation2 + $0xa0] sm:$0xff] }
 0x3a9   :  { %2819 = vmatprep.subr.bf16.mxu0 %v2804_v54  ;;  %v2931_v13 = vld [vmem:[#allocation2 + $0xc8] sm:$0xff]  ;;  %v2930_v17 = vld [vmem:[#allocation2 + $0xc0] sm:$0xff]  ;;  %v2925_v45 = vld [vmem:[#allocation2 + $0x98] sm:$0xff] }
 0x3aa   :  { %v2935_v27 = vld [vmem:[#allocation2 + $0xe8] sm:$0xff]  ;;  %v2934_v53 = vld [vmem:[#allocation2 + $0xe0] sm:$0xff]  ;;  %v2924_v51 = vld [vmem:[#allocation2 + $0x90] sm:$0xff] }
 0x3ab   :  { %v2929_v63 = vld [vmem:[#allocation2 + $0xb8] sm:$0xff]  ;;  %v2932_v33 = vld [vmem:[#allocation2 + $0xd0] sm:$0xff]  ;;  %v3028_v41 = vld [vmem:[#allocation2 + $0x108] sm:$0xff] }
 0x3ac   :  { %2820 = vmatpush1.bf16.msra.mxu0 %v2803_v2  ;;  %v2933_v8 = vld [vmem:[#allocation2 + $0xd8] sm:$0xff]  ;;  %v2936_v47 = vld [vmem:[#allocation2 + $0xf0] sm:$0xff]  ;;  %v3027_v61 = vld [vmem:[#allocation2 + $0x100] sm:$0xff] }
 0x3ad   :  { %2821 = vmatprep.subr.bf16.mxu0 %v2808_v50  ;;  %v2937_v3 = vld [vmem:[#allocation2 + $0xf8] sm:$0xff]  ;;  %v3032_v37 = vld [vmem:[#allocation2 + $0x128] sm:$0xff]  ;;  %v3031_v56 = vld [vmem:[#allocation2 + $0x120] sm:$0xff] }
 0x3ae   :  { %v3036_v34 = vld [vmem:[#allocation2 + $0x148] sm:$0xff]  ;;  %v3035_v38 = vld [vmem:[#allocation2 + $0x140] sm:$0xff]  ;;  %v3030_v6 = vld [vmem:[#allocation2 + $0x118] sm:$0xff] }
 0x3af   :  { %v3040_v55 = vld [vmem:[#allocation2 + $0x168] sm:$0xff]  ;;  %v3039_v44 = vld [vmem:[#allocation2 + $0x160] sm:$0xff]  ;;  %v3029_v48 = vld [vmem:[#allocation2 + $0x110] sm:$0xff] }
 0x3b0   :  { %2822 = vmatpush1.bf16.msra.mxu0 %v2807_v10  ;;  %v3034_v35 = vld [vmem:[#allocation2 + $0x138] sm:$0xff]  ;;  %v3037_v4 = vld [vmem:[#allocation2 + $0x150] sm:$0xff]  ;;  %v3133_v40 = vld [vmem:[#allocation2 + $0x188] sm:$0xff] }
 0x3b1   :  { %2856 = vmatprep.subr.bf16.mxu0 %v2798_v59  ;;  %v3038_v39 = vld [vmem:[#allocation2 + $0x158] sm:$0xff]  ;;  %v3041_v0 = vld [vmem:[#allocation2 + $0x170] sm:$0xff]  ;;  %v3132_v5 = vld [vmem:[#allocation2 + $0x180] sm:$0xff] }
 0x3b2   :  { %v3042_v58 = vld [vmem:[#allocation2 + $0x178] sm:$0xff]  ;;  %v3137_v43 = vld [vmem:[#allocation2 + $0x1a8] sm:$0xff]  ;;  %v3136_v15 = vld [vmem:[#allocation2 + $0x1a0] sm:$0xff] }
 0x3b3   :  { %3714 = vmatmul.mubr.msk.bf16.vlgmr.msra.gmra.mrb[32].mxu0 %vm2811_vm1, %v5724_v36  ;;  %v3141_v16 = vld [vmem:[#allocation2 + $0x1c8] sm:$0xff]  ;;  %v3140_v30 = vld [vmem:[#allocation2 + $0x1c0] sm:$0xff]  ;;  %v3135_v2 = vld [vmem:[#allocation2 + $0x198] sm:$0xff] }
 0x3b4   :  { %2857 = vmatpush1.bf16.msra.mxu0 %v2797_v7  ;;  %2888 = vmatprep.mubr.bf16.mxu0 %v4331_v25  ;;  %v3145_v60 = vld [vmem:[#allocation2 + $0x1e8] sm:$0xff]  ;;  %v3144_v54 = vld [vmem:[#allocation2 + $0x1e0] sm:$0xff]  ;;  %v3134_v50 = vld [vmem:[#allocation2 + $0x190] sm:$0xff] }
 0x3b5   :  { %2858 = vmatprep.subr.bf16.mxu0 %v2802_v11  ;;  %v3139_v10 = vld [vmem:[#allocation2 + $0x1b8] sm:$0xff]  ;;  %v3142_v7 = vld [vmem:[#allocation2 + $0x1d0] sm:$0xff] }
 0x3b6   :  { %v3143_v59 = vld [vmem:[#allocation2 + $0x1d8] sm:$0xff] }
 0x3b7   :  { %v3147_v11 = vld [vmem:[#allocation2 + $0x1f8] sm:$0xff] }
 0x3b8   :  { %2859 = vmatpush1.bf16.msra.mxu0 %v2801_v46  ;;  %v3146_v46 = vld [vmem:[#allocation2 + $0x1f0] sm:$0xff] }
 0x3b9   :  { %2860 = vmatprep.subr.bf16.mxu0 %v2806_v32  ;;  %v2898_v32 = vlaneseq }
 0x3bc   :  { %2861 = vmatpush1.bf16.msra.mxu0 %v2805_v12  ;;  %v5775_v12 = vshrl.u32 %v2898_v32, 7 }
 0x3bd   :  { %2862 = vmatprep.subr.bf16.mxu0 %v2810_v42 }
 0x3be   :  { %v2904_v42 = vsub.s32 1, %v5775_v12 }
 0x3c0   :  { %2863 = vmatpush1.bf16.msra.mxu0 %v2809_v1 }
 0x3c1   :  { %2941 = vmatprep.subr.bf16.mxu0 %v2923_v49  ;;  %v2905_v49 = vrot.slane %v5087_v26, %v2904_v42 }
 0x3c3   :  { %3715 = vmatmul.mubr.msk.bf16.vlgmr.msra.gmra.mrb[36].mxu0 %vm2811_vm1, %v5724_v36  ;;  %v2928_v36 = vld [vmem:[#allocation2 + $0xb0] sm:$0xff] }
 0x3c4   :  { %2942 = vmatpush1.bf16.msra.mxu0 %v2922_v31  ;;  %2973 = vmatprep.mubr.bf16.mxu0 %v4331_v25 }
 0x3c5   :  { %2943 = vmatprep.subr.bf16.mxu0 %v2927_v62  ;;  %v3241_v62 = vstv %s5081_s25 }
 0x3c8   :  { %2944 = vmatpush1.bf16.msra.mxu0 %v2926_v57 }
 0x3c9   :  { %2945 = vmatprep.subr.bf16.mxu0 %v2931_v13 }
 0x3cc   :  { %2946 = vmatpush1.bf16.msra.mxu0 %v2930_v17 }
 0x3cd   :  { %2947 = vmatprep.subr.bf16.mxu0 %v2935_v27 }
 0x3d0   :  { %2948 = vmatpush1.bf16.msra.mxu0 %v2934_v53 }
 0x3d1   :  { %2982 = vmatprep.subr.bf16.mxu0 %v2925_v45 }
 0x3d3   :  { %3716 = vmatmul.mubr.msk.bf16.vlgmr.msra.gmra.mrb[32].mxu0 %vm2811_vm1, %v5735_v52 }
 0x3d4   :  { %2983 = vmatpush1.bf16.msra.mxu0 %v2924_v51  ;;  %3014 = vmatprep.mubr.bf16.mxu0 %v4331_v25 }
 0x3d5   :  { %2984 = vmatprep.subr.bf16.mxu0 %v2929_v63 }
 0x3d8   :  { %2985 = vmatpush1.bf16.msra.mxu0 %v2928_v36  ;;  %v2908_v36 = vsub.s32 2, %v5775_v12 }
 0x3d9   :  { %2986 = vmatprep.subr.bf16.mxu0 %v2933_v8  ;;  %v2912_v8 = vsub.s32 3, %v5775_v12 }
 0x3dc   :  { %2987 = vmatpush1.bf16.msra.mxu0 %v2932_v33  ;;  %v2909_v33 = vrot.slane %v5087_v26, %v2908_v36 }
 0x3dd   :  { %2988 = vmatprep.subr.bf16.mxu0 %v2937_v3  ;;  %v2913_v3 = vrot.slane %v5087_v26, %v2912_v8 }
 0x3e0   :  { %2989 = vmatpush1.bf16.msra.mxu0 %v2936_v47 }
 0x3e1   :  { %3046 = vmatprep.subr.bf16.mxu0 %v3028_v41 }
 0x3e3   :  { %3717 = vmatmul.mubr.msk.bf16.vlgmr.msra.gmra.mrb[36].mxu0 %vm2811_vm1, %v5735_v52  ;;  %v3033_v52 = vld [vmem:[#allocation2 + $0x130] sm:$0xff] }
 0x3e4   :  { %3047 = vmatpush1.bf16.msra.mxu0 %v3027_v61  ;;  %3078 = vmatprep.mubr.bf16.mxu0 %v4331_v25 }
 0x3e5   :  { %3048 = vmatprep.subr.bf16.mxu0 %v3032_v37 }
 0x3e8   :  { %3049 = vmatpush1.bf16.msra.mxu0 %v3031_v56 }
 0x3e9   :  { %3050 = vmatprep.subr.bf16.mxu0 %v3036_v34 }
 0x3ec   :  { %3051 = vmatpush1.bf16.msra.mxu0 %v3035_v38 }
 0x3ed   :  { %3052 = vmatprep.subr.bf16.mxu0 %v3040_v55 }
 0x3f0   :  { %3053 = vmatpush1.bf16.msra.mxu0 %v3039_v44 }
 0x3f1   :  { %3087 = vmatprep.subr.bf16.mxu0 %v3030_v6 }
 0x3f3   :  { %3718 = vmatmul.mubr.msk.bf16.vlgmr.msra.gmra.mrb[32].mxu0 %vm2811_vm1, %v5745_v9 }
 0x3f4   :  { %3088 = vmatpush1.bf16.msra.mxu0 %v3029_v48  ;;  %3119 = vmatprep.mubr.bf16.mxu0 %v4331_v25 }
 0x3f5   :  { %3089 = vmatprep.subr.bf16.mxu0 %v3034_v35 }
 0x3f8   :  { %3090 = vmatpush1.bf16.msra.mxu0 %v3033_v52 }
 0x3f9   :  { %3091 = vmatprep.subr.bf16.mxu0 %v3038_v39 }
 0x3fc   :  { %3092 = vmatpush1.bf16.msra.mxu0 %v3037_v4 }
 0x3fd   :  { %3093 = vmatprep.subr.bf16.mxu0 %v3042_v58 }
 0x400   :  { %3094 = vmatpush1.bf16.msra.mxu0 %v3041_v0 }
 0x401   :  { %3151 = vmatprep.subr.bf16.mxu0 %v3133_v40 }
 0x403   :  { %3719 = vmatmul.mubr.msk.bf16.vlgmr.msra.gmra.mrb[36].mxu0 %vm2811_vm1, %v5745_v9  ;;  %v3138_v9 = vld [vmem:[#allocation2 + $0x1b0] sm:$0xff] }
 0x404   :  { %3152 = vmatpush1.bf16.msra.mxu0 %v3132_v5  ;;  %3183 = vmatprep.mubr.bf16.mxu0 %v4331_v25 }
 0x405   :  { %3153 = vmatprep.subr.bf16.mxu0 %v3137_v43 }
 0x408   :  { %3154 = vmatpush1.bf16.msra.mxu0 %v3136_v15 }
 0x409   :  { %3155 = vmatprep.subr.bf16.mxu0 %v3141_v16 }
 0x40c   :  { %3156 = vmatpush1.bf16.msra.mxu0 %v3140_v30 }
 0x40d   :  { %3157 = vmatprep.subr.bf16.mxu0 %v3145_v60 }
 0x410   :  { %3158 = vmatpush1.bf16.msra.mxu0 %v3144_v54 }
 0x411   :  { %3192 = vmatprep.subr.bf16.mxu0 %v3135_v2 }
 0x413   :  { %3720 = vmatmul.mubr.msk.bf16.vlgmr.msra.gmra.mrb[32].mxu0 %vm2811_vm1, %v5749_v14 }
 0x414   :  { %3193 = vmatpush1.bf16.msra.mxu0 %v3134_v50  ;;  %3224 = vmatprep.mubr.bf16.mxu0 %v4331_v25  ;;  %v2900_v25 = vsub.s32 0, %v5775_v12 }
 0x415   :  { %3194 = vmatprep.subr.bf16.mxu0 %v3139_v10 }
 0x416   :  { %v2901_v1 = vrot.slane %v5087_v26, %v2900_v25 }
 0x418   :  { %3195 = vmatpush1.bf16.msra.mxu0 %v3138_v9 }
 0x419   :  { %3196 = vmatprep.subr.bf16.mxu0 %v3143_v59 }
 0x41c   :  { %3197 = vmatpush1.bf16.msra.mxu0 %v3142_v7 }
 0x41d   :  { %3198 = vmatprep.subr.bf16.mxu0 %v3147_v11 }
 0x420   :  { %3199 = vmatpush1.bf16.msra.mxu0 %v3146_v46 }
 0x423   :  { %3721 = vmatmul.mubr.msk.bf16.vlgmr.msra.gmra.mrb[36].mxu0 %vm2811_vm1, %v5749_v14 }
 0x4e6   :  { %v3185_v31 = vpop.f32.mrb[32].mxu0 }
 0x4e7   :  { %v4162_v57 = vadd.f32 %v3185_v31, %v2901_v1  ;;  %v3187_v13 = vpop.f32.mrb[33].mxu0 }
 0x4e8   :  { %v4163_v14 = vadd.f32 %v3187_v13, %v2905_v49  ;;  %v3189_v17 = vpop.f32.mrb[34].mxu0 }
 0x4e9   :  { %vm3237_vm7 = vcmp.gt.f32.partialorder %v4162_v57, 0.0  ;;  %v3242_v27 = vmul.f32 %v4162_v57, %v3241_v62  ;;  %v3190_v53 = vpop.f32.mrb[35].mxu0 }
 0x4ea   :  { %vm3238_vm8 = vcmp.gt.f32.partialorder %v4163_v14, 0.0  ;;  %v3243_v45 = vmul.f32 %v4163_v14, %v3241_v62 }
 0x4eb   :  { %v5786_v51 = vsel %vm3237_vm7, %v4162_v57, %v3242_v27 }
 0x4ec   :  { %v3247_v63 = vsel %vm3238_vm8, %v4163_v14, %v3243_v45 }
 0x4f6   :  { %v3226_v47 = vpop.f32.mrb[36].mxu0 }
 0x4f7   :  { %v4164_v41 = vadd.f32 %v3226_v47, %v2909_v33  ;;  %v3228_v61 = vpop.f32.mrb[37].mxu0 }
 0x4f8   :  { %v4165_v37 = vadd.f32 %v3228_v61, %v2913_v3  ;;  %v3230_v56 = vpop.f32.mrb[38].mxu0 }
 0x4f9   :  { %vm3239_vm9 = vcmp.gt.f32.partialorder %v4164_v41, 0.0  ;;  %v3244_v34 = vmul.f32 %v4164_v41, %v3241_v62  ;;  %v3231_v38 = vpop.f32.mrb[39].mxu0 }
 0x4fa   :  { %vm3240_vm10 = vcmp.gt.f32.partialorder %v4165_v37, 0.0  ;;  %v3245_v55 = vmul.f32 %v4165_v37, %v3241_v62 }
 0x4fb   :  { %v5792_v44 = vsel %vm3239_vm9, %v4164_v41, %v3244_v34 }
 0x4fc   :  { %v5794_v6 = vsel %vm3240_vm10, %v4165_v37, %v3245_v55 }
 0x4fd   :  { %4319 = dma.done.wait [#allocation6 + $0x1], 8192 }
 0x4fe   :  { %4320 = vsyncadd [#allocation6 + $0x1], 4294959104  ;;  %v3255_v48 = vpack.c.bf16 %v3247_v63, %v3247_v63  ;;  %v3259_v35 = vld [vmem:[#allocation3 + $0x8] sm:$0xff]  ;;  %v3258_v26 = vld [vmem:[#allocation3] sm:$0xff]  ;;  %v3254_v53 = vpack.c.bf16 %v5786_v51, %v5786_v51  ;;  %v3257_v45 = vpack.c.bf16 %v5794_v6, %v5794_v6 }
 0x4ff   :  { %v3261_v52 = vld [vmem:[#allocation3 + $0x18] sm:$0xff]  ;;  %3333 = vmatprep.subr.bf16.mxu1 %v3259_v35  ;;  %v3260_v39 = vld [vmem:[#allocation3 + $0x10] sm:$0xff]  ;;  %v3263_v4 = vld [vmem:[#allocation3 + $0x28] sm:$0xff] }
 0x500   :  { %3365 = vmatprep.mubr.bf16.mxu1 %v3255_v48  ;;  %3334 = vmatpush1.bf16.msra.mxu1 %v3258_v26  ;;  %v3262_v58 = vld [vmem:[#allocation3 + $0x20] sm:$0xff]  ;;  %v3265_v0 = vld [vmem:[#allocation3 + $0x38] sm:$0xff]  ;;  %v3264_v40 = vld [vmem:[#allocation3 + $0x30] sm:$0xff] }
 0x501   :  { %3335 = vmatprep.subr.bf16.mxu1 %v3261_v52  ;;  %v3267_v5 = vld [vmem:[#allocation3 + $0x48] sm:$0xff]  ;;  %v3266_v43 = vld [vmem:[#allocation3 + $0x40] sm:$0xff]  ;;  %v3269_v15 = vld [vmem:[#allocation3 + $0x58] sm:$0xff] }
 0x502   :  { %v3268_v16 = vld [vmem:[#allocation3 + $0x50] sm:$0xff]  ;;  %v3271_v30 = vld [vmem:[#allocation3 + $0x68] sm:$0xff]  ;;  %v3270_v60 = vld [vmem:[#allocation3 + $0x60] sm:$0xff] }
 0x503   :  { %v3273_v54 = vld [vmem:[#allocation3 + $0x78] sm:$0xff]  ;;  %v3272_v2 = vld [vmem:[#allocation3 + $0x70] sm:$0xff]  ;;  %v3275_v50 = vld [vmem:[#allocation3 + $0x88] sm:$0xff] }
 0x504   :  { %3336 = vmatpush1.bf16.msra.mxu1 %v3260_v39  ;;  %v3274_v10 = vld [vmem:[#allocation3 + $0x80] sm:$0xff]  ;;  %v3277_v9 = vld [vmem:[#allocation3 + $0x98] sm:$0xff]  ;;  %v3276_v59 = vld [vmem:[#allocation3 + $0x90] sm:$0xff] }
 0x505   :  { %3337 = vmatprep.subr.bf16.mxu1 %v3263_v4  ;;  %v3279_v7 = vld [vmem:[#allocation3 + $0xa8] sm:$0xff]  ;;  %v3278_v11 = vld [vmem:[#allocation3 + $0xa0] sm:$0xff]  ;;  %v3281_v46 = vld [vmem:[#allocation3 + $0xb8] sm:$0xff] }
 0x506   :  { %v3280_v32 = vld [vmem:[#allocation3 + $0xb0] sm:$0xff]  ;;  %v3283_v1 = vld [vmem:[#allocation3 + $0xc8] sm:$0xff]  ;;  %v3282_v49 = vld [vmem:[#allocation3 + $0xc0] sm:$0xff] }
 0x507   :  { %v3285_v31 = vld [vmem:[#allocation3 + $0xd8] sm:$0xff]  ;;  %v3284_v62 = vld [vmem:[#allocation3 + $0xd0] sm:$0xff]  ;;  %v3287_v57 = vld [vmem:[#allocation3 + $0xe8] sm:$0xff] }
 0x508   :  { %3338 = vmatpush1.bf16.msra.mxu1 %v3262_v58  ;;  %v3286_v13 = vld [vmem:[#allocation3 + $0xe0] sm:$0xff]  ;;  %v3289_v14 = vld [vmem:[#allocation3 + $0xf8] sm:$0xff]  ;;  %v3288_v17 = vld [vmem:[#allocation3 + $0xf0] sm:$0xff] }
 0x509   :  { %3339 = vmatprep.subr.bf16.mxu1 %v3265_v0  ;;  %v3291_v27 = vld [vmem:[#allocation3 + $0x108] sm:$0xff]  ;;  %v3290_v63 = vld [vmem:[#allocation3 + $0x100] sm:$0xff]  ;;  %v3293_v36 = vld [vmem:[#allocation3 + $0x118] sm:$0xff] }
 0x50a   :  { %v3292_v8 = vld [vmem:[#allocation3 + $0x110] sm:$0xff]  ;;  %v3295_v33 = vld [vmem:[#allocation3 + $0x128] sm:$0xff]  ;;  %v3294_v3 = vld [vmem:[#allocation3 + $0x120] sm:$0xff] }
 0x50b   :  { %v3297_v47 = vld [vmem:[#allocation3 + $0x138] sm:$0xff]  ;;  %v3296_v51 = vld [vmem:[#allocation3 + $0x130] sm:$0xff]  ;;  %v3299_v41 = vld [vmem:[#allocation3 + $0x148] sm:$0xff] }
 0x50c   :  { %3340 = vmatpush1.bf16.msra.mxu1 %v3264_v40  ;;  %v3298_v61 = vld [vmem:[#allocation3 + $0x140] sm:$0xff]  ;;  %v3301_v37 = vld [vmem:[#allocation3 + $0x158] sm:$0xff]  ;;  %v3300_v56 = vld [vmem:[#allocation3 + $0x150] sm:$0xff] }
 0x50d   :  { %3341 = vmatprep.subr.bf16.mxu1 %v3267_v5  ;;  %v3303_v34 = vld [vmem:[#allocation3 + $0x168] sm:$0xff]  ;;  %v3302_v38 = vld [vmem:[#allocation3 + $0x160] sm:$0xff]  ;;  %v3305_v55 = vld [vmem:[#allocation3 + $0x178] sm:$0xff] }
 0x50e   :  { %v3304_v6 = vld [vmem:[#allocation3 + $0x170] sm:$0xff]  ;;  %v3307_v48 = vld [vmem:[#allocation3 + $0x188] sm:$0xff]  ;;  %v3306_v35 = vld [vmem:[#allocation3 + $0x180] sm:$0xff] }
 0x50f   :  { %v3309_v26 = vld [vmem:[#allocation3 + $0x198] sm:$0xff]  ;;  %v3308_v52 = vld [vmem:[#allocation3 + $0x190] sm:$0xff]  ;;  %v3311_v39 = vld [vmem:[#allocation3 + $0x1a8] sm:$0xff] }
 0x510   :  { %3342 = vmatpush1.bf16.msra.mxu1 %v3266_v43  ;;  %v3310_v4 = vld [vmem:[#allocation3 + $0x1a0] sm:$0xff]  ;;  %v3313_v58 = vld [vmem:[#allocation3 + $0x1b8] sm:$0xff]  ;;  %v3312_v0 = vld [vmem:[#allocation3 + $0x1b0] sm:$0xff] }
 0x511   :  { %3343 = vmatprep.subr.bf16.mxu1 %v3269_v15  ;;  %v3315_v40 = vld [vmem:[#allocation3 + $0x1c8] sm:$0xff]  ;;  %v3314_v5 = vld [vmem:[#allocation3 + $0x1c0] sm:$0xff]  ;;  %v3317_v43 = vld [vmem:[#allocation3 + $0x1d8] sm:$0xff] }
 0x512   :  { %v3316_v15 = vld [vmem:[#allocation3 + $0x1d0] sm:$0xff] }
 0x514   :  { %3344 = vmatpush1.bf16.msra.mxu1 %v3268_v16  ;;  %v3319_v16 = vld [vmem:[#allocation3 + $0x1e8] sm:$0xff] }
 0x515   :  { %3345 = vmatprep.subr.bf16.mxu1 %v3271_v30  ;;  %v3318_v30 = vld [vmem:[#allocation3 + $0x1e0] sm:$0xff] }
 0x518   :  { %3346 = vmatpush1.bf16.msra.mxu1 %v3270_v60  ;;  %v3321_v60 = vld [vmem:[#allocation3 + $0x1f8] sm:$0xff] }
 0x519   :  { %3347 = vmatprep.subr.bf16.mxu1 %v3273_v54  ;;  %v3320_v54 = vld [vmem:[#allocation3 + $0x1f0] sm:$0xff] }
 0x51c   :  { %3348 = vmatpush1.bf16.msra.mxu1 %v3272_v2  ;;  %v3256_v2 = vpack.c.bf16 %v5792_v44, %v5792_v44 }
 0x51d   :  { %3349 = vmatprep.subr.bf16.mxu1 %v3275_v50  ;;  %v3326_v50 = vrot.slane %v5092_v28, %v2900_v25 }
 0x520   :  { %3350 = vmatpush1.bf16.msra.mxu1 %v3274_v10  ;;  %v3330_v10 = vrot.slane %v5092_v28, %v2904_v42 }
 0x521   :  { %3351 = vmatprep.subr.bf16.mxu1 %v3277_v9 }
 0x524   :  { %3352 = vmatpush1.bf16.msra.mxu1 %v3276_v59  ;;  %v3417_v59 = vstv %s5083_s26 }
 0x525   :  { %3353 = vmatprep.subr.bf16.mxu1 %v3279_v7 }
 0x528   :  { %3354 = vmatpush1.bf16.msra.mxu1 %v3278_v11 }
 0x529   :  { %3355 = vmatprep.subr.bf16.mxu1 %v3281_v46 }
 0x52c   :  { %3356 = vmatpush1.bf16.msra.mxu1 %v3280_v32 }
 0x52d   :  { %3357 = vmatprep.subr.bf16.mxu1 %v3283_v1 }
 0x530   :  { %3358 = vmatpush1.bf16.msra.mxu1 %v3282_v49 }
 0x531   :  { %3359 = vmatprep.subr.bf16.mxu1 %v3285_v31 }
 0x534   :  { %3360 = vmatpush1.bf16.msra.mxu1 %v3284_v62 }
 0x535   :  { %3361 = vmatprep.subr.bf16.mxu1 %v3287_v57 }
 0x538   :  { %3362 = vmatpush1.bf16.msra.mxu1 %v3286_v13 }
 0x539   :  { %3363 = vmatprep.subr.bf16.mxu1 %v3289_v14 }
 0x53c   :  { %3364 = vmatpush1.bf16.msra.mxu1 %v3288_v17 }
 0x53d   :  { %3374 = vmatprep.subr.bf16.mxu1 %v3291_v27 }
 0x53f   :  { %3366 = vmatmul.mubr.bf16.vlgmr.msra.gmra.mrb[16].mxu1 %v3254_v53 }
 0x540   :  { %3375 = vmatpush1.bf16.msra.mxu1 %v3290_v63  ;;  %3406 = vmatprep.mubr.bf16.mxu1 %v3257_v45 }
 0x541   :  { %3376 = vmatprep.subr.bf16.mxu1 %v3293_v36 }
 0x544   :  { %3377 = vmatpush1.bf16.msra.mxu1 %v3292_v8 }
 0x545   :  { %3378 = vmatprep.subr.bf16.mxu1 %v3295_v33 }
 0x548   :  { %3379 = vmatpush1.bf16.msra.mxu1 %v3294_v3 }
 0x549   :  { %3380 = vmatprep.subr.bf16.mxu1 %v3297_v47 }
 0x54c   :  { %3381 = vmatpush1.bf16.msra.mxu1 %v3296_v51 }
 0x54d   :  { %3382 = vmatprep.subr.bf16.mxu1 %v3299_v41 }
 0x550   :  { %3383 = vmatpush1.bf16.msra.mxu1 %v3298_v61 }
 0x551   :  { %3384 = vmatprep.subr.bf16.mxu1 %v3301_v37 }
 0x554   :  { %3385 = vmatpush1.bf16.msra.mxu1 %v3300_v56 }
 0x555   :  { %3386 = vmatprep.subr.bf16.mxu1 %v3303_v34 }
 0x558   :  { %3387 = vmatpush1.bf16.msra.mxu1 %v3302_v38 }
 0x559   :  { %3388 = vmatprep.subr.bf16.mxu1 %v3305_v55 }
 0x55c   :  { %3389 = vmatpush1.bf16.msra.mxu1 %v3304_v6 }
 0x55d   :  { %3390 = vmatprep.subr.bf16.mxu1 %v3307_v48 }
 0x560   :  { %3391 = vmatpush1.bf16.msra.mxu1 %v3306_v35 }
 0x561   :  { %3392 = vmatprep.subr.bf16.mxu1 %v3309_v26 }
 0x564   :  { %3393 = vmatpush1.bf16.msra.mxu1 %v3308_v52 }
 0x565   :  { %3394 = vmatprep.subr.bf16.mxu1 %v3311_v39 }
 0x568   :  { %3395 = vmatpush1.bf16.msra.mxu1 %v3310_v4 }
 0x569   :  { %3396 = vmatprep.subr.bf16.mxu1 %v3313_v58 }
 0x56c   :  { %3397 = vmatpush1.bf16.msra.mxu1 %v3312_v0 }
 0x56d   :  { %3398 = vmatprep.subr.bf16.mxu1 %v3315_v40 }
 0x570   :  { %3399 = vmatpush1.bf16.msra.mxu1 %v3314_v5 }
 0x571   :  { %3400 = vmatprep.subr.bf16.mxu1 %v3317_v43 }
 0x574   :  { %3401 = vmatpush1.bf16.msra.mxu1 %v3316_v15 }
 0x575   :  { %3402 = vmatprep.subr.bf16.mxu1 %v3319_v16 }
 0x578   :  { %3403 = vmatpush1.bf16.msra.mxu1 %v3318_v30 }
 0x579   :  { %3404 = vmatprep.subr.bf16.mxu1 %v3321_v60 }
 0x57c   :  { %3405 = vmatpush1.bf16.msra.mxu1 %v3320_v54 }
 0x57f   :  { %3407 = vmatmul.mubr.bf16.vlgmr.msra.gmra.mrb[16].mxu1 %v3256_v2 }
 0x652   :  { %v3408_v9 = vpop.f32.mrb[16].mxu1 }
 0x653   :  { %v4166_v7 = vadd.f32 %v3408_v9, %v3326_v50  ;;  %v3410_v11 = vpop.f32.mrb[17].mxu1 }
 0x654   :  { %v4167_v46 = vadd.f32 %v3410_v11, %v3330_v10  ;;  %v3412_v32 = vpop.f32.mrb[18].mxu1 }
 0x655   :  { %vm3415_vm11 = vcmp.gt.f32.partialorder %v4166_v7, 0.0  ;;  %v3418_v1 = vmul.f32 %v4166_v7, %v3417_v59  ;;  %v3413_v49 = vpop.f32.mrb[19].mxu1 }
 0x656   :  { %vm3416_vm12 = vcmp.gt.f32.partialorder %v4167_v46, 0.0  ;;  %v3419_v44 = vmul.f32 %v4167_v46, %v3417_v59 }
 0x657   :  { %v3420_v31 = vsel %vm3415_vm11, %v4166_v7, %v3418_v1 }
 0x658   :  { %v3421_v62 = vsel %vm3416_vm12, %v4167_v46, %v3419_v44 }
 0x659   :  { %4321 = dma.done.wait [#allocation6 + $0x2], 2048 }
 0x65a   :  { %4322 = vsyncadd [#allocation6 + $0x2], 4294965248  ;;  %v3426_v25 = vpack.c.bf16 %v3421_v62, %v3421_v62  ;;  %v3435_v12 = vld [vmem:[#allocation4 + $0x40] sm:$0xff]  ;;  %v3436_v28 = vld [vmem:[#allocation4 + $0x48] sm:$0xff]  ;;  %v3425_v51 = vpack.c.bf16 %v3420_v31, %v3420_v31  ;;  %v3484_v34 = vstv %s5085_s27 }
 0x65b   :  { %v3427_v57 = vld [vmem:[#allocation4] sm:$0xff]  ;;  %3847 = vmatprep.subr.bf16.mxu0 %v3435_v12  ;;  %v3428_v42 = vld [vmem:[#allocation4 + $0x8] sm:$0xff]  ;;  %v3437_v13 = vld [vmem:[#allocation4 + $0x50] sm:$0xff] }
 0x65c   :  { %3475 = vmatprep.mubr.bf16.mxu0 %v3426_v25  ;;  %3848 = vmatpush3.bf16.msra.mxu0 %v3427_v57  ;;  %v3429_v14 = vld [vmem:[#allocation4 + $0x10] sm:$0xff]  ;;  %v3438_v17 = vld [vmem:[#allocation4 + $0x58] sm:$0xff]  ;;  %v3439_v53 = vld [vmem:[#allocation4 + $0x60] sm:$0xff] }
 0x65d   :  { %3849 = vmatprep.subr.bf16.mxu0 %v3436_v28  ;;  %v3430_v27 = vld [vmem:[#allocation4 + $0x18] sm:$0xff]  ;;  %v3431_v45 = vld [vmem:[#allocation4 + $0x20] sm:$0xff]  ;;  %v3440_v63 = vld [vmem:[#allocation4 + $0x68] sm:$0xff] }
 0x65e   :  { %v3432_v36 = vld [vmem:[#allocation4 + $0x28] sm:$0xff]  ;;  %v3441_v8 = vld [vmem:[#allocation4 + $0x70] sm:$0xff]  ;;  %v3442_v3 = vld [vmem:[#allocation4 + $0x78] sm:$0xff] }
 0x65f   :  { %v3433_v33 = vld [vmem:[#allocation4 + $0x30] sm:$0xff]  ;;  %v3434_v47 = vld [vmem:[#allocation4 + $0x38] sm:$0xff] }
 0x660   :  { %3850 = vmatpush3.bf16.msra.mxu0 %v3428_v42 }
 0x661   :  { %3851 = vmatprep.subr.bf16.mxu0 %v3437_v13 }
 0x664   :  { %3852 = vmatpush3.bf16.msra.mxu0 %v3429_v14 }
 0x665   :  { %3853 = vmatprep.subr.bf16.mxu0 %v3438_v17 }
 0x668   :  { %3854 = vmatpush3.bf16.msra.mxu0 %v3430_v27 }
 0x669   :  { %3855 = vmatprep.subr.bf16.mxu0 %v3439_v53 }
 0x66c   :  { %3856 = vmatpush3.bf16.msra.mxu0 %v3431_v45 }
 0x66d   :  { %3857 = vmatprep.subr.bf16.mxu0 %v3440_v63 }
 0x670   :  { %3858 = vmatpush3.bf16.msra.mxu0 %v3432_v36 }
 0x671   :  { %3859 = vmatprep.subr.bf16.mxu0 %v3441_v8 }
 0x674   :  { %3860 = vmatpush3.bf16.msra.mxu0 %v3433_v33 }
 0x675   :  { %3861 = vmatprep.subr.bf16.mxu0 %v3442_v3 }
 0x678   :  { %3862 = vmatpush3.bf16.msra.mxu0 %v3434_v47 }
 0x67b   :  { %3476 = vmatmul.mubr.bf16.vlgmr.msra.gmra.mrb[40].mxu0 %v3425_v51 }
 0x74e   :  { %v3863_v41 = vpop.f32.mrb[40].mxu0 }
 0x74f   :  { %v3864_v61 = vpop.f32.mrb[41].mxu0 }
 0x750   :  { %v3865_v37 = vadd.f32 %v3864_v61, %v3863_v41  ;;  %v3866_v56 = vpop.f32.mrb[42].mxu0 }
 0x751   :  { %v3867_v38 = vpop.f32.mrb[43].mxu0 }
 0x752   :  { %v3478_v55 = vadd.f32 %v3865_v37, %v5094_v29 }
 0x754   :  { %vm3483_vm13 = vcmp.gt.f32.partialorder %v3478_v55, 0.0  ;;  %v3485_v6 = vmul.f32 %v3484_v34, %v3478_v55 }
 0x756   :  { %v3486_v48 = vsel %vm3483_vm13, %v3478_v55, %v3485_v6 }
 0x757   :  { %4323 = dma.done.wait [#allocation6 + $0x3], 1024 }
 0x758   :  { %4324 = vsyncadd [#allocation6 + $0x3], 4294966272  ;;  %v4332_v35 = vmov 0.0   ;;  %vm4333_vm14 = vmmov 0   ;;  %v5836_v29 = vld [vmem:[#allocation24_spill] sm:$0xff]  ;;  %v5837_v26 = vld [vmem:[#allocation25_spill] sm:$0xff] }
 0x759   :  { %4070 = vmatprep.subr.bf16.mxu0 %v4332_v35  ;;  %4086 = vmatprep.mubr.msk.bf16.mxu0 %vm4333_vm14, %v4332_v35 }
 0x75a   :  { %4071 = vmatpush3.bf16.msra.mxu0 %v5032_v18  ;;  %v3491_v18 = vpack.c.bf16 %v3486_v48, %v3486_v48 }
 0x75b   :  { %4072 = vmatprep.subr.bf16.mxu0 %v4332_v35 }
 0x75e   :  { %4073 = vmatpush3.bf16.msra.mxu0 %v5037_v19 }
 0x75f   :  { %4074 = vmatprep.subr.bf16.mxu0 %v4332_v35 }
 0x762   :  { %4075 = vmatpush3.bf16.msra.mxu0 %v5042_v20 }
 0x763   :  { %4076 = vmatprep.subr.bf16.mxu0 %v4332_v35 }
 0x766   :  { %4077 = vmatpush3.bf16.msra.mxu0 %v5047_v21 }
 0x767   :  { %4078 = vmatprep.subr.bf16.mxu0 %v4332_v35 }
 0x76a   :  { %4079 = vmatpush3.bf16.msra.mxu0 %v5052_v22 }
 0x76b   :  { %4080 = vmatprep.subr.bf16.mxu0 %v4332_v35 }
 0x76e   :  { %4081 = vmatpush3.bf16.msra.mxu0 %v5057_v23 }
 0x76f   :  { %4082 = vmatprep.subr.bf16.mxu0 %v4332_v35 }
 0x772   :  { %4083 = vmatpush3.bf16.msra.mxu0 %v5062_v24 }
 0x773   :  { %4084 = vmatprep.subr.bf16.mxu0 %v4332_v35 }
 0x776   :  { %4085 = vmatpush3.bf16.msra.mxu0 %v5836_v29 }
 0x779   :  { %4087 = vmatmul.mubr.bf16.vlgmr.msra.gmra.mrb[44].mxu0 %v3491_v18 }
 0x84c   :  { %v3534_v19 = vpop.f32.mrb[44].mxu0 }
 0x84d   :  { %v3535_v20 = vadd.f32 %v3534_v19, %v5837_v26  ;;  %v4088_v52 = vpop.f32.mrb[45].mxu0 }
 0x84e   :  { %v3537_v39 = vpop.f32.mrb[46].mxu0 }
 0x84f   :  { %3540 = vst [vmem:[%s5832_s9] sm:$0xff] %v3535_v20  ;;  %v4089_v21 = vpop.f32.mrb[47].mxu0 }
 0x850   :  { %3545 = vsyncpa [#allocation8], 1 }
 0x851   :  { %3546 = vsyncpa [#allocation9], 1 }
 0x852   :  { %3547 = vsyncmov [#allocation6] }
 0x855   :  { %s3548_s27 = vpop.sfrf %3547 }
 0x856   :  { %p3722_p7 = scmp.ne.s32.totalorder %s3548_s27, 0 }
 0x858   :  { %3552 = shalt.err (%p3722_p7)  }
 0x859   :  { %3554 = vsyncmov [#allocation6 + $0x1] }
 0x85c   :  { %s3555_s11 = vpop.sfrf %3554 }
 0x85d   :  { %p3723_p8 = scmp.ne.s32.totalorder %s3555_s11, 0 }
 0x85f   :  { %3559 = shalt.err (%p3723_p8)  }
 0x860   :  { %3561 = vsyncmov [#allocation6 + $0x2] }
 0x863   :  { %s3562_s12 = vpop.sfrf %3561 }
 0x864   :  { %p3724_p9 = scmp.ne.s32.totalorder %s3562_s12, 0 }
 0x866   :  { %3566 = shalt.err (%p3724_p9)  }
 0x867   :  { %3568 = vsyncmov [#allocation6 + $0x3] }
 0x86a   :  { %s3569_s13 = vpop.sfrf %3568 }
 0x86b   :  { %p3725_p10 = scmp.ne.s32.totalorder %s3569_s13, 0 }
 0x86d   :  { %3573 = shalt.err (%p3725_p10)  }

</bundles_post_ra>
